<compile_context>
chip_gen: v6e
topology: v6e:2x2x1
jax: 0.10.0
libtpu: 0.0.40
codegen_flags: <defaults>
</compile_context>

<pallas_src>
import functools

import jax
import jax.numpy as jnp
from jax.experimental import pallas as pl
from jax.experimental.pallas import tpu as pltpu

LANE = 128          # lane padding multiple (channel / K dims)
TM_MM = 256         # matmul M tile (good fill for the 256-wide v6e/v7x MXU)
TK_MAX = 512        # max K chunk per grid step (bounds per-step VMEM)
TM_EW = 512         # elementwise M tile (mem-bound -> big tiles)


def _round_up(v, m):
    return (v + m - 1) // m * m


# ---------------------------- Pallas kernels ----------------------------

def _make_matmul_kernel(act, want_stats):
    """C[i] = act(sum_k A[i,k] @ W[k] + b); optional BN partial stats epilogue."""

    def kernel(a_ref, w_ref, b_ref, o_ref, *rest):
        if want_stats:
            stats_ref, acc_ref = rest
        else:
            stats_ref = None
            (acc_ref,) = rest

        k = pl.program_id(1)

        @pl.when(k == 0)
        def _():
            acc_ref[...] = jnp.zeros_like(acc_ref)

        acc_ref[...] += jnp.dot(a_ref[...], w_ref[...],
                                preferred_element_type=jnp.float32)

        @pl.when(k == pl.num_programs(1) - 1)
        def _():
            y = acc_ref[...] + b_ref[...]
            if act == "tanh":
                y = jnp.tanh(y)
            elif act == "relu":
                y = jnp.maximum(y, 0.0)
            o_ref[...] = y.astype(o_ref.dtype)
            if want_stats:
                sums = jnp.sum(y, axis=0, keepdims=True)        # (1, Np)
                sq = jnp.sum(y * y, axis=0, keepdims=True)      # (1, Np)
                stats_ref[...] = jnp.concatenate([sums, sq], axis=0)[None]

    return kernel


def _make_affine_kernel(act, has_res):
    """o = act(x * scale + shift) (+ residual), per-channel broadcast."""

    def kernel(x_ref, s_ref, t_ref, *rest):
        if has_res:
            r_ref, o_ref = rest
        else:
            r_ref = None
            (o_ref,) = rest
        y = x_ref[...].astype(jnp.float32) * s_ref[...] + t_ref[...]
        if act == "relu":
            y = jnp.maximum(y, 0.0)
        elif act == "tanh":
            y = jnp.tanh(y)
        if has_res:
            y = y + r_ref[...].astype(jnp.float32)
        o_ref[...] = y.astype(o_ref.dtype)

    return kernel


# --------------------------- kernel wrappers ---------------------------

def matmul_fused(A, W, b, act="none", want_stats=False):
    """bf16 (M,K)@(K,N) + b with f32 accumulation on the MXU.

    Returns (out[:M,:N] (bf16), stats (2,N) f32 or None) where stats holds
    per-channel sum and sum-of-squares of the (pre-activation) output.
    """
    M, K = A.shape
    K2, N = W.shape
    assert K == K2

    Np = _round_up(N, LANE)
    tm = min(TM_MM, _round_up(M, 8))
    Mp = _round_up(M, tm)
    Kp = _round_up(K, LANE)
    if Kp <= TK_MAX:
        tk = Kp
    else:
        tk = LANE
        for cand in (512, 448, 384, 320, 256, 192, 128):
            if cand <= TK_MAX and Kp % cand == 0:
                tk = cand
                break
    nk = Kp // tk

    A = A.astype(jnp.bfloat16)
    W = W.astype(jnp.bfloat16)
    if (Mp, Kp) != (M, K):
        A = jnp.pad(A, ((0, Mp - M), (0, Kp - K)))
    if (Kp, Np) != (K, N):
        W = jnp.pad(W, ((0, Kp - K), (0, Np - N)))
    bp = jnp.pad(b.astype(jnp.float32), (0, Np - N)).reshape(1, Np)

    n_mtiles = Mp // tm
    in_specs = [pl.BlockSpec((tm, tk), lambda i, k: (i, k)),
                pl.BlockSpec((tk, Np), lambda i, k: (k, 0)),
                pl.BlockSpec((1, Np), lambda i, k: (0, 0))]
    if want_stats:
        out_shape = (jax.ShapeDtypeStruct((Mp, Np), jnp.bfloat16),
                     jax.ShapeDtypeStruct((n_mtiles, 2, Np), jnp.float32))
        out_specs = (pl.BlockSpec((tm, Np), lambda i, k: (i, 0)),
                     pl.BlockSpec((1, 2, Np), lambda i, k: (i, 0, 0)))
    else:
        out_shape = jax.ShapeDtypeStruct((Mp, Np), jnp.bfloat16)
        out_specs = pl.BlockSpec((tm, Np), lambda i, k: (i, 0))

    outs = pl.pallas_call(
        _make_matmul_kernel(act, want_stats),
        out_shape=out_shape,
        grid=(n_mtiles, nk),
        in_specs=in_specs,
        out_specs=out_specs,
        scratch_shapes=[pltpu.VMEM((tm, Np), jnp.float32)],
        compiler_params=pltpu.CompilerParams(
            dimension_semantics=("parallel", "arbitrary")),
    )(A, W, bp)

    if want_stats:
        out, stats = outs
        stats = jnp.sum(stats, axis=0)[:, :N]     # (2, N): [sum, sum_sq]
    else:
        out, stats = outs, None
    out = out[:M, :N] if (Mp, Np) != (M, N) else out
    return out, stats


def affine_act(X, scale, shift, act="none", residual=None):
    """y = act(X * scale + shift) (+ residual) in a Pallas elementwise kernel."""
    M, N = X.shape
    Np = _round_up(N, LANE)
    tm = TM_EW if M >= TM_EW else _round_up(M, 8)
    Mp = _round_up(M, tm)

    Xp = X.astype(jnp.bfloat16)
    if (Mp, Np) != (M, N):
        Xp = jnp.pad(Xp, ((0, Mp - M), (0, Np - N)))
    sp = jnp.pad(scale.astype(jnp.float32), (0, Np - N)).reshape(1, Np)
    tp = jnp.pad(shift.astype(jnp.float32), (0, Np - N)).reshape(1, Np)

    inputs = [Xp, sp, tp]
    in_specs = [pl.BlockSpec((tm, Np), lambda i: (i, 0)),
                pl.BlockSpec((1, Np), lambda i: (0, 0)),
                pl.BlockSpec((1, Np), lambda i: (0, 0))]
    has_res = residual is not None
    if has_res:
        Rp = residual.astype(jnp.bfloat16)
        if (Mp, Np) != (M, N):
            Rp = jnp.pad(Rp, ((0, Mp - M), (0, Np - N)))
        inputs.append(Rp)
        in_specs.append(pl.BlockSpec((tm, Np), lambda i: (i, 0)))

    out = pl.pallas_call(
        _make_affine_kernel(act, has_res),
        out_shape=jax.ShapeDtypeStruct((Mp, Np), jnp.bfloat16),
        grid=(Mp // tm,),
        in_specs=in_specs,
        out_specs=pl.BlockSpec((tm, Np), lambda i: (i, 0)),
        compiler_params=pltpu.CompilerParams(dimension_semantics=("parallel",)),
    )(*inputs)
    return out[:M, :N] if (Mp, Np) != (M, N) else out


# ------------------------------ JAX glue ------------------------------

def conv2d(x, w, b, stride=1, pad=0, pad_mode="zero", act="none", want_stats=False):
    """x: NHWC (bf16), w: (O, I, kh, kw). Returns (flat (M,O), stats, out NHWC shape)."""
    if pad > 0:
        mode = "reflect" if pad_mode == "reflect" else "constant"
        x = jnp.pad(x, ((0, 0), (pad, pad), (pad, pad), (0, 0)), mode=mode)
    N, Hp, Wp, C = x.shape
    O, I, kh, kw = w.shape
    Hout = (Hp - kh) // stride + 1
    Wout = (Wp - kw) // stride + 1
    # TODO(synk): im2col is still materialized in HBM (kh*kw x activation bytes,
    # in bf16); a fully in-kernel shifted-window gather (manual DMA over pl.ANY
    # refs) would remove this remaining traffic.
    cols = []
    for i in range(kh):
        for j in range(kw):
            cols.append(x[:, i:i + (Hout - 1) * stride + 1:stride,
                           j:j + (Wout - 1) * stride + 1:stride, :])
    A = jnp.concatenate(cols, axis=-1).reshape(N * Hout * Wout, kh * kw * C)
    Wm = jnp.transpose(w, (2, 3, 1, 0)).reshape(kh * kw * I, O)
    if b is None:
        b = jnp.zeros((O,), jnp.float32)
    flat, stats = matmul_fused(A, Wm, b, act=act, want_stats=want_stats)
    return flat, stats, (N, Hout, Wout, O)


def conv_transpose2d_subpixel(x, w_t, b, want_stats=True):
    """ConvTranspose2d(k=3, s=2, p=1, output_padding=1) as 4 sub-pixel convs.

    x: NHWC, w_t: (I, O, 3, 3) (PyTorch ConvTranspose2d layout).
    Returns (out NHWC (N, 2H, 2W, O), stats (2,O) summed over pieces, count).
    """
    N, H, W, C = x.shape
    I, O, kh, kw = w_t.shape
    assert kh == 3 and kw == 3
    w = jnp.transpose(w_t, (1, 0, 2, 3))            # (O, I, 3, 3)
    xp = jnp.pad(x, ((0, 0), (0, 1), (0, 1), (0, 0)))  # zero row bottom, col right

    # Parity-decomposed kernels (Conv2d (O, I, kh, kw) layout).
    k_ee = w[:, :, 1:2, 1:2]                                                  # 1x1
    k_eo = jnp.stack([w[:, :, 1, 2], w[:, :, 1, 0]], axis=-1)[:, :, None, :]  # 1x2
    k_oe = jnp.stack([w[:, :, 2, 1], w[:, :, 0, 1]], axis=-1)[:, :, :, None]  # 2x1
    k_oo = jnp.stack([
        jnp.stack([w[:, :, 2, 2], w[:, :, 2, 0]], axis=-1),
        jnp.stack([w[:, :, 0, 2], w[:, :, 0, 0]], axis=-1),
    ], axis=-2)                                                               # 2x2

    f_ee, s_ee, _ = conv2d(x,               k_ee, b, want_stats=want_stats)
    f_eo, s_eo, _ = conv2d(xp[:, :H, :, :], k_eo, b, want_stats=want_stats)
    f_oe, s_oe, _ = conv2d(xp[:, :, :W, :], k_oe, b, want_stats=want_stats)
    f_oo, s_oo, _ = conv2d(xp,              k_oo, b, want_stats=want_stats)

    ee = f_ee.reshape(N, H, W, O)
    eo = f_eo.reshape(N, H, W, O)
    oe = f_oe.reshape(N, H, W, O)
    oo = f_oo.reshape(N, H, W, O)
    top = jnp.stack([ee, eo], axis=3)      # (N, H, W, 2, O)  -> column parity
    bot = jnp.stack([oe, oo], axis=3)
    full = jnp.stack([top, bot], axis=2)   # (N, H, 2, W, 2, O) -> row parity
    out = full.reshape(N, 2 * H, 2 * W, O)

    stats = None
    if want_stats:
        stats = s_ee + s_eo + s_oe + s_oo
    count = N * 2 * H * 2 * W
    return out, stats, count


def batchnorm_apply(flat, stats, count, gamma, beta, act="none",
                    residual=None, eps=1e-5):
    # BatchNorm2d in training mode: biased batch statistics over (N, H, W).
    # The sum / sum-of-squares reduction was fused into the matmul epilogue;
    # only the tiny per-channel finalization happens here in plain JAX.
    mean = stats[0] / count
    var = jnp.maximum(stats[1] / count - mean * mean, 0.0)
    scale = gamma / jnp.sqrt(var + eps)
    shift = beta - mean * scale
    return affine_act(flat, scale, shift, act=act, residual=residual)


# --------------------------- model definition ---------------------------

def init_params(key, input_nc, output_nc, ngf, n_blocks):
    # norm_layer = BatchNorm2d (default) => use_bias = False for all inner convs.
    params = {}
    keys = iter(jax.random.split(key, 64))

    def conv_w(k, o, i, ksz):
        return 0.02 * jax.random.normal(k, (o, i, ksz, ksz), jnp.float32)

    params["c0_w"] = conv_w(next(keys), ngf, input_nc, 7)
    params["c0_bn"] = (jnp.ones((ngf,), jnp.float32), jnp.zeros((ngf,), jnp.float32))
    for i in range(2):
        mult = 2 ** i
        oc = ngf * mult * 2
        params[f"down{i}_w"] = conv_w(next(keys), oc, ngf * mult, 3)
        params[f"down{i}_bn"] = (jnp.ones((oc,), jnp.float32), jnp.zeros((oc,), jnp.float32))
    dim = ngf * 4
    for b in range(n_blocks):
        params[f"blk{b}_w1"] = conv_w(next(keys), dim, dim, 3)
        params[f"blk{b}_bn1"] = (jnp.ones((dim,), jnp.float32), jnp.zeros((dim,), jnp.float32))
        params[f"blk{b}_w2"] = conv_w(next(keys), dim, dim, 3)
        params[f"blk{b}_bn2"] = (jnp.ones((dim,), jnp.float32), jnp.zeros((dim,), jnp.float32))
    for i in range(2):
        mult = 2 ** (2 - i)
        ic, oc = ngf * mult, ngf * mult // 2
        params[f"up{i}_w"] = 0.02 * jax.random.normal(next(keys), (ic, oc, 3, 3), jnp.float32)
        params[f"up{i}_bn"] = (jnp.ones((oc,), jnp.float32), jnp.zeros((oc,), jnp.float32))
    params["cf_w"] = conv_w(next(keys), output_nc, ngf, 7)
    params["cf_b"] = jnp.zeros((output_nc,), jnp.float32)
    return params


def resnet_generator(x_nchw, params, ngf, n_blocks):
    x = jnp.transpose(x_nchw, (0, 2, 3, 1)).astype(jnp.bfloat16)  # NCHW -> NHWC

    # ReflectionPad2d(3) + Conv2d(input_nc, ngf, 7) + BN + ReLU
    flat, stats, shp = conv2d(x, params["c0_w"], None, stride=1, pad=3,
                              pad_mode="reflect", want_stats=True)
    flat = batchnorm_apply(flat, stats, shp[0] * shp[1] * shp[2],
                           *params["c0_bn"], act="relu")
    x = flat.reshape(shp)

    # 2x downsample: Conv2d(k=3, s=2, p=1) + BN + ReLU
    for i in range(2):
        flat, stats, shp = conv2d(x, params[f"down{i}_w"], None, stride=2, pad=1,
                                  pad_mode="zero", want_stats=True)
        flat = batchnorm_apply(flat, stats, shp[0] * shp[1] * shp[2],
                               *params[f"down{i}_bn"], act="relu")
        x = flat.reshape(shp)

    # n_blocks ResnetBlocks (reflect pad, 3x3 conv, BN, ReLU, reflect pad, 3x3 conv, BN, +x)
    for b in range(n_blocks):
        res_flat = x.reshape(-1, x.shape[-1])
        flat, stats, shp = conv2d(x, params[f"blk{b}_w1"], None, stride=1, pad=1,
                                  pad_mode="reflect", want_stats=True)
        flat = batchnorm_apply(flat, stats, shp[0] * shp[1] * shp[2],
                               *params[f"blk{b}_bn1"], act="relu")
        h = flat.reshape(shp)
        flat, stats, shp = conv2d(h, params[f"blk{b}_w2"], None, stride=1, pad=1,
                                  pad_mode="reflect", want_stats=True)
        flat = batchnorm_apply(flat, stats, shp[0] * shp[1] * shp[2],
                               *params[f"blk{b}_bn2"], act="none", residual=res_flat)
        x = flat.reshape(shp)

    # 2x upsample: ConvTranspose2d(k=3, s=2, p=1, op=1) as sub-pixel convs + BN + ReLU
    for i in range(2):
        up, stats, count = conv_transpose2d_subpixel(x, params[f"up{i}_w"], None,
                                                     want_stats=True)
        flat = up.reshape(-1, up.shape[-1])
        flat = batchnorm_apply(flat, stats, count, *params[f"up{i}_bn"], act="relu")
        x = flat.reshape(up.shape)

    # ReflectionPad2d(3) + Conv2d(ngf, output_nc, 7, bias=True) + Tanh (fused in matmul)
    flat, _, shp = conv2d(x, params["cf_w"], params["cf_b"], stride=1, pad=3,
                          pad_mode="reflect", act="tanh", want_stats=False)
    x = flat.reshape(shp)

    return jnp.transpose(x, (0, 3, 1, 2)).astype(jnp.float32)  # NHWC -> NCHW


if __name__ == "__main__":
    key = jax.random.PRNGKey(0)
    kx, kp = jax.random.split(key)
    batch, input_nc, output_nc, ngf, n_blocks, H = 2, 3, 3, 8, 2, 16
    x = jax.random.normal(kx, (batch, input_nc, H, H), jnp.float32)
    params = init_params(kp, input_nc, output_nc, ngf, n_blocks)

    fwd = jax.jit(functools.partial(resnet_generator, ngf=ngf, n_blocks=n_blocks))
    y = fwd(x, params)
    jax.block_until_ready(y)
    assert y.shape == (batch, output_nc, H, H), y.shape
    assert bool(jnp.all(jnp.isfinite(y)))
    print("KERNEL_OK")
</pallas_src>

<mosaic_0001>
module attributes {stable_mosaic.version = 11 : i64} {
  func.func @kernel(%arg0: i32, %arg1: i32, %arg2: memref<256x256xbf16, #tpu.memory_space<vmem>>, %arg3: memref<256x128xbf16, #tpu.memory_space<vmem>>, %arg4: memref<1x128xf32, #tpu.memory_space<vmem>>, %arg5: memref<256x128xbf16, #tpu.memory_space<vmem>>, %arg6: memref<1x2x128xf32, #tpu.memory_space<vmem>>, %arg7: memref<256x128xf32, #tpu.memory_space<vmem>>) attributes {dimension_semantics = [#tpu.dimension_semantics<parallel>, #tpu.dimension_semantics<arbitrary>], iteration_bounds = array<i64: 2, 1>, scalar_prefetch = 0 : i64, scratch_operands = 1 : i64, tpu.core_type = #tpu.core_type<tc>, window_params = [{transform_indices = @transform_0, window_bounds = array<i64: 256, 256>}, {transform_indices = @transform_1, window_bounds = array<i64: 256, 128>}, {pipeline_mode = #tpu.pipeline_mode<synchronous>, transform_indices = @transform_2, window_bounds = array<i64: 1, 128>}, {transform_indices = @transform_3, window_bounds = array<i64: 256, 128>}, {transform_indices = @transform_4, window_bounds = array<i64: 1, 2, 128>}]} {
    %c0_i32 = arith.constant 0 : i32
    %0 = arith.cmpi eq, %arg1, %c0_i32 : i32
    %1 = arith.extui %0 : i1 to i32
    %c0_i32_0 = arith.constant 0 : i32
    %2 = arith.cmpi ne, %1, %c0_i32_0 : i32
    scf.if %2 {
      %cst_10 = arith.constant 0.000000e+00 : f32
      %12 = vector.broadcast %cst_10 : f32 to vector<256x128xf32>
      %c0_11 = arith.constant 0 : index
      %c0_12 = arith.constant 0 : index
      %13 = vector.load %arg7[%c0_11, %c0_12] : memref<256x128xf32, #tpu.memory_space<vmem>>, vector<256x128xf32>
      tpu.vector_store %arg7[%c0_11, %c0_12], %12 {strides = array<i32>} : memref<256x128xf32, #tpu.memory_space<vmem>>, vector<256x128xf32>,
    } else {
    }
    %c0 = arith.constant 0 : index
    %c0_1 = arith.constant 0 : index
    %3 = vector.load %arg7[%c0, %c0_1] : memref<256x128xf32, #tpu.memory_space<vmem>>, vector<256x128xf32>
    %c0_2 = arith.constant 0 : index
    %c0_3 = arith.constant 0 : index
    %4 = vector.load %arg2[%c0_2, %c0_3] : memref<256x256xbf16, #tpu.memory_space<vmem>>, vector<256x256xbf16>
    %c0_4 = arith.constant 0 : index
    %c0_5 = arith.constant 0 : index
    %5 = vector.load %arg3[%c0_4, %c0_5] : memref<256x128xbf16, #tpu.memory_space<vmem>>, vector<256x128xbf16>
    %cst = arith.constant dense<0.000000e+00> : vector<256x128xf32>
    %6 = tpu.matmul %4, %5, %cst {dimension_numbers = #tpu.dot_dimension_numbers<[1], [0], [0], [1], [0, 0, 1, 1], [], []>} : vector<256x256xbf16>, vector<256x128xbf16>, vector<256x128xf32> -> vector<256x128xf32>
    %7 = arith.addf %3, %6 : vector<256x128xf32>
    %c0_6 = arith.constant 0 : index
    %c0_7 = arith.constant 0 : index
    %8 = vector.load %arg7[%c0_6, %c0_7] : memref<256x128xf32, #tpu.memory_space<vmem>>, vector<256x128xf32>
    tpu.vector_store %arg7[%c0_6, %c0_7], %7 {strides = array<i32>} : memref<256x128xf32, #tpu.memory_space<vmem>>, vector<256x128xf32>,
    %c0_i32_8 = arith.constant 0 : i32
    %9 = arith.cmpi eq, %arg1, %c0_i32_8 : i32
    %10 = arith.extui %9 : i1 to i32
    %c0_i32_9 = arith.constant 0 : i32
    %11 = arith.cmpi ne, %10, %c0_i32_9 : i32
    scf.if %11 {
      %c0_10 = arith.constant 0 : index
      %c0_11 = arith.constant 0 : index
      %12 = vector.load %arg7[%c0_10, %c0_11] : memref<256x128xf32, #tpu.memory_space<vmem>>, vector<256x128xf32>
      %c0_12 = arith.constant 0 : index
      %c0_13 = arith.constant 0 : index
      %13 = vector.load %arg4[%c0_12, %c0_13] : memref<1x128xf32, #tpu.memory_space<vmem>>, vector<1x128xf32>
      %14 = vector.broadcast %13 : vector<1x128xf32> to vector<256x128xf32>
      %15 = arith.addf %12, %14 : vector<256x128xf32>
      %16 = arith.truncf %15 : vector<256x128xf32> to vector<256x128xbf16>
      %c0_14 = arith.constant 0 : index
      %c0_15 = arith.constant 0 : index
      %17 = vector.load %arg5[%c0_14, %c0_15] : memref<256x128xbf16, #tpu.memory_space<vmem>>, vector<256x128xbf16>
      tpu.vector_store %arg5[%c0_14, %c0_15], %16 {strides = array<i32>} : memref<256x128xbf16, #tpu.memory_space<vmem>>, vector<256x128xbf16>,
      %cst_16 = arith.constant dense<0.000000e+00> : vector<128xf32>
      %18 = vector.multi_reduction <add>, %15, %cst_16 [0] : vector<256x128xf32> to vector<128xf32>
      %19 = vector.shape_cast %18 : vector<128xf32> to vector<1x128xf32>
      %20 = arith.mulf %15, %15 : vector<256x128xf32>
      %cst_17 = arith.constant dense<0.000000e+00> : vector<128xf32>
      %21 = vector.multi_reduction <add>, %20, %cst_17 [0] : vector<256x128xf32> to vector<128xf32>
      %22 = vector.shape_cast %21 : vector<128xf32> to vector<1x128xf32>
      %23 = tpu.concatenate %19, %22 in 0 : vector<1x128xf32>, vector<1x128xf32> -> vector<2x128xf32>
      %24 = vector.shape_cast %23 : vector<2x128xf32> to vector<1x2x128xf32>
      %c0_18 = arith.constant 0 : index
      %c0_19 = arith.constant 0 : index
      %c0_20 = arith.constant 0 : index
      %25 = vector.load %arg6[%c0_18, %c0_19, %c0_20] : memref<1x2x128xf32, #tpu.memory_space<vmem>>, vector<1x2x128xf32>
      tpu.vector_store %arg6[%c0_18, %c0_19, %c0_20], %24 {strides = array<i32>} : memref<1x2x128xf32, #tpu.memory_space<vmem>>, vector<1x2x128xf32>,
    } else {
    }
    return
  }
  func.func @transform_0(%arg0: i32, %arg1: i32) -> (i32, i32) {
    %c0_i32 = arith.constant 0 : i32
    return %arg0, %arg1 : i32, i32
  }
  func.func @transform_1(%arg0: i32, %arg1: i32) -> (i32, i32) {
    %c0_i32 = arith.constant 0 : i32
    %c0_i32_0 = arith.constant 0 : i32
    return %arg1, %c0_i32 : i32, i32
  }
  func.func @transform_2(%arg0: i32, %arg1: i32) -> (i32, i32) {
    %c0_i32 = arith.constant 0 : i32
    %c0_i32_0 = arith.constant 0 : i32
    %c0_i32_1 = arith.constant 0 : i32
    return %c0_i32, %c0_i32_0 : i32, i32
  }
  func.func @transform_3(%arg0: i32, %arg1: i32) -> (i32, i32) {
    %c0_i32 = arith.constant 0 : i32
    %c0_i32_0 = arith.constant 0 : i32
    return %arg0, %c0_i32 : i32, i32
  }
  func.func @transform_4(%arg0: i32, %arg1: i32) -> (i32, i32, i32) {
    %c0_i32 = arith.constant 0 : i32
    %c0_i32_0 = arith.constant 0 : i32
    %c0_i32_1 = arith.constant 0 : i32
    return %arg0, %c0_i32, %c0_i32_0 : i32, i32, i32
  }
}

module attributes {stable_mosaic.version = 11 : i64} {
  func.func @kernel(%arg0: i32, %arg1: memref<512x128xbf16, #tpu.memory_space<vmem>>, %arg2: memref<1x128xf32, #tpu.memory_space<vmem>>, %arg3: memref<1x128xf32, #tpu.memory_space<vmem>>, %arg4: memref<512x128xbf16, #tpu.memory_space<vmem>>) attributes {dimension_semantics = [#tpu.dimension_semantics<parallel>], iteration_bounds = array<i64: 1>, scalar_prefetch = 0 : i64, scratch_operands = 0 : i64, tpu.core_type = #tpu.core_type<tc>, window_params = [{transform_indices = @transform_0, window_bounds = array<i64: 512, 128>}, {pipeline_mode = #tpu.pipeline_mode<synchronous>, transform_indices = @transform_1, window_bounds = array<i64: 1, 128>}, {pipeline_mode = #tpu.pipeline_mode<synchronous>, transform_indices = @transform_2, window_bounds = array<i64: 1, 128>}, {transform_indices = @transform_3, window_bounds = array<i64: 512, 128>}]} {
    %c0 = arith.constant 0 : index
    %c0_0 = arith.constant 0 : index
    %0 = vector.load %arg1[%c0, %c0_0] : memref<512x128xbf16, #tpu.memory_space<vmem>>, vector<512x128xbf16>
    %1 = arith.extf %0 : vector<512x128xbf16> to vector<512x128xf32>
    %c0_1 = arith.constant 0 : index
    %c0_2 = arith.constant 0 : index
    %2 = vector.load %arg2[%c0_1, %c0_2] : memref<1x128xf32, #tpu.memory_space<vmem>>, vector<1x128xf32>
    %3 = vector.broadcast %2 : vector<1x128xf32> to vector<512x128xf32>
    %4 = arith.mulf %1, %3 : vector<512x128xf32>
    %c0_3 = arith.constant 0 : index
    %c0_4 = arith.constant 0 : index
    %5 = vector.load %arg3[%c0_3, %c0_4] : memref<1x128xf32, #tpu.memory_space<vmem>>, vector<1x128xf32>
    %6 = vector.broadcast %5 : vector<1x128xf32> to vector<512x128xf32>
    %7 = arith.addf %4, %6 : vector<512x128xf32>
    %cst = arith.constant 0.000000e+00 : f32
    %8 = vector.broadcast %cst : f32 to vector<512x128xf32>
    %9 = arith.maximumf %7, %8 : vector<512x128xf32>
    %10 = arith.truncf %9 : vector<512x128xf32> to vector<512x128xbf16>
    %c0_5 = arith.constant 0 : index
    %c0_6 = arith.constant 0 : index
    %11 = vector.load %arg4[%c0_5, %c0_6] : memref<512x128xbf16, #tpu.memory_space<vmem>>, vector<512x128xbf16>
    tpu.vector_store %arg4[%c0_5, %c0_6], %10 {strides = array<i32>} : memref<512x128xbf16, #tpu.memory_space<vmem>>, vector<512x128xbf16>,
    return
  }
  func.func @transform_0(%arg0: i32) -> (i32, i32) {
    %c0_i32 = arith.constant 0 : i32
    %c0_i32_0 = arith.constant 0 : i32
    return %arg0, %c0_i32 : i32, i32
  }
  func.func @transform_1(%arg0: i32) -> (i32, i32) {
    %c0_i32 = arith.constant 0 : i32
    %c0_i32_0 = arith.constant 0 : i32
    %c0_i32_1 = arith.constant 0 : i32
    return %c0_i32, %c0_i32_0 : i32, i32
  }
  func.func @transform_2(%arg0: i32) -> (i32, i32) {
    %c0_i32 = arith.constant 0 : i32
    %c0_i32_0 = arith.constant 0 : i32
    %c0_i32_1 = arith.constant 0 : i32
    return %c0_i32, %c0_i32_0 : i32, i32
  }
  func.func @transform_3(%arg0: i32) -> (i32, i32) {
    %c0_i32 = arith.constant 0 : i32
    %c0_i32_0 = arith.constant 0 : i32
    return %arg0, %c0_i32 : i32, i32
  }
}

module attributes {stable_mosaic.version = 11 : i64} {
  func.func @kernel(%arg0: i32, %arg1: i32, %arg2: memref<128x128xbf16, #tpu.memory_space<vmem>>, %arg3: memref<128x128xbf16, #tpu.memory_space<vmem>>, %arg4: memref<1x128xf32, #tpu.memory_space<vmem>>, %arg5: memref<128x128xbf16, #tpu.memory_space<vmem>>, %arg6: memref<1x2x128xf32, #tpu.memory_space<vmem>>, %arg7: memref<128x128xf32, #tpu.memory_space<vmem>>) attributes {dimension_semantics = [#tpu.dimension_semantics<parallel>, #tpu.dimension_semantics<arbitrary>], iteration_bounds = array<i64: 1, 1>, scalar_prefetch = 0 : i64, scratch_operands = 1 : i64, tpu.core_type = #tpu.core_type<tc>, window_params = [{transform_indices = @transform_0, window_bounds = array<i64: 128, 128>}, {transform_indices = @transform_1, window_bounds = array<i64: 128, 128>}, {pipeline_mode = #tpu.pipeline_mode<synchronous>, transform_indices = @transform_2, window_bounds = array<i64: 1, 128>}, {transform_indices = @transform_3, window_bounds = array<i64: 128, 128>}, {transform_indices = @transform_4, window_bounds = array<i64: 1, 2, 128>}]} {
    %c0_i32 = arith.constant 0 : i32
    %0 = arith.cmpi eq, %arg1, %c0_i32 : i32
    %1 = arith.extui %0 : i1 to i32
    %c0_i32_0 = arith.constant 0 : i32
    %2 = arith.cmpi ne, %1, %c0_i32_0 : i32
    scf.if %2 {
      %cst_10 = arith.constant 0.000000e+00 : f32
      %12 = vector.broadcast %cst_10 : f32 to vector<128x128xf32>
      %c0_11 = arith.constant 0 : index
      %c0_12 = arith.constant 0 : index
      %13 = vector.load %arg7[%c0_11, %c0_12] : memref<128x128xf32, #tpu.memory_space<vmem>>, vector<128x128xf32>
      tpu.vector_store %arg7[%c0_11, %c0_12], %12 {strides = array<i32>} : memref<128x128xf32, #tpu.memory_space<vmem>>, vector<128x128xf32>,
    } else {
    }
    %c0 = arith.constant 0 : index
    %c0_1 = arith.constant 0 : index
    %3 = vector.load %arg7[%c0, %c0_1] : memref<128x128xf32, #tpu.memory_space<vmem>>, vector<128x128xf32>
    %c0_2 = arith.constant 0 : index
    %c0_3 = arith.constant 0 : index
    %4 = vector.load %arg2[%c0_2, %c0_3] : memref<128x128xbf16, #tpu.memory_space<vmem>>, vector<128x128xbf16>
    %c0_4 = arith.constant 0 : index
    %c0_5 = arith.constant 0 : index
    %5 = vector.load %arg3[%c0_4, %c0_5] : memref<128x128xbf16, #tpu.memory_space<vmem>>, vector<128x128xbf16>
    %cst = arith.constant dense<0.000000e+00> : vector<128x128xf32>
    %6 = tpu.matmul %4, %5, %cst {dimension_numbers = #tpu.dot_dimension_numbers<[1], [0], [0], [1], [0, 0, 1, 1], [], []>} : vector<128x128xbf16>, vector<128x128xbf16>, vector<128x128xf32> -> vector<128x128xf32>
    %7 = arith.addf %3, %6 : vector<128x128xf32>
    %c0_6 = arith.constant 0 : index
    %c0_7 = arith.constant 0 : index
    %8 = vector.load %arg7[%c0_6, %c0_7] : memref<128x128xf32, #tpu.memory_space<vmem>>, vector<128x128xf32>
    tpu.vector_store %arg7[%c0_6, %c0_7], %7 {strides = array<i32>} : memref<128x128xf32, #tpu.memory_space<vmem>>, vector<128x128xf32>,
    %c0_i32_8 = arith.constant 0 : i32
    %9 = arith.cmpi eq, %arg1, %c0_i32_8 : i32
    %10 = arith.extui %9 : i1 to i32
    %c0_i32_9 = arith.constant 0 : i32
    %11 = arith.cmpi ne, %10, %c0_i32_9 : i32
    scf.if %11 {
      %c0_10 = arith.constant 0 : index
      %c0_11 = arith.constant 0 : index
      %12 = vector.load %arg7[%c0_10, %c0_11] : memref<128x128xf32, #tpu.memory_space<vmem>>, vector<128x128xf32>
      %c0_12 = arith.constant 0 : index
      %c0_13 = arith.constant 0 : index
      %13 = vector.load %arg4[%c0_12, %c0_13] : memref<1x128xf32, #tpu.memory_space<vmem>>, vector<1x128xf32>
      %14 = vector.broadcast %13 : vector<1x128xf32> to vector<128x128xf32>
      %15 = arith.addf %12, %14 : vector<128x128xf32>
      %16 = arith.truncf %15 : vector<128x128xf32> to vector<128x128xbf16>
      %c0_14 = arith.constant 0 : index
      %c0_15 = arith.constant 0 : index
      %17 = vector.load %arg5[%c0_14, %c0_15] : memref<128x128xbf16, #tpu.memory_space<vmem>>, vector<128x128xbf16>
      tpu.vector_store %arg5[%c0_14, %c0_15], %16 {strides = array<i32>} : memref<128x128xbf16, #tpu.memory_space<vmem>>, vector<128x128xbf16>,
      %cst_16 = arith.constant dense<0.000000e+00> : vector<128xf32>
      %18 = vector.multi_reduction <add>, %15, %cst_16 [0] : vector<128x128xf32> to vector<128xf32>
      %19 = vector.shape_cast %18 : vector<128xf32> to vector<1x128xf32>
      %20 = arith.mulf %15, %15 : vector<128x128xf32>
      %cst_17 = arith.constant dense<0.000000e+00> : vector<128xf32>
      %21 = vector.multi_reduction <add>, %20, %cst_17 [0] : vector<128x128xf32> to vector<128xf32>
      %22 = vector.shape_cast %21 : vector<128xf32> to vector<1x128xf32>
      %23 = tpu.concatenate %19, %22 in 0 : vector<1x128xf32>, vector<1x128xf32> -> vector<2x128xf32>
      %24 = vector.shape_cast %23 : vector<2x128xf32> to vector<1x2x128xf32>
      %c0_18 = arith.constant 0 : index
      %c0_19 = arith.constant 0 : index
      %c0_20 = arith.constant 0 : index
      %25 = vector.load %arg6[%c0_18, %c0_19, %c0_20] : memref<1x2x128xf32, #tpu.memory_space<vmem>>, vector<1x2x128xf32>
      tpu.vector_store %arg6[%c0_18, %c0_19, %c0_20], %24 {strides = array<i32>} : memref<1x2x128xf32, #tpu.memory_space<vmem>>, vector<1x2x128xf32>,
    } else {
    }
    return
  }
  func.func @transform_0(%arg0: i32, %arg1: i32) -> (i32, i32) {
    %c0_i32 = arith.constant 0 : i32
    return %arg0, %arg1 : i32, i32
  }
  func.func @transform_1(%arg0: i32, %arg1: i32) -> (i32, i32) {
    %c0_i32 = arith.constant 0 : i32
    %c0_i32_0 = arith.constant 0 : i32
    return %arg1, %c0_i32 : i32, i32
  }
  func.func @transform_2(%arg0: i32, %arg1: i32) -> (i32, i32) {
    %c0_i32 = arith.constant 0 : i32
    %c0_i32_0 = arith.constant 0 : i32
    %c0_i32_1 = arith.constant 0 : i32
    return %c0_i32, %c0_i32_0 : i32, i32
  }
  func.func @transform_3(%arg0: i32, %arg1: i32) -> (i32, i32) {
    %c0_i32 = arith.constant 0 : i32
    %c0_i32_0 = arith.constant 0 : i32
    return %arg0, %c0_i32 : i32, i32
  }
  func.func @transform_4(%arg0: i32, %arg1: i32) -> (i32, i32, i32) {
    %c0_i32 = arith.constant 0 : i32
    %c0_i32_0 = arith.constant 0 : i32
    %c0_i32_1 = arith.constant 0 : i32
    return %arg0, %c0_i32, %c0_i32_0 : i32, i32, i32
  }
}

module attributes {stable_mosaic.version = 11 : i64} {
  func.func @kernel(%arg0: i32, %arg1: memref<128x128xbf16, #tpu.memory_space<vmem>>, %arg2: memref<1x128xf32, #tpu.memory_space<vmem>>, %arg3: memref<1x128xf32, #tpu.memory_space<vmem>>, %arg4: memref<128x128xbf16, #tpu.memory_space<vmem>>) attributes {dimension_semantics = [#tpu.dimension_semantics<parallel>], iteration_bounds = array<i64: 1>, scalar_prefetch = 0 : i64, scratch_operands = 0 : i64, tpu.core_type = #tpu.core_type<tc>, window_params = [{transform_indices = @transform_0, window_bounds = array<i64: 128, 128>}, {pipeline_mode = #tpu.pipeline_mode<synchronous>, transform_indices = @transform_1, window_bounds = array<i64: 1, 128>}, {pipeline_mode = #tpu.pipeline_mode<synchronous>, transform_indices = @transform_2, window_bounds = array<i64: 1, 128>}, {transform_indices = @transform_3, window_bounds = array<i64: 128, 128>}]} {
    %c0 = arith.constant 0 : index
    %c0_0 = arith.constant 0 : index
    %0 = vector.load %arg1[%c0, %c0_0] : memref<128x128xbf16, #tpu.memory_space<vmem>>, vector<128x128xbf16>
    %1 = arith.extf %0 : vector<128x128xbf16> to vector<128x128xf32>
    %c0_1 = arith.constant 0 : index
    %c0_2 = arith.constant 0 : index
    %2 = vector.load %arg2[%c0_1, %c0_2] : memref<1x128xf32, #tpu.memory_space<vmem>>, vector<1x128xf32>
    %3 = vector.broadcast %2 : vector<1x128xf32> to vector<128x128xf32>
    %4 = arith.mulf %1, %3 : vector<128x128xf32>
    %c0_3 = arith.constant 0 : index
    %c0_4 = arith.constant 0 : index
    %5 = vector.load %arg3[%c0_3, %c0_4] : memref<1x128xf32, #tpu.memory_space<vmem>>, vector<1x128xf32>
    %6 = vector.broadcast %5 : vector<1x128xf32> to vector<128x128xf32>
    %7 = arith.addf %4, %6 : vector<128x128xf32>
    %cst = arith.constant 0.000000e+00 : f32
    %8 = vector.broadcast %cst : f32 to vector<128x128xf32>
    %9 = arith.maximumf %7, %8 : vector<128x128xf32>
    %10 = arith.truncf %9 : vector<128x128xf32> to vector<128x128xbf16>
    %c0_5 = arith.constant 0 : index
    %c0_6 = arith.constant 0 : index
    %11 = vector.load %arg4[%c0_5, %c0_6] : memref<128x128xbf16, #tpu.memory_space<vmem>>, vector<128x128xbf16>
    tpu.vector_store %arg4[%c0_5, %c0_6], %10 {strides = array<i32>} : memref<128x128xbf16, #tpu.memory_space<vmem>>, vector<128x128xbf16>,
    return
  }
  func.func @transform_0(%arg0: i32) -> (i32, i32) {
    %c0_i32 = arith.constant 0 : i32
    %c0_i32_0 = arith.constant 0 : i32
    return %arg0, %c0_i32 : i32, i32
  }
  func.func @transform_1(%arg0: i32) -> (i32, i32) {
    %c0_i32 = arith.constant 0 : i32
    %c0_i32_0 = arith.constant 0 : i32
    %c0_i32_1 = arith.constant 0 : i32
    return %c0_i32, %c0_i32_0 : i32, i32
  }
  func.func @transform_2(%arg0: i32) -> (i32, i32) {
    %c0_i32 = arith.constant 0 : i32
    %c0_i32_0 = arith.constant 0 : i32
    %c0_i32_1 = arith.constant 0 : i32
    return %c0_i32, %c0_i32_0 : i32, i32
  }
  func.func @transform_3(%arg0: i32) -> (i32, i32) {
    %c0_i32 = arith.constant 0 : i32
    %c0_i32_0 = arith.constant 0 : i32
    return %arg0, %c0_i32 : i32, i32
  }
}

module attributes {stable_mosaic.version = 11 : i64} {
  func.func @kernel(%arg0: i32, %arg1: i32, %arg2: memref<32x256xbf16, #tpu.memory_space<vmem>>, %arg3: memref<256x128xbf16, #tpu.memory_space<vmem>>, %arg4: memref<1x128xf32, #tpu.memory_space<vmem>>, %arg5: memref<32x128xbf16, #tpu.memory_space<vmem>>, %arg6: memref<1x2x128xf32, #tpu.memory_space<vmem>>, %arg7: memref<32x128xf32, #tpu.memory_space<vmem>>) attributes {dimension_semantics = [#tpu.dimension_semantics<parallel>, #tpu.dimension_semantics<arbitrary>], iteration_bounds = array<i64: 1, 1>, scalar_prefetch = 0 : i64, scratch_operands = 1 : i64, tpu.core_type = #tpu.core_type<tc>, window_params = [{transform_indices = @transform_0, window_bounds = array<i64: 32, 256>}, {transform_indices = @transform_1, window_bounds = array<i64: 256, 128>}, {pipeline_mode = #tpu.pipeline_mode<synchronous>, transform_indices = @transform_2, window_bounds = array<i64: 1, 128>}, {transform_indices = @transform_3, window_bounds = array<i64: 32, 128>}, {transform_indices = @transform_4, window_bounds = array<i64: 1, 2, 128>}]} {
    %c0_i32 = arith.constant 0 : i32
    %0 = arith.cmpi eq, %arg1, %c0_i32 : i32
    %1 = arith.extui %0 : i1 to i32
    %c0_i32_0 = arith.constant 0 : i32
    %2 = arith.cmpi ne, %1, %c0_i32_0 : i32
    scf.if %2 {
      %cst_10 = arith.constant 0.000000e+00 : f32
      %12 = vector.broadcast %cst_10 : f32 to vector<32x128xf32>
      %c0_11 = arith.constant 0 : index
      %c0_12 = arith.constant 0 : index
      %13 = vector.load %arg7[%c0_11, %c0_12] : memref<32x128xf32, #tpu.memory_space<vmem>>, vector<32x128xf32>
      tpu.vector_store %arg7[%c0_11, %c0_12], %12 {strides = array<i32>} : memref<32x128xf32, #tpu.memory_space<vmem>>, vector<32x128xf32>,
    } else {
    }
    %c0 = arith.constant 0 : index
    %c0_1 = arith.constant 0 : index
    %3 = vector.load %arg7[%c0, %c0_1] : memref<32x128xf32, #tpu.memory_space<vmem>>, vector<32x128xf32>
    %c0_2 = arith.constant 0 : index
    %c0_3 = arith.constant 0 : index
    %4 = vector.load %arg2[%c0_2, %c0_3] : memref<32x256xbf16, #tpu.memory_space<vmem>>, vector<32x256xbf16>
    %c0_4 = arith.constant 0 : index
    %c0_5 = arith.constant 0 : index
    %5 = vector.load %arg3[%c0_4, %c0_5] : memref<256x128xbf16, #tpu.memory_space<vmem>>, vector<256x128xbf16>
    %cst = arith.constant dense<0.000000e+00> : vector<32x128xf32>
    %6 = tpu.matmul %4, %5, %cst {dimension_numbers = #tpu.dot_dimension_numbers<[1], [0], [0], [1], [0, 0, 1, 1], [], []>} : vector<32x256xbf16>, vector<256x128xbf16>, vector<32x128xf32> -> vector<32x128xf32>
    %7 = arith.addf %3, %6 : vector<32x128xf32>
    %c0_6 = arith.constant 0 : index
    %c0_7 = arith.constant 0 : index
    %8 = vector.load %arg7[%c0_6, %c0_7] : memref<32x128xf32, #tpu.memory_space<vmem>>, vector<32x128xf32>
    tpu.vector_store %arg7[%c0_6, %c0_7], %7 {strides = array<i32>} : memref<32x128xf32, #tpu.memory_space<vmem>>, vector<32x128xf32>,
    %c0_i32_8 = arith.constant 0 : i32
    %9 = arith.cmpi eq, %arg1, %c0_i32_8 : i32
    %10 = arith.extui %9 : i1 to i32
    %c0_i32_9 = arith.constant 0 : i32
    %11 = arith.cmpi ne, %10, %c0_i32_9 : i32
    scf.if %11 {
      %c0_10 = arith.constant 0 : index
      %c0_11 = arith.constant 0 : index
      %12 = vector.load %arg7[%c0_10, %c0_11] : memref<32x128xf32, #tpu.memory_space<vmem>>, vector<32x128xf32>
      %c0_12 = arith.constant 0 : index
      %c0_13 = arith.constant 0 : index
      %13 = vector.load %arg4[%c0_12, %c0_13] : memref<1x128xf32, #tpu.memory_space<vmem>>, vector<1x128xf32>
      %14 = vector.broadcast %13 : vector<1x128xf32> to vector<32x128xf32>
      %15 = arith.addf %12, %14 : vector<32x128xf32>
      %16 = arith.truncf %15 : vector<32x128xf32> to vector<32x128xbf16>
      %c0_14 = arith.constant 0 : index
      %c0_15 = arith.constant 0 : index
      %17 = vector.load %arg5[%c0_14, %c0_15] : memref<32x128xbf16, #tpu.memory_space<vmem>>, vector<32x128xbf16>
      tpu.vector_store %arg5[%c0_14, %c0_15], %16 {strides = array<i32>} : memref<32x128xbf16, #tpu.memory_space<vmem>>, vector<32x128xbf16>,
      %cst_16 = arith.constant dense<0.000000e+00> : vector<128xf32>
      %18 = vector.multi_reduction <add>, %15, %cst_16 [0] : vector<32x128xf32> to vector<128xf32>
      %19 = vector.shape_cast %18 : vector<128xf32> to vector<1x128xf32>
      %20 = arith.mulf %15, %15 : vector<32x128xf32>
      %cst_17 = arith.constant dense<0.000000e+00> : vector<128xf32>
      %21 = vector.multi_reduction <add>, %20, %cst_17 [0] : vector<32x128xf32> to vector<128xf32>
      %22 = vector.shape_cast %21 : vector<128xf32> to vector<1x128xf32>
      %23 = tpu.concatenate %19, %22 in 0 : vector<1x128xf32>, vector<1x128xf32> -> vector<2x128xf32>
      %24 = vector.shape_cast %23 : vector<2x128xf32> to vector<1x2x128xf32>
      %c0_18 = arith.constant 0 : index
      %c0_19 = arith.constant 0 : index
      %c0_20 = arith.constant 0 : index
      %25 = vector.load %arg6[%c0_18, %c0_19, %c0_20] : memref<1x2x128xf32, #tpu.memory_space<vmem>>, vector<1x2x128xf32>
      tpu.vector_store %arg6[%c0_18, %c0_19, %c0_20], %24 {strides = array<i32>} : memref<1x2x128xf32, #tpu.memory_space<vmem>>, vector<1x2x128xf32>,
    } else {
    }
    return
  }
  func.func @transform_0(%arg0: i32, %arg1: i32) -> (i32, i32) {
    %c0_i32 = arith.constant 0 : i32
    return %arg0, %arg1 : i32, i32
  }
  func.func @transform_1(%arg0: i32, %arg1: i32) -> (i32, i32) {
    %c0_i32 = arith.constant 0 : i32
    %c0_i32_0 = arith.constant 0 : i32
    return %arg1, %c0_i32 : i32, i32
  }
  func.func @transform_2(%arg0: i32, %arg1: i32) -> (i32, i32) {
    %c0_i32 = arith.constant 0 : i32
    %c0_i32_0 = arith.constant 0 : i32
    %c0_i32_1 = arith.constant 0 : i32
    return %c0_i32, %c0_i32_0 : i32, i32
  }
  func.func @transform_3(%arg0: i32, %arg1: i32) -> (i32, i32) {
    %c0_i32 = arith.constant 0 : i32
    %c0_i32_0 = arith.constant 0 : i32
    return %arg0, %c0_i32 : i32, i32
  }
  func.func @transform_4(%arg0: i32, %arg1: i32) -> (i32, i32, i32) {
    %c0_i32 = arith.constant 0 : i32
    %c0_i32_0 = arith.constant 0 : i32
    %c0_i32_1 = arith.constant 0 : i32
    return %arg0, %c0_i32, %c0_i32_0 : i32, i32, i32
  }
}

module attributes {stable_mosaic.version = 11 : i64} {
  func.func @kernel(%arg0: i32, %arg1: memref<32x128xbf16, #tpu.memory_space<vmem>>, %arg2: memref<1x128xf32, #tpu.memory_space<vmem>>, %arg3: memref<1x128xf32, #tpu.memory_space<vmem>>, %arg4: memref<32x128xbf16, #tpu.memory_space<vmem>>) attributes {dimension_semantics = [#tpu.dimension_semantics<parallel>], iteration_bounds = array<i64: 1>, scalar_prefetch = 0 : i64, scratch_operands = 0 : i64, tpu.core_type = #tpu.core_type<tc>, window_params = [{transform_indices = @transform_0, window_bounds = array<i64: 32, 128>}, {pipeline_mode = #tpu.pipeline_mode<synchronous>, transform_indices = @transform_1, window_bounds = array<i64: 1, 128>}, {pipeline_mode = #tpu.pipeline_mode<synchronous>, transform_indices = @transform_2, window_bounds = array<i64: 1, 128>}, {transform_indices = @transform_3, window_bounds = array<i64: 32, 128>}]} {
    %c0 = arith.constant 0 : index
    %c0_0 = arith.constant 0 : index
    %0 = vector.load %arg1[%c0, %c0_0] : memref<32x128xbf16, #tpu.memory_space<vmem>>, vector<32x128xbf16>
    %1 = arith.extf %0 : vector<32x128xbf16> to vector<32x128xf32>
    %c0_1 = arith.constant 0 : index
    %c0_2 = arith.constant 0 : index
    %2 = vector.load %arg2[%c0_1, %c0_2] : memref<1x128xf32, #tpu.memory_space<vmem>>, vector<1x128xf32>
    %3 = vector.broadcast %2 : vector<1x128xf32> to vector<32x128xf32>
    %4 = arith.mulf %1, %3 : vector<32x128xf32>
    %c0_3 = arith.constant 0 : index
    %c0_4 = arith.constant 0 : index
    %5 = vector.load %arg3[%c0_3, %c0_4] : memref<1x128xf32, #tpu.memory_space<vmem>>, vector<1x128xf32>
    %6 = vector.broadcast %5 : vector<1x128xf32> to vector<32x128xf32>
    %7 = arith.addf %4, %6 : vector<32x128xf32>
    %cst = arith.constant 0.000000e+00 : f32
    %8 = vector.broadcast %cst : f32 to vector<32x128xf32>
    %9 = arith.maximumf %7, %8 : vector<32x128xf32>
    %10 = arith.truncf %9 : vector<32x128xf32> to vector<32x128xbf16>
    %c0_5 = arith.constant 0 : index
    %c0_6 = arith.constant 0 : index
    %11 = vector.load %arg4[%c0_5, %c0_6] : memref<32x128xbf16, #tpu.memory_space<vmem>>, vector<32x128xbf16>
    tpu.vector_store %arg4[%c0_5, %c0_6], %10 {strides = array<i32>} : memref<32x128xbf16, #tpu.memory_space<vmem>>, vector<32x128xbf16>,
    return
  }
  func.func @transform_0(%arg0: i32) -> (i32, i32) {
    %c0_i32 = arith.constant 0 : i32
    %c0_i32_0 = arith.constant 0 : i32
    return %arg0, %c0_i32 : i32, i32
  }
  func.func @transform_1(%arg0: i32) -> (i32, i32) {
    %c0_i32 = arith.constant 0 : i32
    %c0_i32_0 = arith.constant 0 : i32
    %c0_i32_1 = arith.constant 0 : i32
    return %c0_i32, %c0_i32_0 : i32, i32
  }
  func.func @transform_2(%arg0: i32) -> (i32, i32) {
    %c0_i32 = arith.constant 0 : i32
    %c0_i32_0 = arith.constant 0 : i32
    %c0_i32_1 = arith.constant 0 : i32
    return %c0_i32, %c0_i32_0 : i32, i32
  }
  func.func @transform_3(%arg0: i32) -> (i32, i32) {
    %c0_i32 = arith.constant 0 : i32
    %c0_i32_0 = arith.constant 0 : i32
    return %arg0, %c0_i32 : i32, i32
  }
}

module attributes {stable_mosaic.version = 11 : i64} {
  func.func @kernel(%arg0: i32, %arg1: i32, %arg2: memref<32x384xbf16, #tpu.memory_space<vmem>>, %arg3: memref<384x128xbf16, #tpu.memory_space<vmem>>, %arg4: memref<1x128xf32, #tpu.memory_space<vmem>>, %arg5: memref<32x128xbf16, #tpu.memory_space<vmem>>, %arg6: memref<1x2x128xf32, #tpu.memory_space<vmem>>, %arg7: memref<32x128xf32, #tpu.memory_space<vmem>>) attributes {dimension_semantics = [#tpu.dimension_semantics<parallel>, #tpu.dimension_semantics<arbitrary>], iteration_bounds = array<i64: 1, 1>, scalar_prefetch = 0 : i64, scratch_operands = 1 : i64, tpu.core_type = #tpu.core_type<tc>, window_params = [{transform_indices = @transform_0, window_bounds = array<i64: 32, 384>}, {transform_indices = @transform_1, window_bounds = array<i64: 384, 128>}, {pipeline_mode = #tpu.pipeline_mode<synchronous>, transform_indices = @transform_2, window_bounds = array<i64: 1, 128>}, {transform_indices = @transform_3, window_bounds = array<i64: 32, 128>}, {transform_indices = @transform_4, window_bounds = array<i64: 1, 2, 128>}]} {
    %c0_i32 = arith.constant 0 : i32
    %0 = arith.cmpi eq, %arg1, %c0_i32 : i32
    %1 = arith.extui %0 : i1 to i32
    %c0_i32_0 = arith.constant 0 : i32
    %2 = arith.cmpi ne, %1, %c0_i32_0 : i32
    scf.if %2 {
      %cst_10 = arith.constant 0.000000e+00 : f32
      %12 = vector.broadcast %cst_10 : f32 to vector<32x128xf32>
      %c0_11 = arith.constant 0 : index
      %c0_12 = arith.constant 0 : index
      %13 = vector.load %arg7[%c0_11, %c0_12] : memref<32x128xf32, #tpu.memory_space<vmem>>, vector<32x128xf32>
      tpu.vector_store %arg7[%c0_11, %c0_12], %12 {strides = array<i32>} : memref<32x128xf32, #tpu.memory_space<vmem>>, vector<32x128xf32>,
    } else {
    }
    %c0 = arith.constant 0 : index
    %c0_1 = arith.constant 0 : index
    %3 = vector.load %arg7[%c0, %c0_1] : memref<32x128xf32, #tpu.memory_space<vmem>>, vector<32x128xf32>
    %c0_2 = arith.constant 0 : index
    %c0_3 = arith.constant 0 : index
    %4 = vector.load %arg2[%c0_2, %c0_3] : memref<32x384xbf16, #tpu.memory_space<vmem>>, vector<32x384xbf16>
    %c0_4 = arith.constant 0 : index
    %c0_5 = arith.constant 0 : index
    %5 = vector.load %arg3[%c0_4, %c0_5] : memref<384x128xbf16, #tpu.memory_space<vmem>>, vector<384x128xbf16>
    %cst = arith.constant dense<0.000000e+00> : vector<32x128xf32>
    %6 = tpu.matmul %4, %5, %cst {dimension_numbers = #tpu.dot_dimension_numbers<[1], [0], [0], [1], [0, 0, 1, 1], [], []>} : vector<32x384xbf16>, vector<384x128xbf16>, vector<32x128xf32> -> vector<32x128xf32>
    %7 = arith.addf %3, %6 : vector<32x128xf32>
    %c0_6 = arith.constant 0 : index
    %c0_7 = arith.constant 0 : index
    %8 = vector.load %arg7[%c0_6, %c0_7] : memref<32x128xf32, #tpu.memory_space<vmem>>, vector<32x128xf32>
    tpu.vector_store %arg7[%c0_6, %c0_7], %7 {strides = array<i32>} : memref<32x128xf32, #tpu.memory_space<vmem>>, vector<32x128xf32>,
    %c0_i32_8 = arith.constant 0 : i32
    %9 = arith.cmpi eq, %arg1, %c0_i32_8 : i32
    %10 = arith.extui %9 : i1 to i32
    %c0_i32_9 = arith.constant 0 : i32
    %11 = arith.cmpi ne, %10, %c0_i32_9 : i32
    scf.if %11 {
      %c0_10 = arith.constant 0 : index
      %c0_11 = arith.constant 0 : index
      %12 = vector.load %arg7[%c0_10, %c0_11] : memref<32x128xf32, #tpu.memory_space<vmem>>, vector<32x128xf32>
      %c0_12 = arith.constant 0 : index
      %c0_13 = arith.constant 0 : index
      %13 = vector.load %arg4[%c0_12, %c0_13] : memref<1x128xf32, #tpu.memory_space<vmem>>, vector<1x128xf32>
      %14 = vector.broadcast %13 : vector<1x128xf32> to vector<32x128xf32>
      %15 = arith.addf %12, %14 : vector<32x128xf32>
      %16 = arith.truncf %15 : vector<32x128xf32> to vector<32x128xbf16>
      %c0_14 = arith.constant 0 : index
      %c0_15 = arith.constant 0 : index
      %17 = vector.load %arg5[%c0_14, %c0_15] : memref<32x128xbf16, #tpu.memory_space<vmem>>, vector<32x128xbf16>
      tpu.vector_store %arg5[%c0_14, %c0_15], %16 {strides = array<i32>} : memref<32x128xbf16, #tpu.memory_space<vmem>>, vector<32x128xbf16>,
      %cst_16 = arith.constant dense<0.000000e+00> : vector<128xf32>
      %18 = vector.multi_reduction <add>, %15, %cst_16 [0] : vector<32x128xf32> to vector<128xf32>
      %19 = vector.shape_cast %18 : vector<128xf32> to vector<1x128xf32>
      %20 = arith.mulf %15, %15 : vector<32x128xf32>
      %cst_17 = arith.constant dense<0.000000e+00> : vector<128xf32>
      %21 = vector.multi_reduction <add>, %20, %cst_17 [0] : vector<32x128xf32> to vector<128xf32>
      %22 = vector.shape_cast %21 : vector<128xf32> to vector<1x128xf32>
      %23 = tpu.concatenate %19, %22 in 0 : vector<1x128xf32>, vector<1x128xf32> -> vector<2x128xf32>
      %24 = vector.shape_cast %23 : vector<2x128xf32> to vector<1x2x128xf32>
      %c0_18 = arith.constant 0 : index
      %c0_19 = arith.constant 0 : index
      %c0_20 = arith.constant 0 : index
      %25 = vector.load %arg6[%c0_18, %c0_19, %c0_20] : memref<1x2x128xf32, #tpu.memory_space<vmem>>, vector<1x2x128xf32>
      tpu.vector_store %arg6[%c0_18, %c0_19, %c0_20], %24 {strides = array<i32>} : memref<1x2x128xf32, #tpu.memory_space<vmem>>, vector<1x2x128xf32>,
    } else {
    }
    return
  }
  func.func @transform_0(%arg0: i32, %arg1: i32) -> (i32, i32) {
    %c0_i32 = arith.constant 0 : i32
    return %arg0, %arg1 : i32, i32
  }
  func.func @transform_1(%arg0: i32, %arg1: i32) -> (i32, i32) {
    %c0_i32 = arith.constant 0 : i32
    %c0_i32_0 = arith.constant 0 : i32
    return %arg1, %c0_i32 : i32, i32
  }
  func.func @transform_2(%arg0: i32, %arg1: i32) -> (i32, i32) {
    %c0_i32 = arith.constant 0 : i32
    %c0_i32_0 = arith.constant 0 : i32
    %c0_i32_1 = arith.constant 0 : i32
    return %c0_i32, %c0_i32_0 : i32, i32
  }
  func.func @transform_3(%arg0: i32, %arg1: i32) -> (i32, i32) {
    %c0_i32 = arith.constant 0 : i32
    %c0_i32_0 = arith.constant 0 : i32
    return %arg0, %c0_i32 : i32, i32
  }
  func.func @transform_4(%arg0: i32, %arg1: i32) -> (i32, i32, i32) {
    %c0_i32 = arith.constant 0 : i32
    %c0_i32_0 = arith.constant 0 : i32
    %c0_i32_1 = arith.constant 0 : i32
    return %arg0, %c0_i32, %c0_i32_0 : i32, i32, i32
  }
}

module attributes {stable_mosaic.version = 11 : i64} {
  func.func @kernel(%arg0: i32, %arg1: memref<32x128xbf16, #tpu.memory_space<vmem>>, %arg2: memref<1x128xf32, #tpu.memory_space<vmem>>, %arg3: memref<1x128xf32, #tpu.memory_space<vmem>>, %arg4: memref<32x128xbf16, #tpu.memory_space<vmem>>, %arg5: memref<32x128xbf16, #tpu.memory_space<vmem>>) attributes {dimension_semantics = [#tpu.dimension_semantics<parallel>], iteration_bounds = array<i64: 1>, scalar_prefetch = 0 : i64, scratch_operands = 0 : i64, tpu.core_type = #tpu.core_type<tc>, window_params = [{transform_indices = @transform_0, window_bounds = array<i64: 32, 128>}, {pipeline_mode = #tpu.pipeline_mode<synchronous>, transform_indices = @transform_1, window_bounds = array<i64: 1, 128>}, {pipeline_mode = #tpu.pipeline_mode<synchronous>, transform_indices = @transform_2, window_bounds = array<i64: 1, 128>}, {transform_indices = @transform_3, window_bounds = array<i64: 32, 128>}, {transform_indices = @transform_4, window_bounds = array<i64: 32, 128>}]} {
    %c0 = arith.constant 0 : index
    %c0_0 = arith.constant 0 : index
    %0 = vector.load %arg1[%c0, %c0_0] : memref<32x128xbf16, #tpu.memory_space<vmem>>, vector<32x128xbf16>
    %1 = arith.extf %0 : vector<32x128xbf16> to vector<32x128xf32>
    %c0_1 = arith.constant 0 : index
    %c0_2 = arith.constant 0 : index
    %2 = vector.load %arg2[%c0_1, %c0_2] : memref<1x128xf32, #tpu.memory_space<vmem>>, vector<1x128xf32>
    %3 = vector.broadcast %2 : vector<1x128xf32> to vector<32x128xf32>
    %4 = arith.mulf %1, %3 : vector<32x128xf32>
    %c0_3 = arith.constant 0 : index
    %c0_4 = arith.constant 0 : index
    %5 = vector.load %arg3[%c0_3, %c0_4] : memref<1x128xf32, #tpu.memory_space<vmem>>, vector<1x128xf32>
    %6 = vector.broadcast %5 : vector<1x128xf32> to vector<32x128xf32>
    %7 = arith.addf %4, %6 : vector<32x128xf32>
    %c0_5 = arith.constant 0 : index
    %c0_6 = arith.constant 0 : index
    %8 = vector.load %arg4[%c0_5, %c0_6] : memref<32x128xbf16, #tpu.memory_space<vmem>>, vector<32x128xbf16>
    %9 = arith.extf %8 : vector<32x128xbf16> to vector<32x128xf32>
    %10 = arith.addf %7, %9 : vector<32x128xf32>
    %11 = arith.truncf %10 : vector<32x128xf32> to vector<32x128xbf16>
    %c0_7 = arith.constant 0 : index
    %c0_8 = arith.constant 0 : index
    %12 = vector.load %arg5[%c0_7, %c0_8] : memref<32x128xbf16, #tpu.memory_space<vmem>>, vector<32x128xbf16>
    tpu.vector_store %arg5[%c0_7, %c0_8], %11 {strides = array<i32>} : memref<32x128xbf16, #tpu.memory_space<vmem>>, vector<32x128xbf16>,
    return
  }
  func.func @transform_0(%arg0: i32) -> (i32, i32) {
    %c0_i32 = arith.constant 0 : i32
    %c0_i32_0 = arith.constant 0 : i32
    return %arg0, %c0_i32 : i32, i32
  }
  func.func @transform_1(%arg0: i32) -> (i32, i32) {
    %c0_i32 = arith.constant 0 : i32
    %c0_i32_0 = arith.constant 0 : i32
    %c0_i32_1 = arith.constant 0 : i32
    return %c0_i32, %c0_i32_0 : i32, i32
  }
  func.func @transform_2(%arg0: i32) -> (i32, i32) {
    %c0_i32 = arith.constant 0 : i32
    %c0_i32_0 = arith.constant 0 : i32
    %c0_i32_1 = arith.constant 0 : i32
    return %c0_i32, %c0_i32_0 : i32, i32
  }
  func.func @transform_3(%arg0: i32) -> (i32, i32) {
    %c0_i32 = arith.constant 0 : i32
    %c0_i32_0 = arith.constant 0 : i32
    return %arg0, %c0_i32 : i32, i32
  }
  func.func @transform_4(%arg0: i32) -> (i32, i32) {
    %c0_i32 = arith.constant 0 : i32
    %c0_i32_0 = arith.constant 0 : i32
    return %arg0, %c0_i32 : i32, i32
  }
}

module attributes {stable_mosaic.version = 11 : i64} {
  func.func @kernel(%arg0: i32, %arg1: i32, %arg2: memref<32x128xbf16, #tpu.memory_space<vmem>>, %arg3: memref<128x128xbf16, #tpu.memory_space<vmem>>, %arg4: memref<1x128xf32, #tpu.memory_space<vmem>>, %arg5: memref<32x128xbf16, #tpu.memory_space<vmem>>, %arg6: memref<1x2x128xf32, #tpu.memory_space<vmem>>, %arg7: memref<32x128xf32, #tpu.memory_space<vmem>>) attributes {dimension_semantics = [#tpu.dimension_semantics<parallel>, #tpu.dimension_semantics<arbitrary>], iteration_bounds = array<i64: 1, 1>, scalar_prefetch = 0 : i64, scratch_operands = 1 : i64, tpu.core_type = #tpu.core_type<tc>, window_params = [{transform_indices = @transform_0, window_bounds = array<i64: 32, 128>}, {transform_indices = @transform_1, window_bounds = array<i64: 128, 128>}, {pipeline_mode = #tpu.pipeline_mode<synchronous>, transform_indices = @transform_2, window_bounds = array<i64: 1, 128>}, {transform_indices = @transform_3, window_bounds = array<i64: 32, 128>}, {transform_indices = @transform_4, window_bounds = array<i64: 1, 2, 128>}]} {
    %c0_i32 = arith.constant 0 : i32
    %0 = arith.cmpi eq, %arg1, %c0_i32 : i32
    %1 = arith.extui %0 : i1 to i32
    %c0_i32_0 = arith.constant 0 : i32
    %2 = arith.cmpi ne, %1, %c0_i32_0 : i32
    scf.if %2 {
      %cst_10 = arith.constant 0.000000e+00 : f32
      %12 = vector.broadcast %cst_10 : f32 to vector<32x128xf32>
      %c0_11 = arith.constant 0 : index
      %c0_12 = arith.constant 0 : index
      %13 = vector.load %arg7[%c0_11, %c0_12] : memref<32x128xf32, #tpu.memory_space<vmem>>, vector<32x128xf32>
      tpu.vector_store %arg7[%c0_11, %c0_12], %12 {strides = array<i32>} : memref<32x128xf32, #tpu.memory_space<vmem>>, vector<32x128xf32>,
    } else {
    }
    %c0 = arith.constant 0 : index
    %c0_1 = arith.constant 0 : index
    %3 = vector.load %arg7[%c0, %c0_1] : memref<32x128xf32, #tpu.memory_space<vmem>>, vector<32x128xf32>
    %c0_2 = arith.constant 0 : index
    %c0_3 = arith.constant 0 : index
    %4 = vector.load %arg2[%c0_2, %c0_3] : memref<32x128xbf16, #tpu.memory_space<vmem>>, vector<32x128xbf16>
    %c0_4 = arith.constant 0 : index
    %c0_5 = arith.constant 0 : index
    %5 = vector.load %arg3[%c0_4, %c0_5] : memref<128x128xbf16, #tpu.memory_space<vmem>>, vector<128x128xbf16>
    %cst = arith.constant dense<0.000000e+00> : vector<32x128xf32>
    %6 = tpu.matmul %4, %5, %cst {dimension_numbers = #tpu.dot_dimension_numbers<[1], [0], [0], [1], [0, 0, 1, 1], [], []>} : vector<32x128xbf16>, vector<128x128xbf16>, vector<32x128xf32> -> vector<32x128xf32>
    %7 = arith.addf %3, %6 : vector<32x128xf32>
    %c0_6 = arith.constant 0 : index
    %c0_7 = arith.constant 0 : index
    %8 = vector.load %arg7[%c0_6, %c0_7] : memref<32x128xf32, #tpu.memory_space<vmem>>, vector<32x128xf32>
    tpu.vector_store %arg7[%c0_6, %c0_7], %7 {strides = array<i32>} : memref<32x128xf32, #tpu.memory_space<vmem>>, vector<32x128xf32>,
    %c0_i32_8 = arith.constant 0 : i32
    %9 = arith.cmpi eq, %arg1, %c0_i32_8 : i32
    %10 = arith.extui %9 : i1 to i32
    %c0_i32_9 = arith.constant 0 : i32
    %11 = arith.cmpi ne, %10, %c0_i32_9 : i32
    scf.if %11 {
      %c0_10 = arith.constant 0 : index
      %c0_11 = arith.constant 0 : index
      %12 = vector.load %arg7[%c0_10, %c0_11] : memref<32x128xf32, #tpu.memory_space<vmem>>, vector<32x128xf32>
      %c0_12 = arith.constant 0 : index
      %c0_13 = arith.constant 0 : index
      %13 = vector.load %arg4[%c0_12, %c0_13] : memref<1x128xf32, #tpu.memory_space<vmem>>, vector<1x128xf32>
      %14 = vector.broadcast %13 : vector<1x128xf32> to vector<32x128xf32>
      %15 = arith.addf %12, %14 : vector<32x128xf32>
      %16 = arith.truncf %15 : vector<32x128xf32> to vector<32x128xbf16>
      %c0_14 = arith.constant 0 : index
      %c0_15 = arith.constant 0 : index
      %17 = vector.load %arg5[%c0_14, %c0_15] : memref<32x128xbf16, #tpu.memory_space<vmem>>, vector<32x128xbf16>
      tpu.vector_store %arg5[%c0_14, %c0_15], %16 {strides = array<i32>} : memref<32x128xbf16, #tpu.memory_space<vmem>>, vector<32x128xbf16>,
      %cst_16 = arith.constant dense<0.000000e+00> : vector<128xf32>
      %18 = vector.multi_reduction <add>, %15, %cst_16 [0] : vector<32x128xf32> to vector<128xf32>
      %19 = vector.shape_cast %18 : vector<128xf32> to vector<1x128xf32>
      %20 = arith.mulf %15, %15 : vector<32x128xf32>
      %cst_17 = arith.constant dense<0.000000e+00> : vector<128xf32>
      %21 = vector.multi_reduction <add>, %20, %cst_17 [0] : vector<32x128xf32> to vector<128xf32>
      %22 = vector.shape_cast %21 : vector<128xf32> to vector<1x128xf32>
      %23 = tpu.concatenate %19, %22 in 0 : vector<1x128xf32>, vector<1x128xf32> -> vector<2x128xf32>
      %24 = vector.shape_cast %23 : vector<2x128xf32> to vector<1x2x128xf32>
      %c0_18 = arith.constant 0 : index
      %c0_19 = arith.constant 0 : index
      %c0_20 = arith.constant 0 : index
      %25 = vector.load %arg6[%c0_18, %c0_19, %c0_20] : memref<1x2x128xf32, #tpu.memory_space<vmem>>, vector<1x2x128xf32>
      tpu.vector_store %arg6[%c0_18, %c0_19, %c0_20], %24 {strides = array<i32>} : memref<1x2x128xf32, #tpu.memory_space<vmem>>, vector<1x2x128xf32>,
    } else {
    }
    return
  }
  func.func @transform_0(%arg0: i32, %arg1: i32) -> (i32, i32) {
    %c0_i32 = arith.constant 0 : i32
    return %arg0, %arg1 : i32, i32
  }
  func.func @transform_1(%arg0: i32, %arg1: i32) -> (i32, i32) {
    %c0_i32 = arith.constant 0 : i32
    %c0_i32_0 = arith.constant 0 : i32
    return %arg1, %c0_i32 : i32, i32
  }
  func.func @transform_2(%arg0: i32, %arg1: i32) -> (i32, i32) {
    %c0_i32 = arith.constant 0 : i32
    %c0_i32_0 = arith.constant 0 : i32
    %c0_i32_1 = arith.constant 0 : i32
    return %c0_i32, %c0_i32_0 : i32, i32
  }
  func.func @transform_3(%arg0: i32, %arg1: i32) -> (i32, i32) {
    %c0_i32 = arith.constant 0 : i32
    %c0_i32_0 = arith.constant 0 : i32
    return %arg0, %c0_i32 : i32, i32
  }
  func.func @transform_4(%arg0: i32, %arg1: i32) -> (i32, i32, i32) {
    %c0_i32 = arith.constant 0 : i32
    %c0_i32_0 = arith.constant 0 : i32
    %c0_i32_1 = arith.constant 0 : i32
    return %arg0, %c0_i32, %c0_i32_0 : i32, i32, i32
  }
}

module attributes {stable_mosaic.version = 11 : i64} {
  func.func @kernel(%arg0: i32, %arg1: i32, %arg2: memref<256x512xbf16, #tpu.memory_space<vmem>>, %arg3: memref<512x128xbf16, #tpu.memory_space<vmem>>, %arg4: memref<1x128xf32, #tpu.memory_space<vmem>>, %arg5: memref<256x128xbf16, #tpu.memory_space<vmem>>, %arg6: memref<256x128xf32, #tpu.memory_space<vmem>>) attributes {dimension_semantics = [#tpu.dimension_semantics<parallel>, #tpu.dimension_semantics<arbitrary>], iteration_bounds = array<i64: 2, 1>, scalar_prefetch = 0 : i64, scratch_operands = 1 : i64, tpu.core_type = #tpu.core_type<tc>, window_params = [{transform_indices = @transform_0, window_bounds = array<i64: 256, 512>}, {transform_indices = @transform_1, window_bounds = array<i64: 512, 128>}, {pipeline_mode = #tpu.pipeline_mode<synchronous>, transform_indices = @transform_2, window_bounds = array<i64: 1, 128>}, {transform_indices = @transform_3, window_bounds = array<i64: 256, 128>}]} {
    %c0_i32 = arith.constant 0 : i32
    %0 = arith.cmpi eq, %arg1, %c0_i32 : i32
    %1 = arith.extui %0 : i1 to i32
    %c0_i32_0 = arith.constant 0 : i32
    %2 = arith.cmpi ne, %1, %c0_i32_0 : i32
    scf.if %2 {
      %cst_10 = arith.constant 0.000000e+00 : f32
      %12 = vector.broadcast %cst_10 : f32 to vector<256x128xf32>
      %c0_11 = arith.constant 0 : index
      %c0_12 = arith.constant 0 : index
      %13 = vector.load %arg6[%c0_11, %c0_12] : memref<256x128xf32, #tpu.memory_space<vmem>>, vector<256x128xf32>
      tpu.vector_store %arg6[%c0_11, %c0_12], %12 {strides = array<i32>} : memref<256x128xf32, #tpu.memory_space<vmem>>, vector<256x128xf32>,
    } else {
    }
    %c0 = arith.constant 0 : index
    %c0_1 = arith.constant 0 : index
    %3 = vector.load %arg6[%c0, %c0_1] : memref<256x128xf32, #tpu.memory_space<vmem>>, vector<256x128xf32>
    %c0_2 = arith.constant 0 : index
    %c0_3 = arith.constant 0 : index
    %4 = vector.load %arg2[%c0_2, %c0_3] : memref<256x512xbf16, #tpu.memory_space<vmem>>, vector<256x512xbf16>
    %c0_4 = arith.constant 0 : index
    %c0_5 = arith.constant 0 : index
    %5 = vector.load %arg3[%c0_4, %c0_5] : memref<512x128xbf16, #tpu.memory_space<vmem>>, vector<512x128xbf16>
    %cst = arith.constant dense<0.000000e+00> : vector<256x128xf32>
    %6 = tpu.matmul %4, %5, %cst {dimension_numbers = #tpu.dot_dimension_numbers<[1], [0], [0], [1], [0, 0, 1, 1], [], []>} : vector<256x512xbf16>, vector<512x128xbf16>, vector<256x128xf32> -> vector<256x128xf32>
    %7 = arith.addf %3, %6 : vector<256x128xf32>
    %c0_6 = arith.constant 0 : index
    %c0_7 = arith.constant 0 : index
    %8 = vector.load %arg6[%c0_6, %c0_7] : memref<256x128xf32, #tpu.memory_space<vmem>>, vector<256x128xf32>
    tpu.vector_store %arg6[%c0_6, %c0_7], %7 {strides = array<i32>} : memref<256x128xf32, #tpu.memory_space<vmem>>, vector<256x128xf32>,
    %c0_i32_8 = arith.constant 0 : i32
    %9 = arith.cmpi eq, %arg1, %c0_i32_8 : i32
    %10 = arith.extui %9 : i1 to i32
    %c0_i32_9 = arith.constant 0 : i32
    %11 = arith.cmpi ne, %10, %c0_i32_9 : i32
    scf.if %11 {
      %c0_10 = arith.constant 0 : index
      %c0_11 = arith.constant 0 : index
      %12 = vector.load %arg6[%c0_10, %c0_11] : memref<256x128xf32, #tpu.memory_space<vmem>>, vector<256x128xf32>
      %c0_12 = arith.constant 0 : index
      %c0_13 = arith.constant 0 : index
      %13 = vector.load %arg4[%c0_12, %c0_13] : memref<1x128xf32, #tpu.memory_space<vmem>>, vector<1x128xf32>
      %14 = vector.broadcast %13 : vector<1x128xf32> to vector<256x128xf32>
      %15 = arith.addf %12, %14 : vector<256x128xf32>
      %16 = math.tanh %15 : vector<256x128xf32>
      %17 = arith.truncf %16 : vector<256x128xf32> to vector<256x128xbf16>
      %c0_14 = arith.constant 0 : index
      %c0_15 = arith.constant 0 : index
      %18 = vector.load %arg5[%c0_14, %c0_15] : memref<256x128xbf16, #tpu.memory_space<vmem>>, vector<256x128xbf16>
      tpu.vector_store %arg5[%c0_14, %c0_15], %17 {strides = array<i32>} : memref<256x128xbf16, #tpu.memory_space<vmem>>, vector<256x128xbf16>,
    } else {
    }
    return
  }
  func.func @transform_0(%arg0: i32, %arg1: i32) -> (i32, i32) {
    %c0_i32 = arith.constant 0 : i32
    return %arg0, %arg1 : i32, i32
  }
  func.func @transform_1(%arg0: i32, %arg1: i32) -> (i32, i32) {
    %c0_i32 = arith.constant 0 : i32
    %c0_i32_0 = arith.constant 0 : i32
    return %arg1, %c0_i32 : i32, i32
  }
  func.func @transform_2(%arg0: i32, %arg1: i32) -> (i32, i32) {
    %c0_i32 = arith.constant 0 : i32
    %c0_i32_0 = arith.constant 0 : i32
    %c0_i32_1 = arith.constant 0 : i32
    return %c0_i32, %c0_i32_0 : i32, i32
  }
  func.func @transform_3(%arg0: i32, %arg1: i32) -> (i32, i32) {
    %c0_i32 = arith.constant 0 : i32
    %c0_i32_0 = arith.constant 0 : i32
    return %arg0, %c0_i32 : i32, i32
  }
}

</mosaic_0001>

<bundles_post_ra>
// kernel: resnet_generator.26
= control target key start
LH: loop header
LB: loop body
LE: loop exit
PB: predicated region body
PF: predicated region fallthrough
CT: control target
= control target key end

     0   :  { %s1502_s0 = inlined_call_operand.vmem [shape: bf16[512,128], index: 0, kind: input, shape index: {}]   ;;  %s1503_s1 = inlined_call_operand.vmem [shape: f32[1,128], index: 1, kind: input, shape index: {}]   ;;  %s1504_s2 = inlined_call_operand.vmem [shape: f32[1,128], index: 2, kind: input, shape index: {}]   ;;  %s1505_s3 = inlined_call_operand.vmem [shape: bf16[512,128], index: 3, kind: output, shape index: {}]  }
   0x1   :  { %v803_v0 = vld [vmem:[%s1502_s0] sm:$0xff]   ;;  %v1090_v4 = vld [vmem:[%s1502_s0 + $0x8] sm:$0xff]   ;;  %v1091_v5 = vld [vmem:[%s1502_s0 + $0x10] sm:$0xff]  }
   0x2   :  { %v1178_v1 = vld [vmem:[%s1503_s1] ss:$0 sm:$0xff]  ;;  %v804_v2 = vunpack.c.l.bf16 %v803_v0  ;;  %v805_v3 = vunpack.c.h.bf16 %v803_v0  ;;  %v1092_v6 = vld [vmem:[%s1502_s0 + $0x18] sm:$0xff]   ;;  %v808_v8 = vunpack.c.l.bf16 %v1090_v4  ;;  %v809_v9 = vunpack.c.h.bf16 %v1090_v4  ;;  %v1094_v33 = vld [vmem:[%s1502_s0 + $0x28] sm:$0xff]  }
   0x3   :  { %v1192_v7 = vld [vmem:[%s1504_s2] ss:$0 sm:$0xff]  ;;  %v812_v10 = vunpack.c.l.bf16 %v1091_v5  ;;  %v813_v11 = vunpack.c.h.bf16 %v1091_v5  ;;  %v816_v14 = vunpack.c.l.bf16 %v1092_v6  ;;  %v817_v15 = vunpack.c.h.bf16 %v1092_v6  ;;  %v1095_v38 = vld [vmem:[%s1502_s0 + $0x30] sm:$0xff]   ;;  %v1096_v43 = vld [vmem:[%s1502_s0 + $0x38] sm:$0xff]  }
   0x4   :  { %v149_v12 = vmul.f32 %v804_v2, %v1178_v1  ;;  %v150_v13 = vmul.f32 %v805_v3, %v1178_v1  ;;  %v151_v16 = vmul.f32 %v808_v8, %v1178_v1  ;;  %v152_v17 = vmul.f32 %v809_v9, %v1178_v1  ;;  %v1093_v28 = vld [vmem:[%s1502_s0 + $0x20] sm:$0xff]  }
   0x5   :  { %v153_v18 = vmul.f32 %v812_v10, %v1178_v1  ;;  %v154_v19 = vmul.f32 %v813_v11, %v1178_v1  ;;  %v155_v22 = vmul.f32 %v816_v14, %v1178_v1  ;;  %v156_v23 = vmul.f32 %v817_v15, %v1178_v1  ;;  %v1097_v0 = vld [vmem:[%s1502_s0 + $0x40] sm:$0xff]   ;;  %v1098_v11 = vld [vmem:[%s1502_s0 + $0x48] sm:$0xff]  }
   0x6   :  { %v220_v20 = vadd.f32 %v1192_v7, %v149_v12  ;;  %v221_v21 = vadd.f32 %v1192_v7, %v150_v13  ;;  %v222_v24 = vadd.f32 %v1192_v7, %v151_v16  ;;  %v223_v25 = vadd.f32 %v1192_v7, %v152_v17  ;;  %v1099_v16 = vld [vmem:[%s1502_s0 + $0x50] sm:$0xff]  }
   0x7   :  { %v224_v26 = vadd.f32 %v1192_v7, %v153_v18  ;;  %v225_v27 = vadd.f32 %v1192_v7, %v154_v19  ;;  %v226_v31 = vadd.f32 %v1192_v7, %v155_v22  ;;  %v227_v32 = vadd.f32 %v1192_v7, %v156_v23 }
   0x8   :  { %v284_v29 = vmax.f32 %v220_v20, 0.0  ;;  %v285_v30 = vmax.f32 %v221_v21, 0.0  ;;  %v286_v34 = vmax.f32 %v222_v24, 0.0  ;;  %v287_v35 = vmax.f32 %v223_v25, 0.0  ;;  %v1100_v25 = vld [vmem:[%s1502_s0 + $0x58] sm:$0xff]  }
   0x9   :  { %v288_v36 = vmax.f32 %v224_v26, 0.0  ;;  %v289_v37 = vmax.f32 %v225_v27, 0.0  ;;  %v290_v40 = vmax.f32 %v226_v31, 0.0  ;;  %v291_v41 = vmax.f32 %v227_v32, 0.0 }
   0xa   :  { %v933_v39 = vpack.c.bf16 %v285_v30, %v284_v29  ;;  %v820_v42 = vunpack.c.l.bf16 %v1093_v28  ;;  %v938_v44 = vpack.c.bf16 %v287_v35, %v286_v34  ;;  %v821_v46 = vunpack.c.h.bf16 %v1093_v28 }
   0xb   :  { %v943_v45 = vpack.c.bf16 %v289_v37, %v288_v36  ;;  %v824_v47 = vunpack.c.l.bf16 %v1094_v33  ;;  %v948_v48 = vpack.c.bf16 %v291_v41, %v290_v40  ;;  %v825_v50 = vunpack.c.h.bf16 %v1094_v33 }
   0xc   :  { %934 = vst [vmem:[%s1505_s3] sm:$0xff] %v933_v39   ;;  %v157_v49 = vmul.f32 %v820_v42, %v1178_v1  ;;  %v828_v51 = vunpack.c.l.bf16 %v1095_v38  ;;  %1121 = vst [vmem:[%s1505_s3 + $0x8] sm:$0xff] %v938_v44   ;;  %v158_v52 = vmul.f32 %v821_v46, %v1178_v1  ;;  %v829_v54 = vunpack.c.h.bf16 %v1095_v38  ;;  %v1101_v38 = vld [vmem:[%s1502_s0 + $0x60] sm:$0xff]  }
   0xd   :  { %1122 = vst [vmem:[%s1505_s3 + $0x10] sm:$0xff] %v943_v45   ;;  %v159_v53 = vmul.f32 %v824_v47, %v1178_v1  ;;  %v832_v55 = vunpack.c.l.bf16 %v1096_v43  ;;  %1123 = vst [vmem:[%s1505_s3 + $0x18] sm:$0xff] %v948_v48   ;;  %v160_v57 = vmul.f32 %v825_v50, %v1178_v1  ;;  %v833_v59 = vunpack.c.h.bf16 %v1096_v43 }
   0xe   :  { %v228_v56 = vadd.f32 %v1192_v7, %v157_v49  ;;  %v161_v58 = vmul.f32 %v828_v51, %v1178_v1  ;;  %v229_v60 = vadd.f32 %v1192_v7, %v158_v52  ;;  %v162_v62 = vmul.f32 %v829_v54, %v1178_v1  ;;  %v1102_v51 = vld [vmem:[%s1502_s0 + $0x68] sm:$0xff]  }
   0xf   :  { %v230_v61 = vadd.f32 %v1192_v7, %v159_v53  ;;  %v163_v63 = vmul.f32 %v832_v55, %v1178_v1  ;;  %v231_v3 = vadd.f32 %v1192_v7, %v160_v57  ;;  %v164_v5 = vmul.f32 %v833_v59, %v1178_v1 }
  0x10   :  { %v292_v2 = vmax.f32 %v228_v56, 0.0  ;;  %v232_v4 = vadd.f32 %v1192_v7, %v161_v58  ;;  %v293_v6 = vmax.f32 %v229_v60, 0.0  ;;  %v233_v9 = vadd.f32 %v1192_v7, %v162_v62  ;;  %v1103_v60 = vld [vmem:[%s1502_s0 + $0x70] sm:$0xff]  }
  0x11   :  { %v294_v8 = vmax.f32 %v230_v61, 0.0  ;;  %v234_v10 = vadd.f32 %v1192_v7, %v163_v63  ;;  %v295_v12 = vmax.f32 %v231_v3, 0.0  ;;  %v235_v14 = vadd.f32 %v1192_v7, %v164_v5 }
  0x12   :  { %v296_v13 = vmax.f32 %v232_v4, 0.0  ;;  %v836_v15 = vunpack.c.l.bf16 %v1097_v0  ;;  %v953_v17 = vpack.c.bf16 %v293_v6, %v292_v2  ;;  %v297_v18 = vmax.f32 %v233_v9, 0.0  ;;  %v1104_v2 = vld [vmem:[%s1502_s0 + $0x78] sm:$0xff]  }
  0x13   :  { %v298_v19 = vmax.f32 %v234_v10, 0.0  ;;  %v837_v20 = vunpack.c.h.bf16 %v1097_v0  ;;  %v958_v21 = vpack.c.bf16 %v295_v12, %v294_v8  ;;  %v299_v22 = vmax.f32 %v235_v14, 0.0  ;;  %v1105_v12 = vld [vmem:[%s1502_s0 + $0x80] sm:$0xff]  }
  0x14   :  { %v165_v23 = vmul.f32 %v836_v15, %v1178_v1  ;;  %v840_v24 = vunpack.c.l.bf16 %v1098_v11  ;;  %1124 = vst [vmem:[%s1505_s3 + $0x20] sm:$0xff] %v953_v17   ;;  %v963_v26 = vpack.c.bf16 %v297_v18, %v296_v13  ;;  %v841_v28 = vunpack.c.h.bf16 %v1098_v11 }
  0x15   :  { %v166_v27 = vmul.f32 %v837_v20, %v1178_v1  ;;  %v844_v29 = vunpack.c.l.bf16 %v1099_v16  ;;  %1125 = vst [vmem:[%s1505_s3 + $0x28] sm:$0xff] %v958_v21   ;;  %v968_v30 = vpack.c.bf16 %v299_v22, %v298_v19  ;;  %v845_v33 = vunpack.c.h.bf16 %v1099_v16 }
  0x16   :  { %v236_v31 = vadd.f32 %v1192_v7, %v165_v23  ;;  %v167_v32 = vmul.f32 %v840_v24, %v1178_v1  ;;  %1126 = vst [vmem:[%s1505_s3 + $0x30] sm:$0xff] %v963_v26   ;;  %v168_v35 = vmul.f32 %v841_v28, %v1178_v1  ;;  %v848_v37 = vunpack.c.l.bf16 %v1100_v25 }
  0x17   :  { %v237_v34 = vadd.f32 %v1192_v7, %v166_v27  ;;  %v169_v36 = vmul.f32 %v844_v29, %v1178_v1  ;;  %1127 = vst [vmem:[%s1505_s3 + $0x38] sm:$0xff] %v968_v30   ;;  %v170_v41 = vmul.f32 %v845_v33, %v1178_v1  ;;  %v849_v42 = vunpack.c.h.bf16 %v1100_v25  ;;  %v1106_v29 = vld [vmem:[%s1502_s0 + $0x88] sm:$0xff]  }
  0x18   :  { %v300_v39 = vmax.f32 %v236_v31, 0.0  ;;  %v238_v40 = vadd.f32 %v1192_v7, %v167_v32  ;;  %v239_v44 = vadd.f32 %v1192_v7, %v168_v35  ;;  %v171_v46 = vmul.f32 %v848_v37, %v1178_v1 }
  0x19   :  { %v301_v43 = vmax.f32 %v237_v34, 0.0  ;;  %v240_v45 = vadd.f32 %v1192_v7, %v169_v36  ;;  %v241_v48 = vadd.f32 %v1192_v7, %v170_v41  ;;  %v172_v49 = vmul.f32 %v849_v42, %v1178_v1  ;;  %v1107_v34 = vld [vmem:[%s1502_s0 + $0x90] sm:$0xff]  }
  0x1a   :  { %v302_v47 = vmax.f32 %v238_v40, 0.0  ;;  %v852_v50 = vunpack.c.l.bf16 %v1101_v38  ;;  %v303_v53 = vmax.f32 %v239_v44, 0.0  ;;  %v242_v55 = vadd.f32 %v1192_v7, %v171_v46 }
  0x1b   :  { %v973_v52 = vpack.c.bf16 %v301_v43, %v300_v39  ;;  %v304_v54 = vmax.f32 %v240_v45, 0.0  ;;  %v305_v56 = vmax.f32 %v241_v48, 0.0  ;;  %v243_v57 = vadd.f32 %v1192_v7, %v172_v49  ;;  %v1108_v43 = vld [vmem:[%s1502_s0 + $0x98] sm:$0xff]  }
  0x1c   :  { %v853_v58 = vunpack.c.h.bf16 %v1101_v38  ;;  %v173_v59 = vmul.f32 %v852_v50, %v1178_v1  ;;  %v978_v61 = vpack.c.bf16 %v303_v53, %v302_v47  ;;  %v306_v62 = vmax.f32 %v242_v55, 0.0 }
  0x1d   :  { %1128 = vst [vmem:[%s1505_s3 + $0x40] sm:$0xff] %v973_v52   ;;  %v856_v63 = vunpack.c.l.bf16 %v1102_v51  ;;  %v857_v0 = vunpack.c.h.bf16 %v1102_v51  ;;  %v983_v3 = vpack.c.bf16 %v305_v56, %v304_v54  ;;  %v307_v4 = vmax.f32 %v243_v57, 0.0  ;;  %v1109_v56 = vld [vmem:[%s1502_s0 + $0xa0] sm:$0xff]  }
  0x1e   :  { %v174_v5 = vmul.f32 %v853_v58, %v1178_v1  ;;  %v244_v6 = vadd.f32 %v1192_v7, %v173_v59  ;;  %1129 = vst [vmem:[%s1505_s3 + $0x48] sm:$0xff] %v978_v61   ;;  %v860_v10 = vunpack.c.l.bf16 %v1103_v60  ;;  %v861_v11 = vunpack.c.h.bf16 %v1103_v60 }
  0x1f   :  { %v175_v8 = vmul.f32 %v856_v63, %v1178_v1  ;;  %v176_v9 = vmul.f32 %v857_v0, %v1178_v1  ;;  %1130 = vst [vmem:[%s1505_s3 + $0x50] sm:$0xff] %v983_v3   ;;  %v988_v13 = vpack.c.bf16 %v307_v4, %v306_v62  ;;  %v864_v16 = vunpack.c.l.bf16 %v1104_v2 }
  0x20   :  { %v245_v14 = vadd.f32 %v1192_v7, %v174_v5  ;;  %v308_v15 = vmax.f32 %v244_v6, 0.0  ;;  %v177_v19 = vmul.f32 %v860_v10, %v1178_v1  ;;  %v178_v20 = vmul.f32 %v861_v11, %v1178_v1 }
  0x21   :  { %v246_v17 = vadd.f32 %v1192_v7, %v175_v8  ;;  %v247_v18 = vadd.f32 %v1192_v7, %v176_v9  ;;  %1131 = vst [vmem:[%s1505_s3 + $0x58] sm:$0xff] %v988_v13   ;;  %v865_v22 = vunpack.c.h.bf16 %v1104_v2  ;;  %v179_v23 = vmul.f32 %v864_v16, %v1178_v1  ;;  %v1110_v2 = vld [vmem:[%s1502_s0 + $0xa8] sm:$0xff]   ;;  %v1111_v16 = vld [vmem:[%s1502_s0 + $0xb0] sm:$0xff]  }
  0x22   :  { %v309_v21 = vmax.f32 %v245_v14, 0.0  ;;  %v868_v24 = vunpack.c.l.bf16 %v1105_v12  ;;  %v248_v27 = vadd.f32 %v1192_v7, %v177_v19  ;;  %v249_v28 = vadd.f32 %v1192_v7, %v178_v20 }
  0x23   :  { %v310_v25 = vmax.f32 %v246_v17, 0.0  ;;  %v311_v26 = vmax.f32 %v247_v18, 0.0  ;;  %v180_v31 = vmul.f32 %v865_v22, %v1178_v1  ;;  %v250_v32 = vadd.f32 %v1192_v7, %v179_v23 }
  0x24   :  { %v993_v30 = vpack.c.bf16 %v309_v21, %v308_v15  ;;  %v869_v33 = vunpack.c.h.bf16 %v1105_v12  ;;  %v312_v36 = vmax.f32 %v248_v27, 0.0  ;;  %v313_v37 = vmax.f32 %v249_v28, 0.0  ;;  %v1112_v21 = vld [vmem:[%s1502_s0 + $0xb8] sm:$0xff]  }
  0x25   :  { %v998_v35 = vpack.c.bf16 %v311_v26, %v310_v25  ;;  %v181_v38 = vmul.f32 %v868_v24, %v1178_v1  ;;  %v251_v39 = vadd.f32 %v1192_v7, %v180_v31  ;;  %v314_v40 = vmax.f32 %v250_v32, 0.0 }
  0x26   :  { %1132 = vst [vmem:[%s1505_s3 + $0x60] sm:$0xff] %v993_v30   ;;  %v182_v41 = vmul.f32 %v869_v33, %v1178_v1  ;;  %v872_v42 = vunpack.c.l.bf16 %v1106_v29  ;;  %v1003_v44 = vpack.c.bf16 %v313_v37, %v312_v36  ;;  %v873_v46 = vunpack.c.h.bf16 %v1106_v29 }
  0x27   :  { %1133 = vst [vmem:[%s1505_s3 + $0x68] sm:$0xff] %v998_v35   ;;  %v252_v45 = vadd.f32 %v1192_v7, %v181_v38  ;;  %v876_v47 = vunpack.c.l.bf16 %v1107_v34  ;;  %v315_v48 = vmax.f32 %v251_v39, 0.0  ;;  %v877_v51 = vunpack.c.h.bf16 %v1107_v34  ;;  %v1113_v34 = vld [vmem:[%s1502_s0 + $0xc0] sm:$0xff]  }
  0x28   :  { %v253_v49 = vadd.f32 %v1192_v7, %v182_v41  ;;  %v183_v50 = vmul.f32 %v872_v42, %v1178_v1  ;;  %1134 = vst [vmem:[%s1505_s3 + $0x70] sm:$0xff] %v1003_v44   ;;  %v184_v53 = vmul.f32 %v873_v46, %v1178_v1  ;;  %v880_v55 = vunpack.c.l.bf16 %v1108_v43 }
  0x29   :  { %v316_v52 = vmax.f32 %v252_v45, 0.0  ;;  %v185_v54 = vmul.f32 %v876_v47, %v1178_v1  ;;  %v1008_v57 = vpack.c.bf16 %v315_v48, %v314_v40  ;;  %v186_v60 = vmul.f32 %v877_v51, %v1178_v1  ;;  %v1114_v47 = vld [vmem:[%s1502_s0 + $0xc8] sm:$0xff]  }
  0x2a   :  { %v317_v58 = vmax.f32 %v253_v49, 0.0  ;;  %v254_v59 = vadd.f32 %v1192_v7, %v183_v50  ;;  %v255_v61 = vadd.f32 %v1192_v7, %v184_v53  ;;  %v881_v63 = vunpack.c.h.bf16 %v1108_v43 }
  0x2b   :  { %v256_v62 = vadd.f32 %v1192_v7, %v185_v54  ;;  %v187_v0 = vmul.f32 %v880_v55, %v1178_v1  ;;  %1135 = vst [vmem:[%s1505_s3 + $0x78] sm:$0xff] %v1008_v57   ;;  %v257_v5 = vadd.f32 %v1192_v7, %v186_v60  ;;  %v884_v6 = vunpack.c.l.bf16 %v1109_v56 }
  0x2c   :  { %v1013_v3 = vpack.c.bf16 %v317_v58, %v316_v52  ;;  %v318_v4 = vmax.f32 %v254_v59, 0.0  ;;  %v319_v8 = vmax.f32 %v255_v61, 0.0  ;;  %v188_v10 = vmul.f32 %v881_v63, %v1178_v1  ;;  %v1115_v52 = vld [vmem:[%s1502_s0 + $0xd0] sm:$0xff]   ;;  %v1116_v61 = vld [vmem:[%s1502_s0 + $0xd8] sm:$0xff]  }
  0x2d   :  { %v320_v9 = vmax.f32 %v256_v62, 0.0  ;;  %v258_v11 = vadd.f32 %v1192_v7, %v187_v0  ;;  %v321_v12 = vmax.f32 %v257_v5, 0.0  ;;  %v885_v13 = vunpack.c.h.bf16 %v1109_v56 }
  0x2e   :  { %1136 = vst [vmem:[%s1505_s3 + $0x80] sm:$0xff] %v1013_v3   ;;  %v189_v14 = vmul.f32 %v884_v6, %v1178_v1  ;;  %v888_v15 = vunpack.c.l.bf16 %v1110_v2  ;;  %v1018_v17 = vpack.c.bf16 %v319_v8, %v318_v4  ;;  %v259_v18 = vadd.f32 %v1192_v7, %v188_v10 }
  0x2f   :  { %v322_v19 = vmax.f32 %v258_v11, 0.0  ;;  %v889_v20 = vunpack.c.h.bf16 %v1110_v2  ;;  %v1023_v22 = vpack.c.bf16 %v321_v12, %v320_v9  ;;  %v190_v23 = vmul.f32 %v885_v13, %v1178_v1  ;;  %v1117_v12 = vld [vmem:[%s1502_s0 + $0xe0] sm:$0xff]  }
  0x30   :  { %v260_v24 = vadd.f32 %v1192_v7, %v189_v14  ;;  %v191_v25 = vmul.f32 %v888_v15, %v1178_v1  ;;  %1137 = vst [vmem:[%s1505_s3 + $0x88] sm:$0xff] %v1018_v17   ;;  %v323_v26 = vmax.f32 %v259_v18, 0.0  ;;  %v892_v28 = vunpack.c.l.bf16 %v1111_v16 }
  0x31   :  { %v192_v27 = vmul.f32 %v889_v20, %v1178_v1  ;;  %v893_v29 = vunpack.c.h.bf16 %v1111_v16  ;;  %1138 = vst [vmem:[%s1505_s3 + $0x90] sm:$0xff] %v1023_v22   ;;  %v261_v30 = vadd.f32 %v1192_v7, %v190_v23  ;;  %v896_v33 = vunpack.c.l.bf16 %v1112_v21 }
  0x32   :  { %v324_v31 = vmax.f32 %v260_v24, 0.0  ;;  %v262_v32 = vadd.f32 %v1192_v7, %v191_v25  ;;  %v1028_v35 = vpack.c.bf16 %v323_v26, %v322_v19  ;;  %v193_v37 = vmul.f32 %v892_v28, %v1178_v1 }
  0x33   :  { %v263_v36 = vadd.f32 %v1192_v7, %v192_v27  ;;  %v194_v38 = vmul.f32 %v893_v29, %v1178_v1  ;;  %v325_v39 = vmax.f32 %v261_v30, 0.0  ;;  %v897_v41 = vunpack.c.h.bf16 %v1112_v21  ;;  %v1118_v21 = vld [vmem:[%s1502_s0 + $0xe8] sm:$0xff]  }
  0x34   :  { %v326_v40 = vmax.f32 %v262_v32, 0.0  ;;  %v195_v42 = vmul.f32 %v896_v33, %v1178_v1  ;;  %1139 = vst [vmem:[%s1505_s3 + $0x98] sm:$0xff] %v1028_v35   ;;  %v264_v44 = vadd.f32 %v1192_v7, %v193_v37  ;;  %v900_v46 = vunpack.c.l.bf16 %v1113_v34 }
  0x35   :  { %v327_v43 = vmax.f32 %v263_v36, 0.0  ;;  %v265_v45 = vadd.f32 %v1192_v7, %v194_v38  ;;  %v1033_v48 = vpack.c.bf16 %v325_v39, %v324_v31  ;;  %v196_v49 = vmul.f32 %v897_v41, %v1178_v1  ;;  %v1120_v39 = vld [vmem:[%s1502_s0 + $0xf8] sm:$0xff]  }
  0x36   :  { %v266_v50 = vadd.f32 %v1192_v7, %v195_v42  ;;  %v901_v51 = vunpack.c.h.bf16 %v1113_v34  ;;  %v328_v54 = vmax.f32 %v264_v44, 0.0  ;;  %v197_v56 = vmul.f32 %v900_v46, %v1178_v1  ;;  %v1119_v34 = vld [vmem:[%s1502_s0 + $0xf0] sm:$0xff]  }
  0x37   :  { %v1038_v53 = vpack.c.bf16 %v327_v43, %v326_v40  ;;  %v329_v55 = vmax.f32 %v265_v45, 0.0  ;;  %1140 = vst [vmem:[%s1505_s3 + $0xa0] sm:$0xff] %v1033_v48   ;;  %v267_v57 = vadd.f32 %v1192_v7, %v196_v49  ;;  %v904_v60 = vunpack.c.l.bf16 %v1114_v47 }
  0x38   :  { %v330_v58 = vmax.f32 %v266_v50, 0.0  ;;  %v198_v59 = vmul.f32 %v901_v51, %v1178_v1  ;;  %v268_v63 = vadd.f32 %v1192_v7, %v197_v56  ;;  %v905_v0 = vunpack.c.h.bf16 %v1114_v47 }
  0x39   :  { %1141 = vst [vmem:[%s1505_s3 + $0xa8] sm:$0xff] %v1038_v53   ;;  %v1043_v62 = vpack.c.bf16 %v329_v55, %v328_v54  ;;  %v908_v2 = vunpack.c.l.bf16 %v1115_v52  ;;  %v331_v3 = vmax.f32 %v267_v57, 0.0  ;;  %v199_v5 = vmul.f32 %v904_v60, %v1178_v1 }
  0x3a   :  { %v269_v4 = vadd.f32 %v1192_v7, %v198_v59  ;;  %v909_v6 = vunpack.c.h.bf16 %v1115_v52  ;;  %v332_v8 = vmax.f32 %v268_v63, 0.0  ;;  %v200_v9 = vmul.f32 %v905_v0, %v1178_v1 }
  0x3b   :  { %1142 = vst [vmem:[%s1505_s3 + $0xb0] sm:$0xff] %v1043_v62   ;;  %v201_v10 = vmul.f32 %v908_v2, %v1178_v1  ;;  %v912_v11 = vunpack.c.l.bf16 %v1116_v61  ;;  %v1048_v13 = vpack.c.bf16 %v331_v3, %v330_v58  ;;  %v270_v15 = vadd.f32 %v1192_v7, %v199_v5 }
  0x3c   :  { %v333_v14 = vmax.f32 %v269_v4, 0.0  ;;  %v202_v16 = vmul.f32 %v909_v6, %v1178_v1  ;;  %v271_v17 = vadd.f32 %v1192_v7, %v200_v9  ;;  %v913_v19 = vunpack.c.h.bf16 %v1116_v61 }
  0x3d   :  { %v272_v18 = vadd.f32 %v1192_v7, %v201_v10  ;;  %v203_v20 = vmul.f32 %v912_v11, %v1178_v1  ;;  %1143 = vst [vmem:[%s1505_s3 + $0xb8] sm:$0xff] %v1048_v13   ;;  %v334_v23 = vmax.f32 %v270_v15, 0.0  ;;  %v916_v25 = vunpack.c.l.bf16 %v1117_v12 }
  0x3e   :  { %v1053_v22 = vpack.c.bf16 %v333_v14, %v332_v8  ;;  %v273_v24 = vadd.f32 %v1192_v7, %v202_v16  ;;  %v335_v26 = vmax.f32 %v271_v17, 0.0  ;;  %v204_v28 = vmul.f32 %v913_v19, %v1178_v1 }
  0x3f   :  { %v336_v27 = vmax.f32 %v272_v18, 0.0  ;;  %v274_v29 = vadd.f32 %v1192_v7, %v203_v20  ;;  %v917_v31 = vunpack.c.h.bf16 %v1117_v12  ;;  %v205_v32 = vmul.f32 %v916_v25, %v1178_v1 }
  0x40   :  { %1144 = vst [vmem:[%s1505_s3 + $0xc0] sm:$0xff] %v1053_v22   ;;  %v337_v30 = vmax.f32 %v273_v24, 0.0  ;;  %v920_v33 = vunpack.c.l.bf16 %v1118_v21  ;;  %v1058_v35 = vpack.c.bf16 %v335_v26, %v334_v23  ;;  %v275_v36 = vadd.f32 %v1192_v7, %v204_v28 }
  0x41   :  { %v338_v37 = vmax.f32 %v274_v29, 0.0  ;;  %v921_v38 = vunpack.c.h.bf16 %v1118_v21  ;;  %v206_v41 = vmul.f32 %v917_v31, %v1178_v1  ;;  %v276_v42 = vadd.f32 %v1192_v7, %v205_v32 }
  0x42   :  { %v1063_v40 = vpack.c.bf16 %v337_v30, %v336_v27  ;;  %v207_v43 = vmul.f32 %v920_v33, %v1178_v1  ;;  %1145 = vst [vmem:[%s1505_s3 + $0xc8] sm:$0xff] %v1058_v35   ;;  %v339_v44 = vmax.f32 %v275_v36, 0.0  ;;  %v924_v46 = vunpack.c.l.bf16 %v1119_v34 }
  0x43   :  { %v208_v45 = vmul.f32 %v921_v38, %v1178_v1  ;;  %v925_v47 = vunpack.c.h.bf16 %v1119_v34  ;;  %v277_v48 = vadd.f32 %v1192_v7, %v206_v41  ;;  %v340_v49 = vmax.f32 %v276_v42, 0.0 }
  0x44   :  { %1146 = vst [vmem:[%s1505_s3 + $0xd0] sm:$0xff] %v1063_v40   ;;  %v278_v50 = vadd.f32 %v1192_v7, %v207_v43  ;;  %v928_v51 = vunpack.c.l.bf16 %v1120_v39  ;;  %v1068_v52 = vpack.c.bf16 %v339_v44, %v338_v37  ;;  %v209_v54 = vmul.f32 %v924_v46, %v1178_v1 }
  0x45   :  { %v279_v53 = vadd.f32 %v1192_v7, %v208_v45  ;;  %v210_v55 = vmul.f32 %v925_v47, %v1178_v1  ;;  %v341_v56 = vmax.f32 %v277_v48, 0.0  ;;  %v929_v58 = vunpack.c.h.bf16 %v1120_v39 }
  0x46   :  { %v342_v57 = vmax.f32 %v278_v50, 0.0  ;;  %v211_v59 = vmul.f32 %v928_v51, %v1178_v1  ;;  %1147 = vst [vmem:[%s1505_s3 + $0xd8] sm:$0xff] %v1068_v52   ;;  %v280_v61 = vadd.f32 %v1192_v7, %v209_v54 }
  0x47   :  { %v343_v60 = vmax.f32 %v279_v53, 0.0  ;;  %v281_v62 = vadd.f32 %v1192_v7, %v210_v55  ;;  %v1073_v63 = vpack.c.bf16 %v341_v56, %v340_v49  ;;  %v212_v0 = vmul.f32 %v929_v58, %v1178_v1 }
  0x48   :  { %v282_v2 = vadd.f32 %v1192_v7, %v211_v59  ;;  %v344_v4 = vmax.f32 %v280_v61, 0.0 }
  0x49   :  { %v1078_v3 = vpack.c.bf16 %v343_v60, %v342_v57  ;;  %v345_v5 = vmax.f32 %v281_v62, 0.0  ;;  %1148 = vst [vmem:[%s1505_s3 + $0xe0] sm:$0xff] %v1073_v63   ;;  %v283_v6 = vadd.f32 %v1192_v7, %v212_v0 }
  0x4a   :  { %v346_v8 = vmax.f32 %v282_v2, 0.0 }
  0x4b   :  { %1149 = vst [vmem:[%s1505_s3 + $0xe8] sm:$0xff] %v1078_v3   ;;  %v1083_v9 = vpack.c.bf16 %v345_v5, %v344_v4  ;;  %v347_v10 = vmax.f32 %v283_v6, 0.0 }
  0x4d   :  { %1150 = vst [vmem:[%s1505_s3 + $0xf0] sm:$0xff] %v1083_v9   ;;  %v1088_v1 = vpack.c.bf16 %v347_v10, %v346_v8 }
  0x4f   :  { %1151 = vst [vmem:[%s1505_s3 + $0xf8] sm:$0xff] %v1088_v1  }

// kernel: resnet_generator.25
= control target key start
LH: loop header
LB: loop body
LE: loop exit
PB: predicated region body
PF: predicated region fallthrough
CT: control target
= control target key end

     0   :  { %s1827_s15 = smov 0   ;;  %s1829_s16 = smov 0   ;;  %s2129_s0 = inlined_call_operand.vmem [shape: bf16[512,256], index: 0, kind: input, shape index: {}]   ;;  %s2130_s1 = inlined_call_operand.vmem [shape: bf16[256,128], index: 1, kind: input, shape index: {}]   ;;  %s2131_s2 = inlined_call_operand.vmem [shape: f32[1,128], index: 2, kind: input, shape index: {}]   ;;  %s2132_s3 = inlined_call_operand.vmem [shape: bf16[512,128], index: 3, kind: output, shape index: {0}]   ;;  %s2133_s4 = inlined_call_operand.vmem [shape: f32[2,2,128], index: 4, kind: output, shape index: {1}]  }
   0x1   :  { %s1831_s17 = smov 0  }
   0x2 LB: > { %s27_s18 = sadd.s32 1, %s1796_s16  ;;  %p1344_p0 = scmp.ge.s32.totalorder %s1800_s17, 1  ;;  %s1800_s17 = sphi %s1831_s17, %s15_s17   ;;  %s1796_s16 = sphi %s1829_s16, %s2135_s16   ;;  %s1792_s15 = sphi %s1827_s15, %s2134_s15  }
   0x3   : > { %p29_p1 = scmp.ge.s32.totalorder %s27_s18, 2  ;;  %p197_p2 = scmp.lt.s32.totalorder %s1800_s17, 3 }
   0x5   : > { %s2137_s18 = smov (%p29_p1, %s27_s18), 0  ;;  %p198_p3 = pnand %p1344_p0, %p197_p2 }
   0x6   : > { %s1345_s21 = sshll.u32 (!%p198_p3), %s1792_s15, 5  ;;  %p261_p5 = scmp.lt.s32.totalorder (!%p198_p3), %s1792_s15, 1 }
   0x7   : > { %201 = sbr.rel (%p198_p3) target bundleno = 354 (0x162), region = 32  ;;  %p239_p4 = scmp.lt.s32.totalorder (!%p198_p3), %s1345_s21, 63 }
   0xc   : > { %v1714_v0 = vld [vmem:[%s2130_s1 + $0x78] sm:$0xff]   ;;  %v1716_v2 = vld [vmem:[%s2130_s1 + $0x70] sm:$0xff]   ;;  %v1718_v4 = vld [vmem:[%s2130_s1 + $0x68] sm:$0xff]   ;;  %s2139_s21 = smov (!%p239_p4, %s1345_s21), 63  ;;  %s2141_s15 = smov (!%p261_p5, %s1792_s15), 1  ;;  %vm1219_vm0 = vcmask 1040384  }
   0xd   : > { %v1715_v1 = vld [vmem:[%s2130_s1 + $0x38] sm:$0xff]   ;;  %1562 = vmatprep.subr.bf16.mxu0 %v1714_v0  ;;  %1674 = vmatprep.subr.bf16.mxu1 %v1714_v0  ;;  %v1717_v3 = vld [vmem:[%s2130_s1 + $0x30] sm:$0xff]   ;;  %v1719_v5 = vld [vmem:[%s2130_s1 + $0x28] sm:$0xff]   ;;  %s1434_s10 = sshll.u32 %s2139_s21, 3  ;;  %s1349_s11 = sshll.u32 %s2139_s21, 2 }
   0xe   : > { %1563 = vmatpush3.bf16.msra.mxu0 %v1715_v1  ;;  %1682 = vmatpush3.bf16.msra.mxu1 %v1715_v1  ;;  %v1720_v6 = vld [vmem:[%s2130_s1 + $0x60] sm:$0xff]   ;;  %v1722_v8 = vld [vmem:[%s2130_s1 + $0x58] sm:$0xff]   ;;  %s1881_s19 = scalar_lea.vmem %s2129_s0, %s1434_s10  ;;  %v1724_v10 = vld [vmem:[%s2130_s1 + $0x50] sm:$0xff]   ;;  %s1954_s14 = scalar_lea.vmem %s2132_s3, %s1349_s11 }
   0xf   : > { %1564 = vmatprep.subr.bf16.mxu0 %v1716_v2  ;;  %1675 = vmatprep.subr.bf16.mxu1 %v1716_v2  ;;  %v1721_v7 = vld [vmem:[%s2130_s1 + $0x20] sm:$0xff]   ;;  %v1723_v9 = vld [vmem:[%s2130_s1 + $0x18] sm:$0xff]   ;;  %v1725_v12 = vld [vmem:[%s2130_s1 + $0x10] sm:$0xff]   ;;  %s1350_s21 = sshll.u32 %s2141_s15, 1 }
  0x10   : > { %v1732_v11 = vld [vmem:[%s1881_s19 + $0x4] ss:$8 sps:$4 sm:$0xff]   ;;  %v1730_v18 = vld [vmem:[%s1881_s19] ss:$8 sps:$4 sm:$0xff]   ;;  %v1733_v19 = vld [vmem:[%s1881_s19 + $0x14] ss:$8 sps:$4 sm:$0xff]   ;;  %s264_s22 = scalar_lea.vmem %s2133_s4, %s1350_s21 }
  0x11   : > { %686 = vmatprep.mubr.bf16.mxu0 %v1732_v11  ;;  %v1726_v13 = vld [vmem:[%s2130_s1 + $0x48] sm:$0xff]   ;;  %v1728_v16 = vld [vmem:[%s2130_s1 + $0x40] sm:$0xff]   ;;  %v1748_v21 = vld [vmem:[%s1881_s19 + $0x94] ss:$8 sps:$4 sm:$0xff]  }
  0x12   : > { %1565 = vmatpush3.bf16.msra.mxu0 %v1717_v3  ;;  %1683 = vmatpush3.bf16.msra.mxu1 %v1717_v3  ;;  %v1744_v14 = vld [vmem:[%s1881_s19 + $0x84] ss:$8 sps:$4 sm:$0xff]   ;;  %v1742_v20 = vld [vmem:[%s1881_s19 + $0x80] ss:$8 sps:$4 sm:$0xff]   ;;  %v1735_v22 = vld [vmem:[%s1881_s19 + $0x10] ss:$8 sps:$4 sm:$0xff]  }
  0x13   : > { %1566 = vmatprep.subr.bf16.mxu0 %v1718_v4  ;;  %1676 = vmatprep.subr.bf16.mxu1 %v1718_v4  ;;  %v1727_v15 = vld [vmem:[%s2130_s1 + $0x8] sm:$0xff]   ;;  %v1729_v17 = vld [vmem:[%s2130_s1] sm:$0xff]   ;;  %v1750_v24 = vld [vmem:[%s1881_s19 + $0x90] ss:$8 sps:$4 sm:$0xff]  }
  0x14   : > { %750 = vmatprep.mubr.bf16.mxu1 %v1744_v14  ;;  %v1736_v23 = vld [vmem:[%s1881_s19 + $0x24] ss:$8 sps:$4 sm:$0xff]   ;;  %v1738_v26 = vld [vmem:[%s1881_s19 + $0x20] ss:$8 sps:$4 sm:$0xff]   ;;  %v1739_v27 = vld [vmem:[%s1881_s19 + $0x34] ss:$8 sps:$4 sm:$0xff]  }
  0x15   : > { %v1754_v25 = vld [vmem:[%s1881_s19 + $0xa4] ss:$8 sps:$4 sm:$0xff]   ;;  %v1756_v28 = vld [vmem:[%s1881_s19 + $0xa0] ss:$8 sps:$4 sm:$0xff]   ;;  %v1760_v29 = vld [vmem:[%s1881_s19 + $0xb4] ss:$8 sps:$4 sm:$0xff]  }
  0x16   : > { %1567 = vmatpush3.bf16.msra.mxu0 %v1719_v5  ;;  %1684 = vmatpush3.bf16.msra.mxu1 %v1719_v5  ;;  %v1741_v30 = vld [vmem:[%s1881_s19 + $0x30] ss:$8 sps:$4 sm:$0xff]   ;;  %v1745_v31 = vld [vmem:[%s1881_s19 + $0x44] ss:$8 sps:$4 sm:$0xff]   ;;  %v1747_v34 = vld [vmem:[%s1881_s19 + $0x40] ss:$8 sps:$4 sm:$0xff]  }
  0x17   : > { %1568 = vmatprep.subr.bf16.mxu0 %v1720_v6  ;;  %1677 = vmatprep.subr.bf16.mxu1 %v1720_v6  ;;  %v1762_v32 = vld [vmem:[%s1881_s19 + $0xb0] ss:$8 sps:$4 sm:$0xff]   ;;  %v1766_v33 = vld [vmem:[%s1881_s19 + $0xc4] ss:$8 sps:$4 sm:$0xff]   ;;  %v1751_v35 = vld [vmem:[%s1881_s19 + $0x54] ss:$8 sps:$4 sm:$0xff]  }
  0x18   : > { %v1768_v36 = vld [vmem:[%s1881_s19 + $0xc0] ss:$8 sps:$4 sm:$0xff]   ;;  %v1769_v37 = vld [vmem:[%s1881_s19 + $0xd4] ss:$8 sps:$4 sm:$0xff]   ;;  %v1753_v38 = vld [vmem:[%s1881_s19 + $0x50] ss:$8 sps:$4 sm:$0xff]  }
  0x19   : > { %v1757_v39 = vld [vmem:[%s1881_s19 + $0x64] ss:$8 sps:$4 sm:$0xff]   ;;  %v1771_v40 = vld [vmem:[%s1881_s19 + $0xd0] ss:$8 sps:$4 sm:$0xff]   ;;  %v1759_v42 = vld [vmem:[%s1881_s19 + $0x60] ss:$8 sps:$4 sm:$0xff]  }
  0x1a   : > { %1569 = vmatpush3.bf16.msra.mxu0 %v1721_v7  ;;  %1685 = vmatpush3.bf16.msra.mxu1 %v1721_v7  ;;  %v1772_v41 = vld [vmem:[%s1881_s19 + $0xe4] ss:$8 sps:$4 sm:$0xff]   ;;  %v1763_v43 = vld [vmem:[%s1881_s19 + $0x74] ss:$8 sps:$4 sm:$0xff]   ;;  %v1774_v44 = vld [vmem:[%s1881_s19 + $0xe0] ss:$8 sps:$4 sm:$0xff]  }
  0x1b   : > { %1570 = vmatprep.subr.bf16.mxu0 %v1722_v8  ;;  %1678 = vmatprep.subr.bf16.mxu1 %v1722_v8  ;;  %v1775_v45 = vld [vmem:[%s1881_s19 + $0xf4] ss:$8 sps:$4 sm:$0xff]   ;;  %v1765_v46 = vld [vmem:[%s1881_s19 + $0x70] ss:$8 sps:$4 sm:$0xff]   ;;  %v1939_v56 = vld [vmem:[%s2131_s2] ss:$0 sm:$0xff] }
  0x1c   : > { %v1777_v47 = vld [vmem:[%s1881_s19 + $0xf0] ss:$8 sps:$4 sm:$0xff]  }
  0x1e   : > { %1571 = vmatpush3.bf16.msra.mxu0 %v1723_v9  ;;  %1686 = vmatpush3.bf16.msra.mxu1 %v1723_v9 }
  0x1f   : > { %1572 = vmatprep.subr.bf16.mxu0 %v1724_v10  ;;  %1679 = vmatprep.subr.bf16.mxu1 %v1724_v10 }
  0x22   : > { %1573 = vmatpush3.bf16.msra.mxu0 %v1725_v12  ;;  %1687 = vmatpush3.bf16.msra.mxu1 %v1725_v12 }
  0x23   : > { %1574 = vmatprep.subr.bf16.mxu0 %v1726_v13  ;;  %1680 = vmatprep.subr.bf16.mxu1 %v1726_v13 }
  0x26   : > { %1575 = vmatpush3.bf16.msra.mxu0 %v1727_v15  ;;  %1688 = vmatpush3.bf16.msra.mxu1 %v1727_v15 }
  0x27   : > { %1576 = vmatprep.subr.bf16.mxu0 %v1728_v16  ;;  %1681 = vmatprep.subr.bf16.mxu1 %v1728_v16 }
  0x2a   : > { %1577 = vmatpush3.bf16.msra.mxu0 %v1729_v17  ;;  %1689 = vmatpush3.bf16.msra.mxu1 %v1729_v17 }
  0x2d   : > { %687 = vmatmul.mubr.bf16.vlgmr.msra.gmra.mxu0 %v1730_v18  ;;  %751 = vmatmul.mubr.bf16.vlgmr.msra.gmra.mxu1 %v1742_v20 }
  0x2e   : > { %694 = vmatprep.mubr.bf16.mxu0 %v1733_v19  ;;  %758 = vmatprep.mubr.bf16.mxu1 %v1748_v21 }
  0x35   : > { %695 = vmatmul.mubr.bf16.gmra.mxu0 %v1735_v22  ;;  %759 = vmatmul.mubr.bf16.gmra.mxu1 %v1750_v24 }
  0x36   : > { %702 = vmatprep.mubr.bf16.mxu0 %v1736_v23  ;;  %766 = vmatprep.mubr.bf16.mxu1 %v1754_v25 }
  0x3d   : > { %703 = vmatmul.mubr.bf16.gmra.mxu0 %v1738_v26  ;;  %767 = vmatmul.mubr.bf16.gmra.mxu1 %v1756_v28 }
  0x3e   : > { %710 = vmatprep.mubr.bf16.mxu0 %v1739_v27  ;;  %774 = vmatprep.mubr.bf16.mxu1 %v1760_v29 }
  0x45   : > { %711 = vmatmul.mubr.bf16.gmra.mxu0 %v1741_v30  ;;  %775 = vmatmul.mubr.bf16.gmra.mxu1 %v1762_v32 }
  0x46   : > { %718 = vmatprep.mubr.bf16.mxu0 %v1745_v31  ;;  %782 = vmatprep.mubr.bf16.mxu1 %v1766_v33 }
  0x4d   : > { %719 = vmatmul.mubr.bf16.gmra.mxu0 %v1747_v34  ;;  %783 = vmatmul.mubr.bf16.gmra.mxu1 %v1768_v36 }
  0x4e   : > { %726 = vmatprep.mubr.bf16.mxu0 %v1751_v35  ;;  %790 = vmatprep.mubr.bf16.mxu1 %v1769_v37 }
  0x55   : > { %727 = vmatmul.mubr.bf16.gmra.mxu0 %v1753_v38  ;;  %791 = vmatmul.mubr.bf16.gmra.mxu1 %v1771_v40 }
  0x56   : > { %734 = vmatprep.mubr.bf16.mxu0 %v1757_v39  ;;  %798 = vmatprep.mubr.bf16.mxu1 %v1772_v41 }
  0x5d   : > { %735 = vmatmul.mubr.bf16.gmra.mxu0 %v1759_v42  ;;  %799 = vmatmul.mubr.bf16.gmra.mxu1 %v1774_v44 }
  0x5e   : > { %742 = vmatprep.mubr.bf16.mxu0 %v1763_v43  ;;  %806 = vmatprep.mubr.bf16.mxu1 %v1775_v45 }
  0x65   : > { %743 = vmatmul.mubr.bf16.gmra.mxu0 %v1765_v46  ;;  %807 = vmatmul.mubr.bf16.gmra.mxu1 %v1777_v47 }
  0xed   : > { %v1578_v48 = vpop.f32.mrf.mxu0  ;;  %v1626_v49 = vpop.f32.mrf.mxu1 }
  0xef   : > { %v1579_v50 = vpop.f32.mrf.mxu0  ;;  %v1627_v51 = vpop.f32.mrf.mxu1 }
  0xf0   : > { %v1628_v53 = vadd.f32 %v1627_v51, %v1626_v49  ;;  %v1580_v54 = vadd.f32 %v1579_v50, %v1578_v48 }
  0xf1   : > { %v1581_v52 = vpop.f32.mrf.mxu0  ;;  %v1629_v55 = vpop.f32.mrf.mxu1 }
  0xf2   : > { %v1943_v61 = vadd.f32 %v1628_v53, %v1939_v56  ;;  %v1946_v63 = vadd.f32 %v1580_v54, %v1939_v56 }
  0xf3   : > { %v1582_v57 = vpop.f32.mrf.mxu0  ;;  %v1630_v59 = vpop.f32.mrf.mxu1 }
  0xf4   : > { %v1583_v58 = vadd.f32 %v1582_v57, %v1581_v52  ;;  %v1631_v62 = vadd.f32 %v1630_v59, %v1629_v55 }
  0xf5   : > { %v1584_v60 = vpop.f32.mrf.mxu0  ;;  %v1632_v1 = vpop.f32.mrf.mxu1 }
  0xf6   : > { %v1949_v0 = vadd.f32 %v1583_v58, %v1939_v56  ;;  %v1957_v3 = vadd.f32 %v1631_v62, %v1939_v56 }
  0xf7   : > { %v1585_v2 = vpop.f32.mrf.mxu0  ;;  %v1633_v5 = vpop.f32.mrf.mxu1 }
  0xf8   : > { %v1470_v4 = vpack.c.bf16 %v1949_v0, %v1946_v63  ;;  %v1510_v7 = vpack.c.bf16 %v1957_v3, %v1943_v61  ;;  %v1634_v8 = vadd.f32 %v1633_v5, %v1632_v1  ;;  %v1586_v9 = vadd.f32 %v1585_v2, %v1584_v60 }
  0xf9   : > { %v1587_v6 = vpop.f32.mrf.mxu0  ;;  %v1635_v10 = vpop.f32.mrf.mxu1  ;;  %v1151_v62 = vmul.f32 %v1949_v0, %v1949_v0 }
  0xfa   : > { %1471 = vst [vmem:[%s1954_s14] sm:$0xff] %v1470_v4   ;;  %1554 = vst [vmem:[%s1954_s14 + $0x40] sm:$0xff] %v1510_v7   ;;  %v1966_v15 = vadd.f32 %v1634_v8, %v1939_v56  ;;  %v1969_v17 = vadd.f32 %v1586_v9, %v1939_v56  ;;  %v1150_v7 = vmul.f32 %v1946_v63, %v1946_v63 }
  0xfb   : > { %v1588_v11 = vpop.f32.mrf.mxu0  ;;  %v1636_v13 = vpop.f32.mrf.mxu1 }
  0xfc   : > { %v1589_v12 = vadd.f32 %v1588_v11, %v1587_v6  ;;  %v1637_v16 = vadd.f32 %v1636_v13, %v1635_v10  ;;  %v1152_v8 = vmul.f32 %v1969_v17, %v1969_v17  ;;  %v1113_v10 = vadd.f32 %v1949_v0, %v1946_v63 }
  0xfd   : > { %v1590_v14 = vpop.f32.mrf.mxu0  ;;  %v1638_v19 = vpop.f32.mrf.mxu1  ;;  %v1182_v13 = vadd.f32 %v1151_v62, %v1150_v7 }
  0xfe   : > { %v1972_v18 = vadd.f32 %v1589_v12, %v1939_v56  ;;  %v1975_v21 = vadd.f32 %v1637_v16, %v1939_v56 }
  0xff   : > { %v1591_v20 = vpop.f32.mrf.mxu0  ;;  %v1639_v23 = vpop.f32.mrf.mxu1  ;;  %v1183_v63 = vadd.f32 %v1182_v13, %v1152_v8 }
 0x100   : > { %v1475_v22 = vpack.c.bf16 %v1972_v18, %v1969_v17  ;;  %v1515_v25 = vpack.c.bf16 %v1975_v21, %v1966_v15  ;;  %v1640_v26 = vadd.f32 %v1639_v23, %v1638_v19  ;;  %v1592_v27 = vadd.f32 %v1591_v20, %v1590_v14 }
 0x101   : > { %v1593_v24 = vpop.f32.mrf.mxu0  ;;  %v1641_v28 = vpop.f32.mrf.mxu1  ;;  %v1153_v14 = vmul.f32 %v1972_v18, %v1972_v18 }
 0x102   : > { %1547 = vst [vmem:[%s1954_s14 + $0x8] sm:$0xff] %v1475_v22   ;;  %1555 = vst [vmem:[%s1954_s14 + $0x48] sm:$0xff] %v1515_v25   ;;  %v1984_v33 = vadd.f32 %v1640_v26, %v1939_v56  ;;  %v925_v35 = vadd.f32 %v1592_v27, %v1939_v56  ;;  %v1114_v22 = vadd.f32 %v1113_v10, %v1969_v17 }
 0x103   : > { %v1594_v29 = vpop.f32.mrf.mxu0  ;;  %v1642_v31 = vpop.f32.mrf.mxu1 }
 0x104   : > { %v1595_v30 = vadd.f32 %v1594_v29, %v1593_v24  ;;  %v1643_v34 = vadd.f32 %v1642_v31, %v1641_v28  ;;  %v1154_v0 = vmul.f32 %v925_v35, %v925_v35  ;;  %v1115_v28 = vadd.f32 %v1114_v22, %v1972_v18 }
 0x105   : > { %v1596_v32 = vpop.f32.mrf.mxu0  ;;  %v1644_v37 = vpop.f32.mrf.mxu1  ;;  %v1184_v31 = vadd.f32 %v1183_v63, %v1153_v14 }
 0x106   : > { %v1988_v36 = vadd.f32 %v1595_v30, %v1939_v56  ;;  %v1991_v39 = vadd.f32 %v1643_v34, %v1939_v56 }
 0x107   : > { %v1597_v38 = vpop.f32.mrf.mxu0  ;;  %v1645_v41 = vpop.f32.mrf.mxu1 }
 0x108   : > { %v1480_v40 = vpack.c.bf16 %v1988_v36, %v925_v35  ;;  %v1520_v43 = vpack.c.bf16 %v1991_v39, %v1984_v33  ;;  %v1646_v44 = vadd.f32 %v1645_v41, %v1644_v37  ;;  %v1598_v45 = vadd.f32 %v1597_v38, %v1596_v32 }
 0x109   : > { %v1599_v42 = vpop.f32.mrf.mxu0  ;;  %v1647_v46 = vpop.f32.mrf.mxu1  ;;  %v1155_v17 = vmul.f32 %v1988_v36, %v1988_v36  ;;  %v1116_v38 = vadd.f32 %v1115_v28, %v925_v35 }
 0x10a   : > { %1548 = vst [vmem:[%s1954_s14 + $0x10] sm:$0xff] %v1480_v40   ;;  %1556 = vst [vmem:[%s1954_s14 + $0x50] sm:$0xff] %v1520_v43   ;;  %v1999_v51 = vadd.f32 %v1646_v44, %v1939_v56  ;;  %v927_v53 = vadd.f32 %v1598_v45, %v1939_v56 }
 0x10b   : > { %v1600_v47 = vpop.f32.mrf.mxu0  ;;  %v1648_v49 = vpop.f32.mrf.mxu1  ;;  %v1117_v18 = vadd.f32 %v1116_v38, %v1988_v36 }
 0x10c   : > { %v1601_v48 = vadd.f32 %v1600_v47, %v1599_v42  ;;  %v1649_v52 = vadd.f32 %v1648_v49, %v1647_v46  ;;  %v1185_v42 = vadd.f32 %v1184_v31, %v1154_v0  ;;  %v1156_v43 = vmul.f32 %v927_v53, %v927_v53 }
 0x10d   : > { %v1602_v50 = vpop.f32.mrf.mxu0  ;;  %v1650_v55 = vpop.f32.mrf.mxu1 }
 0x10e   : > { %v2003_v54 = vadd.f32 %v1601_v48, %v1939_v56  ;;  %v2006_v58 = vadd.f32 %v1649_v52, %v1939_v56  ;;  %v1186_v47 = vadd.f32 %v1185_v42, %v1155_v17  ;;  %v1118_v52 = vadd.f32 %v1117_v18, %v927_v53 }
 0x10f   : > { %v1603_v57 = vpop.f32.mrf.mxu0  ;;  %v1651_v60 = vpop.f32.mrf.mxu1 }
 0x110   : > { %v1485_v59 = vpack.c.bf16 %v2003_v54, %v927_v53  ;;  %v1525_v2 = vpack.c.bf16 %v2006_v58, %v1999_v51  ;;  %v1652_v4 = vadd.f32 %v1651_v60, %v1650_v55  ;;  %v1604_v5 = vadd.f32 %v1603_v57, %v1602_v50 }
 0x111   : > { %v1605_v1 = vpop.f32.mrf.mxu0  ;;  %v1653_v6 = vpop.f32.mrf.mxu1  ;;  %v1157_v48 = vmul.f32 %v2003_v54, %v2003_v54  ;;  %v1187_v60 = vadd.f32 %v1186_v47, %v1156_v43 }
 0x112   : > { %1549 = vst [vmem:[%s1954_s14 + $0x18] sm:$0xff] %v1485_v59   ;;  %1557 = vst [vmem:[%s1954_s14 + $0x58] sm:$0xff] %v1525_v2   ;;  %v2024_v19 = vadd.f32 %v1652_v4, %v1939_v56  ;;  %v929_v23 = vadd.f32 %v1604_v5, %v1939_v56  ;;  %v1119_v2 = vadd.f32 %v1118_v52, %v2003_v54 }
 0x113   : > { %v1606_v9 = vpop.f32.mrf.mxu0  ;;  %v1654_v12 = vpop.f32.mrf.mxu1  ;;  %v1188_v7 = vadd.f32 %v1187_v60, %v1157_v48 }
 0x114   : > { %v1607_v11 = vadd.f32 %v1606_v9, %v1605_v1  ;;  %v1655_v20 = vadd.f32 %v1654_v12, %v1653_v6  ;;  %v1158_v36 = vmul.f32 %v929_v23, %v929_v23 }
 0x115   : > { %v1608_v16 = vpop.f32.mrf.mxu0  ;;  %v1656_v25 = vpop.f32.mrf.mxu1 }
 0x116   : > { %v930_v24 = vadd.f32 %v1607_v11, %v1939_v56  ;;  %v2030_v27 = vadd.f32 %v1655_v20, %v1939_v56  ;;  %v1120_v11 = vadd.f32 %v1119_v2, %v929_v23  ;;  %v1189_v13 = vadd.f32 %v1188_v7, %v1158_v36 }
 0x117   : > { %v1609_v26 = vpop.f32.mrf.mxu0  ;;  %v1657_v30 = vpop.f32.mrf.mxu1 }
 0x118   : > { %v1490_v29 = vpack.c.bf16 %v930_v24, %v929_v23  ;;  %v1530_v34 = vpack.c.bf16 %v2030_v27, %v2024_v19  ;;  %v1658_v37 = vadd.f32 %v1657_v30, %v1656_v25  ;;  %v1610_v40 = vadd.f32 %v1609_v26, %v1608_v16 }
 0x119   : > { %v1611_v32 = vpop.f32.mrf.mxu0  ;;  %v1659_v41 = vpop.f32.mrf.mxu1  ;;  %v1159_v53 = vmul.f32 %v930_v24, %v930_v24  ;;  %v1121_v20 = vadd.f32 %v1120_v11, %v930_v24 }
 0x11a   : > { %1550 = vst [vmem:[%s1954_s14 + $0x20] sm:$0xff] %v1490_v29   ;;  %1558 = vst [vmem:[%s1954_s14 + $0x60] sm:$0xff] %v1530_v34   ;;  %v2043_v50 = vadd.f32 %v1658_v37, %v1939_v56  ;;  %v931_v55 = vadd.f32 %v1610_v40, %v1939_v56 }
 0x11b   : > { %v1612_v44 = vpop.f32.mrf.mxu0  ;;  %v1660_v46 = vpop.f32.mrf.mxu1  ;;  %v1190_v63 = vadd.f32 %v1189_v13, %v1159_v53  ;;  %v1167_v13 = vmul.f32 %v1957_v3, %v1957_v3 }
 0x11c   : > { %v1613_v45 = vadd.f32 %v1612_v44, %v1611_v32  ;;  %v1661_v35 = vadd.f32 %v1660_v46, %v1659_v41  ;;  %v1160_v14 = vmul.f32 %v931_v55, %v931_v55  ;;  %v1122_v29 = vadd.f32 %v1121_v20, %v931_v55 }
 0x11d   : > { %v1614_v49 = vpop.f32.mrf.mxu0  ;;  %v1662_v59 = vpop.f32.mrf.mxu1 }
 0x11e   : > { %v932_v57 = vadd.f32 %v1613_v45, %v1939_v56  ;;  %v2048_v1 = vadd.f32 %v1661_v35, %v1939_v56  ;;  %v1191_v17 = vadd.f32 %v1190_v63, %v1160_v14  ;;  %v1170_v63 = vmul.f32 %v1984_v33, %v1984_v33 }
 0x11f   : > { %v1615_v62 = vpop.f32.mrf.mxu0  ;;  %v1663_v6 = vpop.f32.mrf.mxu1 }
 0x120   : > { %v1495_v4 = vpack.c.bf16 %v932_v57, %v931_v55  ;;  %v1616_v5 = vadd.f32 %v1615_v62, %v1614_v49  ;;  %v1535_v9 = vpack.c.bf16 %v2048_v1, %v2043_v50  ;;  %v1664_v10 = vadd.f32 %v1663_v6, %v1662_v59 }
 0x121   : > { %v1617_v8 = vpop.f32.mrf.mxu0  ;;  %v1665_v12 = vpop.f32.mrf.mxu1  ;;  %v1161_v30 = vmul.f32 %v932_v57, %v932_v57  ;;  %v1123_v34 = vadd.f32 %v1122_v29, %v932_v57 }
 0x122   : > { %1551 = vst [vmem:[%s1954_s14 + $0x28] sm:$0xff] %v1495_v4   ;;  %1559 = vst [vmem:[%s1954_s14 + $0x68] sm:$0xff] %v1535_v9   ;;  %v933_v54 = vadd.f32 %v1616_v5, %v1939_v56  ;;  %v2057_v26 = vadd.f32 %v1664_v10, %v1939_v56  ;;  %v1166_v10 = vmul.f32 %v1943_v61, %v1943_v61 }
 0x123   : > { %v1618_v16 = vpop.f32.mrf.mxu0  ;;  %v1666_v25 = vpop.f32.mrf.mxu1  ;;  %v1192_v18 = vadd.f32 %v1191_v17, %v1161_v30 }
 0x124   : > { %v1619_v22 = vadd.f32 %v1618_v16, %v1617_v8  ;;  %v1667_v28 = vadd.f32 %v1666_v25, %v1665_v12  ;;  %v1162_v37 = vmul.f32 %v933_v54, %v933_v54  ;;  %v1124_v45 = vadd.f32 %v1123_v34, %v933_v54 }
 0x125   : > { %v1620_v0 = vpop.f32.mrf.mxu0  ;;  %v1668_v31 = vpop.f32.mrf.mxu1 }
 0x126   : > { %v934_v23 = vadd.f32 %v1619_v22, %v1939_v56  ;;  %v2061_v24 = vadd.f32 %v1667_v28, %v1939_v56  ;;  %v1193_v35 = vadd.f32 %v1192_v18, %v1162_v37  ;;  %v1169_v22 = vmul.f32 %v1975_v21, %v1975_v21 }
 0x127   : > { %v1621_v32 = vpop.f32.mrf.mxu0  ;;  %v1669_v41 = vpop.f32.mrf.mxu1 }
 0x128   : > { %v1500_v38 = vpack.c.bf16 %v934_v23, %v933_v54  ;;  %v1622_v40 = vadd.f32 %v1621_v32, %v1620_v0  ;;  %v1540_v43 = vpack.c.bf16 %v2061_v24, %v2057_v26  ;;  %v1670_v44 = vadd.f32 %v1669_v41, %v1668_v31 }
 0x129   : > { %v1623_v42 = vpop.f32.mrf.mxu0  ;;  %v1163_v46 = vmul.f32 %v934_v23, %v934_v23  ;;  %v1671_v48 = vpop.f32.mrf.mxu1  ;;  %v1125_v52 = vadd.f32 %v1124_v45, %v934_v23 }
 0x12a   : > { %1552 = vst [vmem:[%s1954_s14 + $0x30] sm:$0xff] %v1500_v38   ;;  %v935_v47 = vadd.f32 %v1622_v40, %v1939_v56  ;;  %1560 = vst [vmem:[%s1954_s14 + $0x70] sm:$0xff] %v1540_v43   ;;  %v951_v60 = vadd.f32 %v1670_v44, %v1939_v56  ;;  %v1175_v38 = vmul.f32 %v2030_v27, %v2030_v27 }
 0x12b   : > { %v1624_v49 = vpop.f32.mrf.mxu0  ;;  %v1672_v59 = vpop.f32.mrf.mxu1  ;;  %v1194_v62 = vadd.f32 %v1193_v35, %v1163_v46 }
 0x12c   : > { %v1164_v55 = vmul.f32 %v935_v47, %v935_v47  ;;  %v1625_v57 = vadd.f32 %v1624_v49, %v1623_v42  ;;  %v1673_v36 = vadd.f32 %v1672_v59, %v1671_v48  ;;  %v1126_v2 = vadd.f32 %v1125_v52, %v935_v47 }
 0x12d   : > { %v1176_v42 = vmul.f32 %v2043_v50, %v2043_v50  ;;  %v1180_v49 = vmul.f32 %v951_v60, %v951_v60 }
 0x12e   : > { %v936_v4 = vadd.f32 %v1625_v57, %v1939_v56  ;;  %v952_v5 = vadd.f32 %v1673_v36, %v1939_v56  ;;  %v1195_v6 = vadd.f32 %v1194_v62, %v1164_v55  ;;  %v1168_v56 = vmul.f32 %v1966_v15, %v1966_v15 }
 0x130   : > { %v1505_v7 = vpack.c.bf16 %v936_v4, %v935_v47  ;;  %v1127_v53 = vadd.f32 %v1126_v2, %v936_v4  ;;  %v1165_v8 = vmul.f32 %v936_v4, %v936_v4  ;;  %v1545_v9 = vpack.c.bf16 %v952_v5, %v951_v60 }
 0x131   : > { %v1181_v55 = vmul.f32 %v952_v5, %v952_v5 }
 0x132   : > { %1553 = vst [vmem:[%s1954_s14 + $0x38] sm:$0xff] %v1505_v7   ;;  %v1128_v11 = vadd.f32 %v1127_v53, %v1943_v61  ;;  %v1196_v12 = vadd.f32 %v1195_v6, %v1165_v8  ;;  %1561 = vst [vmem:[%s1954_s14 + $0x78] sm:$0xff] %v1545_v9  }
 0x134   : > { %v1129_v14 = vadd.f32 %v1128_v11, %v1957_v3  ;;  %v1197_v16 = vadd.f32 %v1196_v12, %v1166_v10  ;;  %v1171_v3 = vmul.f32 %v1991_v39, %v1991_v39 }
 0x136   : > { %v1130_v20 = vadd.f32 %v1129_v14, %v1966_v15  ;;  %v1198_v54 = vadd.f32 %v1197_v16, %v1167_v13  ;;  %v1172_v15 = vmul.f32 %v1999_v51, %v1999_v51 }
 0x138   : > { %v1131_v25 = vadd.f32 %v1130_v20, %v1975_v21  ;;  %v1199_v61 = vadd.f32 %v1198_v54, %v1168_v56  ;;  %v1173_v21 = vmul.f32 %v2006_v58, %v2006_v58 }
 0x13a   : > { %v1200_v0 = vadd.f32 %v1199_v61, %v1169_v22  ;;  %v1132_v28 = vadd.f32 %v1131_v25, %v1984_v33  ;;  %v1174_v33 = vmul.f32 %v2024_v19, %v2024_v19 }
 0x13c   : > { %v1133_v29 = vadd.f32 %v1132_v28, %v1991_v39  ;;  %v1201_v30 = vadd.f32 %v1200_v0, %v1170_v63 }
 0x13e   : > { %v1134_v23 = vadd.f32 %v1133_v29, %v1999_v51  ;;  %v1202_v31 = vadd.f32 %v1201_v30, %v1171_v3 }
 0x140   : > { %v1135_v17 = vadd.f32 %v1134_v23, %v2006_v58  ;;  %v1203_v32 = vadd.f32 %v1202_v31, %v1172_v15 }
 0x142   : > { %v1136_v34 = vadd.f32 %v1135_v17, %v2024_v19  ;;  %v1204_v37 = vadd.f32 %v1203_v32, %v1173_v21  ;;  %v1177_v19 = vmul.f32 %v2048_v1, %v2048_v1 }
 0x144   : > { %v1137_v39 = vadd.f32 %v1136_v34, %v2030_v27  ;;  %v1205_v40 = vadd.f32 %v1204_v37, %v1174_v33  ;;  %v1178_v27 = vmul.f32 %v2057_v26, %v2057_v26 }
 0x146   : > { %v1206_v51 = vadd.f32 %v1205_v40, %v1175_v38  ;;  %v1138_v41 = vadd.f32 %v1137_v39, %v2043_v50  ;;  %v1179_v50 = vmul.f32 %v2061_v24, %v2061_v24 }
 0x148   : > { %v1207_v58 = vadd.f32 %v1206_v51, %v1176_v42  ;;  %v1139_v43 = vadd.f32 %v1138_v41, %v2048_v1 }
 0x14a   : > { %v1208_v44 = vadd.f32 %v1207_v58, %v1177_v19  ;;  %v1140_v18 = vadd.f32 %v1139_v43, %v2057_v26 }
 0x14c   : > { %v1209_v45 = vadd.f32 %v1208_v44, %v1178_v27  ;;  %v1141_v46 = vadd.f32 %v1140_v18, %v2061_v24 }
 0x14e   : > { %v1210_v47 = vadd.f32 %v1209_v45, %v1179_v50  ;;  %v1142_v48 = vadd.f32 %v1141_v46, %v951_v60 }
 0x150   : > { %v1211_v35 = vadd.f32 %v1210_v47, %v1180_v49  ;;  %v1143_v52 = vadd.f32 %v1142_v48, %v952_v5 }
 0x152   : > { %v1144_v1 = vrot.slane %v1143_v52, 4  ;;  %v1212_v57 = vadd.f32 %v1211_v35, %v1181_v55 }
 0x154   : > { %v1145_v59 = vadd.f32 %v1144_v1, %v1143_v52  ;;  %v1213_v36 = vrot.slane %v1212_v57, 4 }
 0x156   : > { %v1146_v62 = vrot.slane %v1145_v59, 2  ;;  %v1214_v26 = vadd.f32 %v1213_v36, %v1212_v57 }
 0x158   : > { %v1147_v2 = vadd.f32 %v1146_v62, %v1145_v59  ;;  %v1215_v4 = vrot.slane %v1214_v26, 2 }
 0x15a   : > { %v1148_v6 = vrot.slane %v1147_v2, 1  ;;  %v1216_v7 = vadd.f32 %v1215_v4, %v1214_v26 }
 0x15c   : > { %v1217_v24 = vrot.slane %v1216_v7, 1  ;;  %v1149_v60 = vadd.f32 %v1148_v6, %v1147_v2 }
 0x15e   : > { %v1218_v5 = vadd.f32 %v1217_v24, %v1216_v7 }
 0x160   : > { %v1220_v53 = vsel %vm1219_vm0, %v1149_v60, %v1218_v5 }
 0x161   : > { %1221 = vst [vmem:[%s264_s22] sm:$0x3] %v1220_v53 }
 0x162 PF: > { %s15_s17 = sadd.s32 1, %s1800_s17   ;;  %s2134_s15 = smov %s1796_s16 }
 0x163   : > { %p12_p6 = scmp.ge.s32.totalorder %s15_s17, 4   ;;  %s2135_s16 = smov %s2137_s18 }
 0x165   :  { %14 = sbr.rel (!%p12_p6) target bundleno = 2 (0x2), region = 85 }

// kernel: resnet_generator.28
= control target key start
LH: loop header
LB: loop body
LE: loop exit
PB: predicated region body
PF: predicated region fallthrough
CT: control target
= control target key end

     0   :  { %s422_s0 = inlined_call_operand.vmem [shape: bf16[128,128], index: 0, kind: input, shape index: {}]   ;;  %s423_s1 = inlined_call_operand.vmem [shape: f32[1,128], index: 1, kind: input, shape index: {}]   ;;  %s424_s2 = inlined_call_operand.vmem [shape: f32[1,128], index: 2, kind: input, shape index: {}]   ;;  %s425_s3 = inlined_call_operand.vmem [shape: bf16[128,128], index: 3, kind: output, shape index: {}]  }
   0x1   :  { %v227_v0 = vld [vmem:[%s422_s0] sm:$0xff]   ;;  %v298_v4 = vld [vmem:[%s422_s0 + $0x8] sm:$0xff]   ;;  %v299_v5 = vld [vmem:[%s422_s0 + $0x10] sm:$0xff]  }
   0x2   :  { %v338_v1 = vld [vmem:[%s423_s1] ss:$0 sm:$0xff]  ;;  %v228_v2 = vunpack.c.l.bf16 %v227_v0  ;;  %v229_v3 = vunpack.c.h.bf16 %v227_v0  ;;  %v300_v6 = vld [vmem:[%s422_s0 + $0x18] sm:$0xff]   ;;  %v232_v8 = vunpack.c.l.bf16 %v298_v4  ;;  %v233_v9 = vunpack.c.h.bf16 %v298_v4  ;;  %v302_v33 = vld [vmem:[%s422_s0 + $0x28] sm:$0xff]  }
   0x3   :  { %v352_v7 = vld [vmem:[%s424_s2] ss:$0 sm:$0xff]  ;;  %v236_v10 = vunpack.c.l.bf16 %v299_v5  ;;  %v237_v11 = vunpack.c.h.bf16 %v299_v5  ;;  %v240_v14 = vunpack.c.l.bf16 %v300_v6  ;;  %v241_v15 = vunpack.c.h.bf16 %v300_v6  ;;  %v303_v38 = vld [vmem:[%s422_s0 + $0x30] sm:$0xff]   ;;  %v304_v43 = vld [vmem:[%s422_s0 + $0x38] sm:$0xff]  }
   0x4   :  { %v53_v12 = vmul.f32 %v228_v2, %v338_v1  ;;  %v54_v13 = vmul.f32 %v229_v3, %v338_v1  ;;  %v55_v16 = vmul.f32 %v232_v8, %v338_v1  ;;  %v56_v17 = vmul.f32 %v233_v9, %v338_v1  ;;  %v301_v28 = vld [vmem:[%s422_s0 + $0x20] sm:$0xff]  }
   0x5   :  { %v57_v18 = vmul.f32 %v236_v10, %v338_v1  ;;  %v58_v19 = vmul.f32 %v237_v11, %v338_v1  ;;  %v59_v22 = vmul.f32 %v240_v14, %v338_v1  ;;  %v60_v23 = vmul.f32 %v241_v15, %v338_v1 }
   0x6   :  { %v76_v20 = vadd.f32 %v352_v7, %v53_v12  ;;  %v77_v21 = vadd.f32 %v352_v7, %v54_v13  ;;  %v78_v24 = vadd.f32 %v352_v7, %v55_v16  ;;  %v79_v25 = vadd.f32 %v352_v7, %v56_v17 }
   0x7   :  { %v80_v26 = vadd.f32 %v352_v7, %v57_v18  ;;  %v81_v27 = vadd.f32 %v352_v7, %v58_v19  ;;  %v82_v31 = vadd.f32 %v352_v7, %v59_v22  ;;  %v83_v32 = vadd.f32 %v352_v7, %v60_v23 }
   0x8   :  { %v92_v29 = vmax.f32 %v76_v20, 0.0  ;;  %v93_v30 = vmax.f32 %v77_v21, 0.0  ;;  %v94_v34 = vmax.f32 %v78_v24, 0.0  ;;  %v95_v35 = vmax.f32 %v79_v25, 0.0 }
   0x9   :  { %v96_v36 = vmax.f32 %v80_v26, 0.0  ;;  %v97_v37 = vmax.f32 %v81_v27, 0.0  ;;  %v98_v40 = vmax.f32 %v82_v31, 0.0  ;;  %v99_v41 = vmax.f32 %v83_v32, 0.0 }
   0xa   :  { %v261_v39 = vpack.c.bf16 %v93_v30, %v92_v29  ;;  %v244_v42 = vunpack.c.l.bf16 %v301_v28  ;;  %v266_v44 = vpack.c.bf16 %v95_v35, %v94_v34  ;;  %v245_v46 = vunpack.c.h.bf16 %v301_v28 }
   0xb   :  { %v271_v45 = vpack.c.bf16 %v97_v37, %v96_v36  ;;  %v248_v47 = vunpack.c.l.bf16 %v302_v33  ;;  %v276_v48 = vpack.c.bf16 %v99_v41, %v98_v40  ;;  %v249_v50 = vunpack.c.h.bf16 %v302_v33 }
   0xc   :  { %262 = vst [vmem:[%s425_s3] sm:$0xff] %v261_v39   ;;  %v61_v49 = vmul.f32 %v244_v42, %v338_v1  ;;  %v252_v51 = vunpack.c.l.bf16 %v303_v38  ;;  %305 = vst [vmem:[%s425_s3 + $0x8] sm:$0xff] %v266_v44   ;;  %v62_v52 = vmul.f32 %v245_v46, %v338_v1  ;;  %v253_v54 = vunpack.c.h.bf16 %v303_v38 }
   0xd   :  { %306 = vst [vmem:[%s425_s3 + $0x10] sm:$0xff] %v271_v45   ;;  %v63_v53 = vmul.f32 %v248_v47, %v338_v1  ;;  %v256_v55 = vunpack.c.l.bf16 %v304_v43  ;;  %307 = vst [vmem:[%s425_s3 + $0x18] sm:$0xff] %v276_v48   ;;  %v64_v57 = vmul.f32 %v249_v50, %v338_v1  ;;  %v257_v59 = vunpack.c.h.bf16 %v304_v43 }
   0xe   :  { %v84_v56 = vadd.f32 %v352_v7, %v61_v49  ;;  %v65_v58 = vmul.f32 %v252_v51, %v338_v1  ;;  %v85_v60 = vadd.f32 %v352_v7, %v62_v52  ;;  %v66_v62 = vmul.f32 %v253_v54, %v338_v1 }
   0xf   :  { %v86_v61 = vadd.f32 %v352_v7, %v63_v53  ;;  %v67_v63 = vmul.f32 %v256_v55, %v338_v1  ;;  %v87_v2 = vadd.f32 %v352_v7, %v64_v57  ;;  %v68_v4 = vmul.f32 %v257_v59, %v338_v1 }
  0x10   :  { %v100_v0 = vmax.f32 %v84_v56, 0.0  ;;  %v88_v3 = vadd.f32 %v352_v7, %v65_v58  ;;  %v101_v5 = vmax.f32 %v85_v60, 0.0  ;;  %v89_v8 = vadd.f32 %v352_v7, %v66_v62 }
  0x11   :  { %v102_v6 = vmax.f32 %v86_v61, 0.0  ;;  %v90_v9 = vadd.f32 %v352_v7, %v67_v63  ;;  %v103_v10 = vmax.f32 %v87_v2, 0.0  ;;  %v91_v12 = vadd.f32 %v352_v7, %v68_v4 }
  0x12   :  { %v104_v11 = vmax.f32 %v88_v3, 0.0  ;;  %v281_v13 = vpack.c.bf16 %v101_v5, %v100_v0  ;;  %v105_v14 = vmax.f32 %v89_v8, 0.0 }
  0x13   :  { %v106_v15 = vmax.f32 %v90_v9, 0.0  ;;  %v286_v16 = vpack.c.bf16 %v103_v10, %v102_v6  ;;  %v107_v17 = vmax.f32 %v91_v12, 0.0 }
  0x14   :  { %308 = vst [vmem:[%s425_s3 + $0x20] sm:$0xff] %v281_v13   ;;  %v291_v1 = vpack.c.bf16 %v105_v14, %v104_v11 }
  0x15   :  { %309 = vst [vmem:[%s425_s3 + $0x28] sm:$0xff] %v286_v16   ;;  %v296_v18 = vpack.c.bf16 %v107_v17, %v106_v15 }
  0x16   :  { %310 = vst [vmem:[%s425_s3 + $0x30] sm:$0xff] %v291_v1  }
  0x17   :  { %311 = vst [vmem:[%s425_s3 + $0x38] sm:$0xff] %v296_v18  }

// kernel: resnet_generator.27
= control target key start
LH: loop header
LB: loop body
LE: loop exit
PB: predicated region body
PF: predicated region fallthrough
CT: control target
= control target key end

     0   :  { %vm490_vm0 = vcmask 1040384   ;;  %s792_s1 = inlined_call_operand.vmem [shape: bf16[128,128], index: 1, kind: input, shape index: {}]   ;;  %s793_s0 = inlined_call_operand.vmem [shape: bf16[128,128], index: 0, kind: input, shape index: {}]   ;;  %s794_s2 = inlined_call_operand.vmem [shape: f32[1,128], index: 2, kind: input, shape index: {}]   ;;  %s795_s3 = inlined_call_operand.vmem [shape: bf16[128,128], index: 3, kind: output, shape index: {0}]   ;;  %s796_s4 = inlined_call_operand.vmem [shape: f32[1,2,128], index: 4, kind: output, shape index: {1}]  }
   0x1   :  { %v661_v0 = vld [vmem:[%s792_s1 + $0x38] sm:$0xff]   ;;  %v662_v1 = vld [vmem:[%s792_s1 + $0x30] sm:$0xff]   ;;  %v663_v2 = vld [vmem:[%s792_s1 + $0x28] sm:$0xff]  }
   0x2   :  { %613 = vmatprep.subr.bf16.mxu0 %v661_v0  ;;  %645 = vmatprep.subr.bf16.mxu1 %v661_v0  ;;  %v664_v3 = vld [vmem:[%s792_s1 + $0x20] sm:$0xff]   ;;  %v665_v5 = vld [vmem:[%s792_s1 + $0x18] sm:$0xff]   ;;  %v666_v7 = vld [vmem:[%s792_s1 + $0x10] sm:$0xff]  }
   0x3   :  { %614 = vmatpush3.bf16.msra.mxu0 %v661_v0  ;;  %653 = vmatpush3.bf16.msra.mxu1 %v661_v0  ;;  %v669_v4 = vld [vmem:[%s793_s0] sm:$0xff]   ;;  %v667_v8 = vld [vmem:[%s792_s1 + $0x8] sm:$0xff]   ;;  %v671_v12 = vld [vmem:[%s793_s0 + $0x10] sm:$0xff]  }
   0x4   :  { %615 = vmatprep.subr.bf16.mxu0 %v662_v1  ;;  %646 = vmatprep.subr.bf16.mxu1 %v662_v1  ;;  %v673_v6 = vld [vmem:[%s793_s0 + $0x20] sm:$0xff]   ;;  %v670_v10 = vld [vmem:[%s793_s0 + $0x8] sm:$0xff]   ;;  %v675_v13 = vld [vmem:[%s793_s0 + $0x30] sm:$0xff]  }
   0x5   :  { %629 = vmatprep.mubr.bf16.mxu0 %v669_v4  ;;  %637 = vmatprep.mubr.bf16.mxu1 %v673_v6  ;;  %v668_v9 = vld [vmem:[%s792_s1] sm:$0xff]   ;;  %v674_v11 = vld [vmem:[%s793_s0 + $0x28] sm:$0xff]   ;;  %v672_v14 = vld [vmem:[%s793_s0 + $0x18] sm:$0xff]  }
   0x6   :  { %v676_v15 = vld [vmem:[%s793_s0 + $0x38] sm:$0xff]   ;;  %v517_v18 = vld [vmem:[%s794_s2] ss:$0 sm:$0xff] }
   0x7   :  { %616 = vmatpush3.bf16.msra.mxu0 %v662_v1  ;;  %654 = vmatpush3.bf16.msra.mxu1 %v662_v1 }
   0x8   :  { %617 = vmatprep.subr.bf16.mxu0 %v663_v2  ;;  %647 = vmatprep.subr.bf16.mxu1 %v663_v2 }
   0xb   :  { %618 = vmatpush3.bf16.msra.mxu0 %v663_v2  ;;  %655 = vmatpush3.bf16.msra.mxu1 %v663_v2 }
   0xc   :  { %619 = vmatprep.subr.bf16.mxu0 %v664_v3  ;;  %648 = vmatprep.subr.bf16.mxu1 %v664_v3 }
   0xf   :  { %620 = vmatpush3.bf16.msra.mxu0 %v664_v3  ;;  %656 = vmatpush3.bf16.msra.mxu1 %v664_v3 }
  0x10   :  { %621 = vmatprep.subr.bf16.mxu0 %v665_v5  ;;  %649 = vmatprep.subr.bf16.mxu1 %v665_v5 }
  0x13   :  { %622 = vmatpush3.bf16.msra.mxu0 %v665_v5  ;;  %657 = vmatpush3.bf16.msra.mxu1 %v665_v5 }
  0x14   :  { %623 = vmatprep.subr.bf16.mxu0 %v666_v7  ;;  %650 = vmatprep.subr.bf16.mxu1 %v666_v7 }
  0x17   :  { %624 = vmatpush3.bf16.msra.mxu0 %v666_v7  ;;  %658 = vmatpush3.bf16.msra.mxu1 %v666_v7 }
  0x18   :  { %625 = vmatprep.subr.bf16.mxu0 %v667_v8  ;;  %651 = vmatprep.subr.bf16.mxu1 %v667_v8 }
  0x1b   :  { %626 = vmatpush3.bf16.msra.mxu0 %v667_v8  ;;  %659 = vmatpush3.bf16.msra.mxu1 %v667_v8 }
  0x1c   :  { %627 = vmatprep.subr.bf16.mxu0 %v668_v9  ;;  %652 = vmatprep.subr.bf16.mxu1 %v668_v9 }
  0x1f   :  { %628 = vmatpush3.bf16.msra.mxu0 %v668_v9  ;;  %660 = vmatpush3.bf16.msra.mxu1 %v668_v9 }
  0x22   :  { %630 = vmatmul.mubr.bf16.vlgmr.msra.gmra.mxu0 %v670_v10  ;;  %638 = vmatmul.mubr.bf16.vlgmr.msra.gmra.mxu1 %v674_v11 }
  0x23   :  { %633 = vmatprep.mubr.bf16.mxu0 %v671_v12  ;;  %641 = vmatprep.mubr.bf16.mxu1 %v675_v13 }
  0x2a   :  { %634 = vmatmul.mubr.bf16.gmra.mxu0 %v672_v14  ;;  %642 = vmatmul.mubr.bf16.gmra.mxu1 %v676_v15 }
  0xe2   :  { %v631_v16 = vpop.f32.mrf.mxu0  ;;  %v639_v17 = vpop.f32.mrf.mxu1 }
  0xe3   :  { %v753_v21 = vadd.f32 %v639_v17, %v517_v18  ;;  %v338_v24 = vadd.f32 %v631_v16, %v517_v18 }
  0xe4   :  { %v215_v19 = vpop.f32.mrf.mxu0  ;;  %v247_v20 = vpop.f32.mrf.mxu1 }
  0xe5   :  { %v336_v25 = vadd.f32 %v517_v18, %v215_v19  ;;  %v344_v29 = vadd.f32 %v517_v18, %v247_v20  ;;  %v455_v44 = vmul.f32 %v338_v24, %v338_v24  ;;  %v463_v20 = vmul.f32 %v753_v21, %v753_v21 }
  0xe6   :  { %v632_v22 = vpop.f32.mrf.mxu0  ;;  %v640_v23 = vpop.f32.mrf.mxu1 }
  0xe7   :  { %v339_v26 = vadd.f32 %v632_v22, %v517_v18  ;;  %v755_v27 = vadd.f32 %v640_v23, %v517_v18  ;;  %v453_v37 = vmul.f32 %v336_v25, %v336_v25  ;;  %v461_v14 = vmul.f32 %v344_v29, %v344_v29 }
  0xe8   :  { %v218_v28 = vpop.f32.mrf.mxu0  ;;  %v250_v30 = vpop.f32.mrf.mxu1 }
  0xe9   :  { %v558_v31 = vpack.c.bf16 %v339_v26, %v338_v24  ;;  %v337_v32 = vadd.f32 %v517_v18, %v218_v28  ;;  %v578_v33 = vpack.c.bf16 %v755_v27, %v753_v21  ;;  %v345_v35 = vadd.f32 %v517_v18, %v250_v30 }
  0xea   :  { %v635_v34 = vpop.f32.mrf.mxu0  ;;  %v643_v36 = vpop.f32.mrf.mxu1  ;;  %v456_v48 = vmul.f32 %v339_v26, %v339_v26 }
  0xeb   :  { %590 = vst [vmem:[%s795_s3 + $0x8] sm:$0xff] %v558_v31   ;;  %v553_v38 = vpack.c.bf16 %v337_v32, %v336_v25  ;;  %v432_v39 = vadd.f32 %v337_v32, %v336_v25  ;;  %v454_v40 = vmul.f32 %v337_v32, %v337_v32  ;;  %594 = vst [vmem:[%s795_s3 + $0x28] sm:$0xff] %v578_v33  }
  0xec   :  { %v231_v41 = vpop.f32.mrf.mxu0  ;;  %v573_v42 = vpack.c.bf16 %v345_v35, %v344_v29  ;;  %v263_v43 = vpop.f32.mrf.mxu1  ;;  %v350_v50 = vadd.f32 %v643_v36, %v517_v18  ;;  %v342_v53 = vadd.f32 %v635_v34, %v517_v18 }
  0xed   :  { %554 = vst [vmem:[%s795_s3] sm:$0xff] %v553_v38   ;;  %v433_v45 = vadd.f32 %v432_v39, %v338_v24  ;;  %v469_v46 = vadd.f32 %v454_v40, %v453_v37  ;;  %v340_v47 = vadd.f32 %v517_v18, %v231_v41  ;;  %v348_v57 = vadd.f32 %v517_v18, %v263_v43 }
  0xee   :  { %v636_v49 = vpop.f32.mrf.mxu0  ;;  %593 = vst [vmem:[%s795_s3 + $0x20] sm:$0xff] %v573_v42   ;;  %v644_v51 = vpop.f32.mrf.mxu1  ;;  %v459_v8 = vmul.f32 %v342_v53, %v342_v53  ;;  %v464_v24 = vmul.f32 %v755_v27, %v755_v27  ;;  %v467_v34 = vmul.f32 %v350_v50, %v350_v50 }
  0xef   :  { %v470_v52 = vadd.f32 %v469_v46, %v455_v44  ;;  %v434_v54 = vadd.f32 %v433_v45, %v339_v26  ;;  %v343_v55 = vadd.f32 %v636_v49, %v517_v18  ;;  %v351_v58 = vadd.f32 %v644_v51, %v517_v18 }
  0xf0   :  { %v234_v56 = vpop.f32.mrf.mxu0  ;;  %v266_v59 = vpop.f32.mrf.mxu1  ;;  %v457_v61 = vmul.f32 %v340_v47, %v340_v47  ;;  %v465_v30 = vmul.f32 %v348_v57, %v348_v57 }
  0xf1   :  { %v435_v60 = vadd.f32 %v434_v54, %v340_v47  ;;  %v471_v62 = vadd.f32 %v470_v52, %v456_v48  ;;  %v568_v63 = vpack.c.bf16 %v343_v55, %v342_v53  ;;  %v341_v0 = vadd.f32 %v517_v18, %v234_v56 }
  0xf2   :  { %v588_v1 = vpack.c.bf16 %v351_v58, %v350_v50  ;;  %v349_v2 = vadd.f32 %v517_v18, %v266_v59  ;;  %v460_v11 = vmul.f32 %v343_v55, %v343_v55  ;;  %v462_v18 = vmul.f32 %v345_v35, %v345_v35 }
  0xf3   :  { %v472_v3 = vadd.f32 %v471_v62, %v457_v61  ;;  %592 = vst [vmem:[%s795_s3 + $0x18] sm:$0xff] %v568_v63   ;;  %v563_v4 = vpack.c.bf16 %v341_v0, %v340_v47  ;;  %v436_v5 = vadd.f32 %v435_v60, %v341_v0  ;;  %v458_v6 = vmul.f32 %v341_v0, %v341_v0 }
  0xf4   :  { %596 = vst [vmem:[%s795_s3 + $0x38] sm:$0xff] %v588_v1   ;;  %v583_v7 = vpack.c.bf16 %v349_v2, %v348_v57  ;;  %v466_v33 = vmul.f32 %v349_v2, %v349_v2  ;;  %v468_v37 = vmul.f32 %v351_v58, %v351_v58 }
  0xf5   :  { %591 = vst [vmem:[%s795_s3 + $0x10] sm:$0xff] %v563_v4   ;;  %v437_v9 = vadd.f32 %v436_v5, %v342_v53  ;;  %v473_v10 = vadd.f32 %v472_v3, %v458_v6 }
  0xf6   :  { %595 = vst [vmem:[%s795_s3 + $0x30] sm:$0xff] %v583_v7  }
  0xf7   :  { %v474_v12 = vadd.f32 %v473_v10, %v459_v8  ;;  %v438_v13 = vadd.f32 %v437_v9, %v343_v55 }
  0xf9   :  { %v439_v15 = vadd.f32 %v438_v13, %v344_v29  ;;  %v475_v16 = vadd.f32 %v474_v12, %v460_v11 }
  0xfb   :  { %v440_v17 = vadd.f32 %v439_v15, %v345_v35  ;;  %v476_v19 = vadd.f32 %v475_v16, %v461_v14 }
  0xfd   :  { %v441_v22 = vadd.f32 %v440_v17, %v753_v21  ;;  %v477_v23 = vadd.f32 %v476_v19, %v462_v18 }
  0xff   :  { %v478_v25 = vadd.f32 %v477_v23, %v463_v20  ;;  %v442_v26 = vadd.f32 %v441_v22, %v755_v27 }
 0x101   :  { %v443_v28 = vadd.f32 %v442_v26, %v348_v57  ;;  %v479_v31 = vadd.f32 %v478_v25, %v464_v24 }
 0x103   :  { %v480_v29 = vadd.f32 %v479_v31, %v465_v30  ;;  %v444_v32 = vadd.f32 %v443_v28, %v349_v2 }
 0x105   :  { %v445_v35 = vadd.f32 %v444_v32, %v350_v50  ;;  %v481_v36 = vadd.f32 %v480_v29, %v466_v33 }
 0x107   :  { %v446_v38 = vadd.f32 %v445_v35, %v351_v58  ;;  %v482_v39 = vadd.f32 %v481_v36, %v467_v34 }
 0x109   :  { %v447_v21 = vrot.slane %v446_v38, 4  ;;  %v483_v40 = vadd.f32 %v482_v39, %v468_v37 }
 0x10b   :  { %v448_v41 = vadd.f32 %v447_v21, %v446_v38  ;;  %v484_v42 = vrot.slane %v483_v40, 4 }
 0x10d   :  { %v449_v43 = vrot.slane %v448_v41, 2  ;;  %v485_v44 = vadd.f32 %v484_v42, %v483_v40 }
 0x10f   :  { %v450_v45 = vadd.f32 %v449_v43, %v448_v41  ;;  %v486_v27 = vrot.slane %v485_v44, 2 }
 0x111   :  { %v451_v46 = vrot.slane %v450_v45, 1  ;;  %v487_v47 = vadd.f32 %v486_v27, %v485_v44 }
 0x113   :  { %v488_v48 = vrot.slane %v487_v47, 1  ;;  %v452_v49 = vadd.f32 %v451_v46, %v450_v45 }
 0x115   :  { %v489_v51 = vadd.f32 %v488_v48, %v487_v47 }
 0x117   :  { %v491_v52 = vsel %vm490_vm0, %v452_v49, %v489_v51 }
 0x118   :  { %492 = vst [vmem:[%s796_s4] sm:$0x3] %v491_v52 }

// kernel: resnet_generator.30
= control target key start
LH: loop header
LB: loop body
LE: loop exit
PB: predicated region body
PF: predicated region fallthrough
CT: control target
= control target key end

     0   :  { %s140_s0 = inlined_call_operand.vmem [shape: bf16[32,128], index: 0, kind: input, shape index: {}]   ;;  %s141_s1 = inlined_call_operand.vmem [shape: f32[1,128], index: 1, kind: input, shape index: {}]   ;;  %s142_s2 = inlined_call_operand.vmem [shape: f32[1,128], index: 2, kind: input, shape index: {}]   ;;  %s143_s3 = inlined_call_operand.vmem [shape: bf16[32,128], index: 3, kind: output, shape index: {}]  }
   0x1   :  { %v83_v0 = vld [vmem:[%s140_s0] sm:$0xff]   ;;  %v100_v4 = vld [vmem:[%s140_s0 + $0x8] sm:$0xff]  }
   0x2   :  { %v72_v1 = vld [vmem:[%s141_s1] ss:$0 sm:$0xff]  ;;  %v84_v2 = vunpack.c.l.bf16 %v83_v0  ;;  %v85_v3 = vunpack.c.h.bf16 %v83_v0  ;;  %v88_v6 = vunpack.c.l.bf16 %v100_v4  ;;  %v89_v7 = vunpack.c.h.bf16 %v100_v4 }
   0x3   :  { %v73_v5 = vld [vmem:[%s142_s2] ss:$0 sm:$0xff] }
   0x4   :  { %v29_v8 = vmul.f32 %v84_v2, %v72_v1  ;;  %v30_v9 = vmul.f32 %v85_v3, %v72_v1  ;;  %v31_v10 = vmul.f32 %v88_v6, %v72_v1  ;;  %v32_v11 = vmul.f32 %v89_v7, %v72_v1 }
   0x6   :  { %v40_v12 = vadd.f32 %v73_v5, %v29_v8  ;;  %v41_v13 = vadd.f32 %v73_v5, %v30_v9  ;;  %v42_v14 = vadd.f32 %v73_v5, %v31_v10  ;;  %v43_v15 = vadd.f32 %v73_v5, %v32_v11 }
   0x8   :  { %v44_v16 = vmax.f32 %v40_v12, 0.0  ;;  %v45_v17 = vmax.f32 %v41_v13, 0.0  ;;  %v46_v18 = vmax.f32 %v42_v14, 0.0  ;;  %v47_v19 = vmax.f32 %v43_v15, 0.0 }
   0xa   :  { %v93_v20 = vpack.c.bf16 %v45_v17, %v44_v16  ;;  %v98_v21 = vpack.c.bf16 %v47_v19, %v46_v18 }
   0xc   :  { %94 = vst [vmem:[%s143_s3] sm:$0xff] %v93_v20   ;;  %101 = vst [vmem:[%s143_s3 + $0x8] sm:$0xff] %v98_v21  }

// kernel: resnet_generator.29
= control target key start
LH: loop header
LB: loop body
LE: loop exit
PB: predicated region body
PF: predicated region fallthrough
CT: control target
= control target key end

     0   :  { %vm298_vm0 = vcmask 1040384   ;;  %s512_s1 = inlined_call_operand.vmem [shape: bf16[256,128], index: 1, kind: input, shape index: {}]   ;;  %s513_s0 = inlined_call_operand.vmem [shape: bf16[32,256], index: 0, kind: input, shape index: {}]   ;;  %s514_s2 = inlined_call_operand.vmem [shape: f32[1,128], index: 2, kind: input, shape index: {}]   ;;  %s515_s3 = inlined_call_operand.vmem [shape: bf16[32,128], index: 3, kind: output, shape index: {0}]   ;;  %s516_s4 = inlined_call_operand.vmem [shape: f32[1,2,128], index: 4, kind: output, shape index: {1}]  }
   0x1   :  { %v393_v0 = vld [vmem:[%s512_s1 + $0x78] sm:$0xff]   ;;  %v395_v2 = vld [vmem:[%s512_s1 + $0x70] sm:$0xff]   ;;  %v397_v4 = vld [vmem:[%s512_s1 + $0x68] sm:$0xff]  }
   0x2   :  { %v394_v1 = vld [vmem:[%s512_s1 + $0x38] sm:$0xff]   ;;  %349 = vmatprep.subr.bf16.mxu0 %v393_v0  ;;  %377 = vmatprep.subr.bf16.mxu1 %v393_v0  ;;  %v396_v3 = vld [vmem:[%s512_s1 + $0x30] sm:$0xff]   ;;  %v398_v5 = vld [vmem:[%s512_s1 + $0x28] sm:$0xff]  }
   0x3   :  { %350 = vmatpush3.bf16.msra.mxu0 %v394_v1  ;;  %385 = vmatpush3.bf16.msra.mxu1 %v394_v1  ;;  %v399_v6 = vld [vmem:[%s512_s1 + $0x60] sm:$0xff]   ;;  %v401_v8 = vld [vmem:[%s512_s1 + $0x58] sm:$0xff]   ;;  %v403_v10 = vld [vmem:[%s512_s1 + $0x50] sm:$0xff]  }
   0x4   :  { %351 = vmatprep.subr.bf16.mxu0 %v395_v2  ;;  %378 = vmatprep.subr.bf16.mxu1 %v395_v2  ;;  %v400_v7 = vld [vmem:[%s512_s1 + $0x20] sm:$0xff]   ;;  %v402_v9 = vld [vmem:[%s512_s1 + $0x18] sm:$0xff]   ;;  %v404_v13 = vld [vmem:[%s512_s1 + $0x10] sm:$0xff]  }
   0x5   :  { %v411_v11 = vld [vmem:[%s513_s0 + $0x4] ss:$8 sps:$4 sm:$0xff]   ;;  %v414_v12 = vld [vmem:[%s513_s0 + $0x14] ss:$8 sps:$4 sm:$0xff]   ;;  %v409_v18 = vld [vmem:[%s513_s0] ss:$8 sps:$4 sm:$0xff]  }
   0x6   :  { %v405_v14 = vld [vmem:[%s512_s1 + $0x48] sm:$0xff]   ;;  %213 = vmatprep.mubr.bf16.mxu0 %v411_v11  ;;  %221 = vmatprep.mubr.bf16.mxu1 %v414_v12  ;;  %v407_v16 = vld [vmem:[%s512_s1 + $0x40] sm:$0xff]   ;;  %v412_v19 = vld [vmem:[%s513_s0 + $0x10] ss:$8 sps:$4 sm:$0xff]  }
   0x7   :  { %352 = vmatpush3.bf16.msra.mxu0 %v396_v3  ;;  %386 = vmatpush3.bf16.msra.mxu1 %v396_v3  ;;  %v406_v15 = vld [vmem:[%s512_s1 + $0x8] sm:$0xff]   ;;  %v408_v17 = vld [vmem:[%s512_s1] sm:$0xff]  }
   0x8   :  { %353 = vmatprep.subr.bf16.mxu0 %v397_v4  ;;  %379 = vmatprep.subr.bf16.mxu1 %v397_v4  ;;  %v329_v25 = vld [vmem:[%s514_s2] ss:$0 sm:$0xff] }
   0xb   :  { %354 = vmatpush3.bf16.msra.mxu0 %v398_v5  ;;  %387 = vmatpush3.bf16.msra.mxu1 %v398_v5 }
   0xc   :  { %355 = vmatprep.subr.bf16.mxu0 %v399_v6  ;;  %380 = vmatprep.subr.bf16.mxu1 %v399_v6 }
   0xf   :  { %356 = vmatpush3.bf16.msra.mxu0 %v400_v7  ;;  %388 = vmatpush3.bf16.msra.mxu1 %v400_v7 }
  0x10   :  { %357 = vmatprep.subr.bf16.mxu0 %v401_v8  ;;  %381 = vmatprep.subr.bf16.mxu1 %v401_v8 }
  0x13   :  { %358 = vmatpush3.bf16.msra.mxu0 %v402_v9  ;;  %389 = vmatpush3.bf16.msra.mxu1 %v402_v9 }
  0x14   :  { %359 = vmatprep.subr.bf16.mxu0 %v403_v10  ;;  %382 = vmatprep.subr.bf16.mxu1 %v403_v10 }
  0x17   :  { %360 = vmatpush3.bf16.msra.mxu0 %v404_v13  ;;  %390 = vmatpush3.bf16.msra.mxu1 %v404_v13 }
  0x18   :  { %361 = vmatprep.subr.bf16.mxu0 %v405_v14  ;;  %383 = vmatprep.subr.bf16.mxu1 %v405_v14 }
  0x1b   :  { %362 = vmatpush3.bf16.msra.mxu0 %v406_v15  ;;  %391 = vmatpush3.bf16.msra.mxu1 %v406_v15 }
  0x1c   :  { %363 = vmatprep.subr.bf16.mxu0 %v407_v16  ;;  %384 = vmatprep.subr.bf16.mxu1 %v407_v16 }
  0x1f   :  { %364 = vmatpush3.bf16.msra.mxu0 %v408_v17  ;;  %392 = vmatpush3.bf16.msra.mxu1 %v408_v17 }
  0x22   :  { %214 = vmatmul.mubr.bf16.vlgmr.msra.gmra.mxu0 %v409_v18  ;;  %222 = vmatmul.mubr.bf16.vlgmr.msra.gmra.mxu1 %v412_v19 }
  0xe2   :  { %v365_v20 = vpop.f32.mrf.mxu0  ;;  %v371_v21 = vpop.f32.mrf.mxu1 }
  0xe4   :  { %v366_v22 = vpop.f32.mrf.mxu0  ;;  %v372_v23 = vpop.f32.mrf.mxu1 }
  0xe5   :  { %v367_v24 = vadd.f32 %v366_v22, %v365_v20  ;;  %v373_v28 = vadd.f32 %v372_v23, %v371_v21 }
  0xe6   :  { %v368_v26 = vpop.f32.mrf.mxu0  ;;  %v374_v27 = vpop.f32.mrf.mxu1 }
  0xe7   :  { %v252_v29 = vadd.f32 %v367_v24, %v329_v25  ;;  %v254_v34 = vadd.f32 %v373_v28, %v329_v25 }
  0xe8   :  { %v369_v30 = vpop.f32.mrf.mxu0  ;;  %v375_v31 = vpop.f32.mrf.mxu1 }
  0xe9   :  { %v370_v32 = vadd.f32 %v369_v30, %v368_v26  ;;  %v376_v33 = vadd.f32 %v375_v31, %v374_v27  ;;  %v285_v37 = vmul.f32 %v252_v29, %v252_v29  ;;  %v287_v42 = vmul.f32 %v254_v34, %v254_v34 }
  0xeb   :  { %v253_v35 = vadd.f32 %v370_v32, %v329_v25  ;;  %v255_v36 = vadd.f32 %v376_v33, %v329_v25 }
  0xed   :  { %v341_v38 = vpack.c.bf16 %v253_v35, %v252_v29  ;;  %v276_v39 = vadd.f32 %v253_v35, %v252_v29  ;;  %v286_v40 = vmul.f32 %v253_v35, %v253_v35  ;;  %v346_v41 = vpack.c.bf16 %v255_v36, %v254_v34 }
  0xee   :  { %v288_v46 = vmul.f32 %v255_v36, %v255_v36 }
  0xef   :  { %342 = vst [vmem:[%s515_s3] sm:$0xff] %v341_v38   ;;  %v289_v43 = vadd.f32 %v286_v40, %v285_v37  ;;  %348 = vst [vmem:[%s515_s3 + $0x8] sm:$0xff] %v346_v41   ;;  %v277_v44 = vadd.f32 %v276_v39, %v254_v34 }
  0xf1   :  { %v278_v45 = vadd.f32 %v277_v44, %v255_v36  ;;  %v290_v47 = vadd.f32 %v289_v43, %v287_v42 }
  0xf3   :  { %v279_v48 = vrot.slane %v278_v45, 4  ;;  %v291_v49 = vadd.f32 %v290_v47, %v288_v46 }
  0xf5   :  { %v280_v50 = vadd.f32 %v279_v48, %v278_v45  ;;  %v292_v51 = vrot.slane %v291_v49, 4 }
  0xf7   :  { %v281_v52 = vrot.slane %v280_v50, 2  ;;  %v293_v53 = vadd.f32 %v292_v51, %v291_v49 }
  0xf9   :  { %v282_v54 = vadd.f32 %v281_v52, %v280_v50  ;;  %v294_v55 = vrot.slane %v293_v53, 2 }
  0xfb   :  { %v283_v56 = vrot.slane %v282_v54, 1  ;;  %v295_v57 = vadd.f32 %v294_v55, %v293_v53 }
  0xfd   :  { %v296_v58 = vrot.slane %v295_v57, 1  ;;  %v284_v59 = vadd.f32 %v283_v56, %v282_v54 }
  0xff   :  { %v297_v60 = vadd.f32 %v296_v58, %v295_v57 }
 0x101   :  { %v299_v61 = vsel %vm298_vm0, %v284_v59, %v297_v60 }
 0x102   :  { %300 = vst [vmem:[%s516_s4] sm:$0x3] %v299_v61 }

// kernel: resnet_generator.34
= control target key start
LH: loop header
LB: loop body
LE: loop exit
PB: predicated region body
PF: predicated region fallthrough
CT: control target
= control target key end

     0   :  { %s171_s0 = inlined_call_operand.vmem [shape: bf16[32,128], index: 0, kind: input, shape index: {}]   ;;  %s172_s1 = inlined_call_operand.vmem [shape: f32[1,128], index: 1, kind: input, shape index: {}]   ;;  %s173_s2 = inlined_call_operand.vmem [shape: f32[1,128], index: 2, kind: input, shape index: {}]   ;;  %s174_s3 = inlined_call_operand.vmem [shape: bf16[32,128], index: 3, kind: input, shape index: {}]   ;;  %s175_s4 = inlined_call_operand.vmem [shape: bf16[32,128], index: 4, kind: output, shape index: {}]  }
   0x1   :  { %v94_v0 = vld [vmem:[%s171_s0] sm:$0xff]   ;;  %v119_v5 = vld [vmem:[%s171_s0 + $0x8] sm:$0xff]  }
   0x2   :  { %v83_v1 = vld [vmem:[%s172_s1] ss:$0 sm:$0xff]  ;;  %v95_v2 = vunpack.c.l.bf16 %v94_v0  ;;  %v96_v3 = vunpack.c.h.bf16 %v94_v0  ;;  %v120_v6 = vld [vmem:[%s174_s3 + $0x8] sm:$0xff]   ;;  %v99_v8 = vunpack.c.l.bf16 %v119_v5  ;;  %v100_v9 = vunpack.c.h.bf16 %v119_v5 }
   0x3   :  { %v102_v4 = vld [vmem:[%s174_s3] sm:$0xff]   ;;  %v107_v16 = vunpack.c.l.bf16 %v120_v6  ;;  %v108_v17 = vunpack.c.h.bf16 %v120_v6 }
   0x4   :  { %v84_v7 = vld [vmem:[%s173_s2] ss:$0 sm:$0xff]  ;;  %v32_v10 = vmul.f32 %v95_v2, %v83_v1  ;;  %v33_v11 = vmul.f32 %v96_v3, %v83_v1  ;;  %v103_v12 = vunpack.c.l.bf16 %v102_v4  ;;  %v104_v13 = vunpack.c.h.bf16 %v102_v4 }
   0x5   :  { %v34_v14 = vmul.f32 %v99_v8, %v83_v1  ;;  %v35_v15 = vmul.f32 %v100_v9, %v83_v1 }
   0x6   :  { %v43_v18 = vadd.f32 %v84_v7, %v32_v10  ;;  %v44_v19 = vadd.f32 %v84_v7, %v33_v11 }
   0x7   :  { %v45_v20 = vadd.f32 %v84_v7, %v34_v14  ;;  %v46_v21 = vadd.f32 %v84_v7, %v35_v15 }
   0x8   :  { %v55_v22 = vadd.f32 %v103_v12, %v43_v18  ;;  %v56_v23 = vadd.f32 %v104_v13, %v44_v19 }
   0x9   :  { %v57_v24 = vadd.f32 %v107_v16, %v45_v20  ;;  %v58_v25 = vadd.f32 %v108_v17, %v46_v21 }
   0xa   :  { %v112_v26 = vpack.c.bf16 %v56_v23, %v55_v22 }
   0xb   :  { %v117_v27 = vpack.c.bf16 %v58_v25, %v57_v24 }
   0xc   :  { %113 = vst [vmem:[%s175_s4] sm:$0xff] %v112_v26  }
   0xd   :  { %121 = vst [vmem:[%s175_s4 + $0x8] sm:$0xff] %v117_v27  }

// kernel: resnet_generator.31
= control target key start
LH: loop header
LB: loop body
LE: loop exit
PB: predicated region body
PF: predicated region fallthrough
CT: control target
= control target key end

     0   :  { %vm427_vm0 = vcmask 1040384   ;;  %s705_s1 = inlined_call_operand.vmem [shape: bf16[384,128], index: 1, kind: input, shape index: {}]   ;;  %s706_s0 = inlined_call_operand.vmem [shape: bf16[32,384], index: 0, kind: input, shape index: {}]   ;;  %s707_s2 = inlined_call_operand.vmem [shape: f32[1,128], index: 2, kind: input, shape index: {}]   ;;  %s708_s3 = inlined_call_operand.vmem [shape: bf16[32,128], index: 3, kind: output, shape index: {0}]   ;;  %s709_s4 = inlined_call_operand.vmem [shape: f32[1,2,128], index: 4, kind: output, shape index: {1}]  }
   0x1   :  { %v546_v0 = vld [vmem:[%s705_s1 + $0x78] sm:$0xff]   ;;  %v549_v3 = vld [vmem:[%s705_s1 + $0x70] sm:$0xff]   ;;  %v552_v6 = vld [vmem:[%s705_s1 + $0x68] sm:$0xff]  }
   0x2   :  { %v547_v1 = vld [vmem:[%s705_s1 + $0xb8] sm:$0xff]   ;;  %488 = vmatprep.subr.bf16.mxu0 %v546_v0  ;;  %v550_v4 = vld [vmem:[%s705_s1 + $0xb0] sm:$0xff]   ;;  %v553_v7 = vld [vmem:[%s705_s1 + $0xa8] sm:$0xff]  }
   0x3   :  { %v548_v2 = vld [vmem:[%s705_s1 + $0x38] sm:$0xff]   ;;  %526 = vmatprep.subr.bf16.mxu1 %v547_v1  ;;  %v551_v5 = vld [vmem:[%s705_s1 + $0x30] sm:$0xff]   ;;  %v554_v8 = vld [vmem:[%s705_s1 + $0x28] sm:$0xff]  }
   0x4   :  { %489 = vmatpush3.bf16.msra.mxu0 %v548_v2  ;;  %527 = vmatpush3.bf16.msra.mxu1 %v547_v1  ;;  %v555_v9 = vld [vmem:[%s705_s1 + $0x60] sm:$0xff]   ;;  %v558_v12 = vld [vmem:[%s705_s1 + $0x58] sm:$0xff]   ;;  %v561_v15 = vld [vmem:[%s705_s1 + $0x50] sm:$0xff]  }
   0x5   :  { %490 = vmatprep.subr.bf16.mxu0 %v549_v3  ;;  %528 = vmatprep.subr.bf16.mxu1 %v550_v4  ;;  %v556_v10 = vld [vmem:[%s705_s1 + $0xa0] sm:$0xff]   ;;  %v559_v13 = vld [vmem:[%s705_s1 + $0x98] sm:$0xff]   ;;  %v562_v16 = vld [vmem:[%s705_s1 + $0x90] sm:$0xff]  }
   0x6   :  { %v557_v11 = vld [vmem:[%s705_s1 + $0x20] sm:$0xff]   ;;  %v560_v14 = vld [vmem:[%s705_s1 + $0x18] sm:$0xff]   ;;  %v563_v17 = vld [vmem:[%s705_s1 + $0x10] sm:$0xff]  }
   0x7   :  { %v564_v18 = vld [vmem:[%s705_s1 + $0x48] sm:$0xff]   ;;  %v567_v21 = vld [vmem:[%s705_s1 + $0x40] sm:$0xff]  }
   0x8   :  { %491 = vmatpush3.bf16.msra.mxu0 %v551_v5  ;;  %529 = vmatpush3.bf16.msra.mxu1 %v550_v4  ;;  %v565_v19 = vld [vmem:[%s705_s1 + $0x88] sm:$0xff]   ;;  %v568_v22 = vld [vmem:[%s705_s1 + $0x80] sm:$0xff]  }
   0x9   :  { %492 = vmatprep.subr.bf16.mxu0 %v552_v6  ;;  %530 = vmatprep.subr.bf16.mxu1 %v553_v7  ;;  %v566_v20 = vld [vmem:[%s705_s1 + $0x8] sm:$0xff]   ;;  %v572_v23 = vld [vmem:[%s706_s0 + $0x4] ss:$12 sps:$4 sm:$0xff]   ;;  %v468_v40 = vld [vmem:[%s707_s2] ss:$0 sm:$0xff] }
   0xa   :  { %v573_v24 = vld [vmem:[%s706_s0 + $0x8] ss:$12 sps:$4 sm:$0xff]   ;;  %293 = vmatprep.mubr.bf16.mxu0 %v572_v23  ;;  %v569_v25 = vld [vmem:[%s705_s1] sm:$0xff]  }
   0xb   :  { %542 = vmatprep.mubr.bf16.mxu1 %v573_v24  ;;  %v570_v26 = vld [vmem:[%s706_s0] ss:$12 sps:$4 sm:$0xff]   ;;  %v575_v28 = vld [vmem:[%s706_s0 + $0x1c] ss:$12 sps:$4 sm:$0xff]   ;;  %v577_v29 = vld [vmem:[%s706_s0 + $0x18] ss:$12 sps:$4 sm:$0xff]  }
   0xc   :  { %493 = vmatpush3.bf16.msra.mxu0 %v554_v8  ;;  %531 = vmatpush3.bf16.msra.mxu1 %v553_v7  ;;  %v574_v27 = vld [vmem:[%s706_s0 + $0x20] ss:$12 sps:$4 sm:$0xff]  }
   0xd   :  { %494 = vmatprep.subr.bf16.mxu0 %v555_v9  ;;  %532 = vmatprep.subr.bf16.mxu1 %v556_v10 }
  0x10   :  { %495 = vmatpush3.bf16.msra.mxu0 %v557_v11  ;;  %533 = vmatpush3.bf16.msra.mxu1 %v556_v10 }
  0x11   :  { %496 = vmatprep.subr.bf16.mxu0 %v558_v12  ;;  %534 = vmatprep.subr.bf16.mxu1 %v559_v13 }
  0x14   :  { %497 = vmatpush3.bf16.msra.mxu0 %v560_v14  ;;  %535 = vmatpush3.bf16.msra.mxu1 %v559_v13 }
  0x15   :  { %498 = vmatprep.subr.bf16.mxu0 %v561_v15  ;;  %536 = vmatprep.subr.bf16.mxu1 %v562_v16 }
  0x18   :  { %499 = vmatpush3.bf16.msra.mxu0 %v563_v17  ;;  %537 = vmatpush3.bf16.msra.mxu1 %v562_v16 }
  0x19   :  { %500 = vmatprep.subr.bf16.mxu0 %v564_v18  ;;  %538 = vmatprep.subr.bf16.mxu1 %v565_v19 }
  0x1c   :  { %501 = vmatpush3.bf16.msra.mxu0 %v566_v20  ;;  %539 = vmatpush3.bf16.msra.mxu1 %v565_v19 }
  0x1d   :  { %502 = vmatprep.subr.bf16.mxu0 %v567_v21  ;;  %540 = vmatprep.subr.bf16.mxu1 %v568_v22 }
  0x20   :  { %503 = vmatpush3.bf16.msra.mxu0 %v569_v25  ;;  %541 = vmatpush3.bf16.msra.mxu1 %v568_v22 }
  0x23   :  { %294 = vmatmul.mubr.bf16.vlgmr.msra.gmra.mxu0 %v570_v26  ;;  %543 = vmatmul.mubr.bf16.vlgmr.msra.gmra.mxu1 %v574_v27 }
  0x24   :  { %301 = vmatprep.mubr.bf16.mxu0 %v575_v28 }
  0x2b   :  { %302 = vmatmul.mubr.bf16.gmra.mxu0 %v577_v29 }
  0xe3   :  { %v504_v30 = vpop.f32.mrf.mxu0  ;;  %v544_v31 = vpop.f32.mrf.mxu1 }
  0xe5   :  { %v505_v32 = vpop.f32.mrf.mxu0  ;;  %v344_v33 = vpop.f32.mrf.mxu1 }
  0xe6   :  { %v506_v34 = vadd.f32 %v505_v32, %v504_v30 }
  0xe7   :  { %v507_v35 = vpop.f32.mrf.mxu0  ;;  %v545_v36 = vpop.f32.mrf.mxu1 }
  0xe8   :  { %v345_v38 = vadd.f32 %v506_v34, %v344_v33 }
  0xe9   :  { %v508_v37 = vpop.f32.mrf.mxu0  ;;  %v347_v41 = vpop.f32.mrf.mxu1 }
  0xea   :  { %v509_v39 = vadd.f32 %v508_v37, %v507_v35  ;;  %v381_v45 = vadd.f32 %v468_v40, %v345_v38 }
  0xeb   :  { %v510_v42 = vpop.f32.mrf.mxu0 }
  0xec   :  { %v348_v43 = vadd.f32 %v509_v39, %v347_v41  ;;  %v414_v55 = vmul.f32 %v381_v45, %v381_v45 }
  0xed   :  { %v511_v44 = vpop.f32.mrf.mxu0 }
  0xee   :  { %v382_v46 = vadd.f32 %v468_v40, %v348_v43  ;;  %v512_v47 = vadd.f32 %v511_v44, %v510_v42 }
  0xef   :  { %v513_v48 = vpop.f32.mrf.mxu0 }
  0xf0   :  { %v480_v49 = vpack.c.bf16 %v382_v46, %v381_v45  ;;  %v353_v50 = vadd.f32 %v544_v31, %v512_v47  ;;  %v415_v52 = vmul.f32 %v382_v46, %v382_v46  ;;  %v405_v56 = vadd.f32 %v382_v46, %v381_v45 }
  0xf1   :  { %v514_v51 = vpop.f32.mrf.mxu0 }
  0xf2   :  { %481 = vst [vmem:[%s708_s3] sm:$0xff] %v480_v49   ;;  %v383_v53 = vadd.f32 %v468_v40, %v353_v50  ;;  %v515_v54 = vadd.f32 %v514_v51, %v513_v48  ;;  %v418_v59 = vadd.f32 %v415_v52, %v414_v55 }
  0xf4   :  { %v416_v57 = vmul.f32 %v383_v53, %v383_v53  ;;  %v356_v58 = vadd.f32 %v545_v36, %v515_v54  ;;  %v406_v60 = vadd.f32 %v405_v56, %v383_v53 }
  0xf6   :  { %v384_v61 = vadd.f32 %v468_v40, %v356_v58  ;;  %v419_v62 = vadd.f32 %v418_v59, %v416_v57 }
  0xf8   :  { %v485_v63 = vpack.c.bf16 %v384_v61, %v383_v53  ;;  %v407_v0 = vadd.f32 %v406_v60, %v384_v61  ;;  %v417_v1 = vmul.f32 %v384_v61, %v384_v61 }
  0xfa   :  { %487 = vst [vmem:[%s708_s3 + $0x8] sm:$0xff] %v485_v63   ;;  %v408_v2 = vrot.slane %v407_v0, 4  ;;  %v420_v3 = vadd.f32 %v419_v62, %v417_v1 }
  0xfc   :  { %v409_v4 = vadd.f32 %v408_v2, %v407_v0  ;;  %v421_v5 = vrot.slane %v420_v3, 4 }
  0xfe   :  { %v410_v6 = vrot.slane %v409_v4, 2  ;;  %v422_v7 = vadd.f32 %v421_v5, %v420_v3 }
 0x100   :  { %v411_v8 = vadd.f32 %v410_v6, %v409_v4  ;;  %v423_v9 = vrot.slane %v422_v7, 2 }
 0x102   :  { %v412_v10 = vrot.slane %v411_v8, 1  ;;  %v424_v11 = vadd.f32 %v423_v9, %v422_v7 }
 0x104   :  { %v425_v12 = vrot.slane %v424_v11, 1  ;;  %v413_v13 = vadd.f32 %v412_v10, %v411_v8 }
 0x106   :  { %v426_v14 = vadd.f32 %v425_v12, %v424_v11 }
 0x108   :  { %v428_v15 = vsel %vm427_vm0, %v413_v13, %v426_v14 }
 0x109   :  { %429 = vst [vmem:[%s709_s4] sm:$0x3] %v428_v15 }

// kernel: resnet_generator.40
= control target key start
LH: loop header
LB: loop body
LE: loop exit
PB: predicated region body
PF: predicated region fallthrough
CT: control target
= control target key end

     0   :  { %vm226_vm0 = vcmask 1040384   ;;  %s374_s1 = inlined_call_operand.vmem [shape: bf16[128,128], index: 1, kind: input, shape index: {}]   ;;  %s375_s0 = inlined_call_operand.vmem [shape: bf16[32,128], index: 0, kind: input, shape index: {}]   ;;  %s376_s2 = inlined_call_operand.vmem [shape: f32[1,128], index: 2, kind: input, shape index: {}]   ;;  %s377_s3 = inlined_call_operand.vmem [shape: bf16[32,128], index: 3, kind: output, shape index: {0}]   ;;  %s378_s4 = inlined_call_operand.vmem [shape: f32[1,2,128], index: 4, kind: output, shape index: {1}]  }
   0x1   :  { %v297_v0 = vld [vmem:[%s374_s1 + $0x38] sm:$0xff]   ;;  %v298_v1 = vld [vmem:[%s374_s1 + $0x30] sm:$0xff]   ;;  %v299_v2 = vld [vmem:[%s374_s1 + $0x28] sm:$0xff]  }
   0x2   :  { %277 = vmatprep.subr.bf16.mxu0 %v297_v0  ;;  %v300_v3 = vld [vmem:[%s374_s1 + $0x20] sm:$0xff]   ;;  %v301_v5 = vld [vmem:[%s374_s1 + $0x18] sm:$0xff]   ;;  %v302_v6 = vld [vmem:[%s374_s1 + $0x10] sm:$0xff]  }
   0x3   :  { %278 = vmatpush3.bf16.msra.mxu0 %v297_v0  ;;  %v305_v4 = vld [vmem:[%s375_s0] sm:$0xff]   ;;  %v303_v7 = vld [vmem:[%s374_s1 + $0x8] sm:$0xff]  }
   0x4   :  { %279 = vmatprep.subr.bf16.mxu0 %v298_v1  ;;  %293 = vmatprep.mubr.bf16.mxu0 %v305_v4  ;;  %v304_v8 = vld [vmem:[%s374_s1] sm:$0xff]   ;;  %v306_v9 = vld [vmem:[%s375_s0 + $0x8] sm:$0xff]  }
   0x5   :  { %v247_v11 = vld [vmem:[%s376_s2] ss:$0 sm:$0xff] }
   0x7   :  { %280 = vmatpush3.bf16.msra.mxu0 %v298_v1 }
   0x8   :  { %281 = vmatprep.subr.bf16.mxu0 %v299_v2 }
   0xb   :  { %282 = vmatpush3.bf16.msra.mxu0 %v299_v2 }
   0xc   :  { %283 = vmatprep.subr.bf16.mxu0 %v300_v3 }
   0xf   :  { %284 = vmatpush3.bf16.msra.mxu0 %v300_v3 }
  0x10   :  { %285 = vmatprep.subr.bf16.mxu0 %v301_v5 }
  0x13   :  { %286 = vmatpush3.bf16.msra.mxu0 %v301_v5 }
  0x14   :  { %287 = vmatprep.subr.bf16.mxu0 %v302_v6 }
  0x17   :  { %288 = vmatpush3.bf16.msra.mxu0 %v302_v6 }
  0x18   :  { %289 = vmatprep.subr.bf16.mxu0 %v303_v7 }
  0x1b   :  { %290 = vmatpush3.bf16.msra.mxu0 %v303_v7 }
  0x1c   :  { %291 = vmatprep.subr.bf16.mxu0 %v304_v8 }
  0x1f   :  { %292 = vmatpush3.bf16.msra.mxu0 %v304_v8 }
  0x22   :  { %294 = vmatmul.mubr.bf16.vlgmr.msra.gmra.mxu0 %v306_v9 }
  0xe2   :  { %v295_v10 = vpop.f32.mrf.mxu0 }
  0xe3   :  { %v182_v14 = vadd.f32 %v295_v10, %v247_v11 }
  0xe4   :  { %v143_v12 = vpop.f32.mrf.mxu0 }
  0xe5   :  { %v180_v15 = vadd.f32 %v247_v11, %v143_v12  ;;  %v215_v24 = vmul.f32 %v182_v14, %v182_v14 }
  0xe6   :  { %v296_v13 = vpop.f32.mrf.mxu0 }
  0xe7   :  { %v183_v16 = vadd.f32 %v296_v13, %v247_v11  ;;  %v213_v20 = vmul.f32 %v180_v15, %v180_v15 }
  0xe8   :  { %v146_v17 = vpop.f32.mrf.mxu0 }
  0xe9   :  { %v264_v18 = vpack.c.bf16 %v183_v16, %v182_v14  ;;  %v181_v19 = vadd.f32 %v247_v11, %v146_v17  ;;  %v216_v27 = vmul.f32 %v183_v16, %v183_v16 }
  0xeb   :  { %266 = vst [vmem:[%s377_s3 + $0x8] sm:$0xff] %v264_v18   ;;  %v259_v21 = vpack.c.bf16 %v181_v19, %v180_v15  ;;  %v204_v22 = vadd.f32 %v181_v19, %v180_v15  ;;  %v214_v23 = vmul.f32 %v181_v19, %v181_v19 }
  0xed   :  { %260 = vst [vmem:[%s377_s3] sm:$0xff] %v259_v21   ;;  %v205_v25 = vadd.f32 %v204_v22, %v182_v14  ;;  %v217_v26 = vadd.f32 %v214_v23, %v213_v20 }
  0xef   :  { %v206_v28 = vadd.f32 %v205_v25, %v183_v16  ;;  %v218_v29 = vadd.f32 %v217_v26, %v215_v24 }
  0xf1   :  { %v207_v30 = vrot.slane %v206_v28, 4  ;;  %v219_v31 = vadd.f32 %v218_v29, %v216_v27 }
  0xf3   :  { %v208_v32 = vadd.f32 %v207_v30, %v206_v28  ;;  %v220_v33 = vrot.slane %v219_v31, 4 }
  0xf5   :  { %v209_v34 = vrot.slane %v208_v32, 2  ;;  %v221_v35 = vadd.f32 %v220_v33, %v219_v31 }
  0xf7   :  { %v210_v36 = vadd.f32 %v209_v34, %v208_v32  ;;  %v222_v37 = vrot.slane %v221_v35, 2 }
  0xf9   :  { %v211_v38 = vrot.slane %v210_v36, 1  ;;  %v223_v39 = vadd.f32 %v222_v37, %v221_v35 }
  0xfb   :  { %v224_v40 = vrot.slane %v223_v39, 1  ;;  %v212_v41 = vadd.f32 %v211_v38, %v210_v36 }
  0xfd   :  { %v225_v42 = vadd.f32 %v224_v40, %v223_v39 }
  0xff   :  { %v227_v43 = vsel %vm226_vm0, %v212_v41, %v225_v42 }
 0x100   :  { %228 = vst [vmem:[%s378_s4] sm:$0x3] %v227_v43 }

// kernel: resnet_generator.49
= control target key start
LH: loop header
LB: loop body
LE: loop exit
PB: predicated region body
PF: predicated region fallthrough
CT: control target
= control target key end

     0   :  { %s2428_s12 = smov 0   ;;  %s2430_s13 = smov 0   ;;  %s2685_s0 = inlined_call_operand.vmem [shape: bf16[512,512], index: 0, kind: input, shape index: {}]   ;;  %s2686_s1 = inlined_call_operand.vmem [shape: bf16[512,128], index: 1, kind: input, shape index: {}]   ;;  %s2687_s2 = inlined_call_operand.vmem [shape: f32[1,128], index: 2, kind: input, shape index: {}]   ;;  %s2688_s3 = inlined_call_operand.vmem [shape: bf16[512,128], index: 3, kind: output, shape index: {}]  }
   0x1   :  { %s2432_s14 = smov 0  }
   0x2 LB: > { %s25_s15 = sadd.s32 1, %s2402_s13  ;;  %p1679_p0 = scmp.ge.s32.totalorder %s2406_s14, 1  ;;  %s2406_s14 = sphi %s2432_s14, %s13_s14   ;;  %s2402_s13 = sphi %s2430_s13, %s2690_s13   ;;  %s2398_s12 = sphi %s2428_s12, %s2689_s12  }
   0x3   : > { %p27_p1 = scmp.ge.s32.totalorder %s25_s15, 2  ;;  %p169_p2 = scmp.lt.s32.totalorder %s2406_s14, 3 }
   0x5   : > { %s2692_s15 = smov (%p27_p1, %s25_s15), 0  ;;  %p170_p3 = pnand %p1679_p0, %p169_p2 }
   0x6   : > { %s1680_s25 = sshll.u32 (!%p170_p3), %s2398_s12, 5 }
   0x7   : > { %173 = sbr.rel (%p170_p3) target bundleno = 389 (0x185), region = 32  ;;  %p205_p4 = scmp.lt.s32.totalorder (!%p170_p3), %s1680_s25, 63 }
   0xc   : > { %v2192_v0 = vld [vmem:[%s2686_s1 + $0x78] sm:$0xff]   ;;  %v2196_v4 = vld [vmem:[%s2686_s1 + $0x70] sm:$0xff]   ;;  %v2200_v8 = vld [vmem:[%s2686_s1 + $0x68] sm:$0xff]   ;;  %s2694_s25 = smov (!%p205_p4, %s1680_s25), 63 }
   0xd   : > { %v2193_v1 = vld [vmem:[%s2686_s1 + $0xf8] sm:$0xff]   ;;  %1944 = vmatprep.subr.bf16.mxu0 %v2192_v0  ;;  %v2197_v5 = vld [vmem:[%s2686_s1 + $0xf0] sm:$0xff]   ;;  %v2201_v9 = vld [vmem:[%s2686_s1 + $0xe8] sm:$0xff]   ;;  %s1816_s24 = sshll.u32 %s2694_s25, 4  ;;  %s1684_s17 = sshll.u32 %s2694_s25, 2 }
   0xe   : > { %v2194_v2 = vld [vmem:[%s2686_s1 + $0x38] sm:$0xff]   ;;  %2056 = vmatprep.subr.bf16.mxu1 %v2193_v1  ;;  %v2198_v6 = vld [vmem:[%s2686_s1 + $0x30] sm:$0xff]   ;;  %v2202_v10 = vld [vmem:[%s2686_s1 + $0x28] sm:$0xff]   ;;  %s2545_s12 = scalar_lea.vmem %s2685_s0, %s1816_s24  ;;  %s2631_s20 = scalar_lea.vmem %s2688_s3, %s1684_s17 }
   0xf   : > { %v2195_v3 = vld [vmem:[%s2686_s1 + $0xb8] sm:$0xff]   ;;  %1945 = vmatpush3.bf16.msra.mxu0 %v2194_v2  ;;  %v2199_v7 = vld [vmem:[%s2686_s1 + $0xb0] sm:$0xff]   ;;  %v2203_v11 = vld [vmem:[%s2686_s1 + $0xa8] sm:$0xff]  }
  0x10   : > { %2057 = vmatpush3.bf16.msra.mxu1 %v2195_v3  ;;  %1946 = vmatprep.subr.bf16.mxu0 %v2196_v4  ;;  %v2204_v12 = vld [vmem:[%s2686_s1 + $0x60] sm:$0xff]   ;;  %v2208_v16 = vld [vmem:[%s2686_s1 + $0x58] sm:$0xff]   ;;  %v2212_v20 = vld [vmem:[%s2686_s1 + $0x50] sm:$0xff]  }
  0x11   : > { %2058 = vmatprep.subr.bf16.mxu1 %v2197_v5  ;;  %v2205_v13 = vld [vmem:[%s2686_s1 + $0xe0] sm:$0xff]   ;;  %v2209_v17 = vld [vmem:[%s2686_s1 + $0xd8] sm:$0xff]   ;;  %v2213_v21 = vld [vmem:[%s2686_s1 + $0xd0] sm:$0xff]  }
  0x12   : > { %v2206_v14 = vld [vmem:[%s2686_s1 + $0x20] sm:$0xff]   ;;  %v2210_v18 = vld [vmem:[%s2686_s1 + $0x18] sm:$0xff]   ;;  %v2214_v22 = vld [vmem:[%s2686_s1 + $0x10] sm:$0xff]  }
  0x13   : > { %1947 = vmatpush3.bf16.msra.mxu0 %v2198_v6  ;;  %v2207_v15 = vld [vmem:[%s2686_s1 + $0xa0] sm:$0xff]   ;;  %v2211_v19 = vld [vmem:[%s2686_s1 + $0x98] sm:$0xff]   ;;  %v2215_v23 = vld [vmem:[%s2686_s1 + $0x90] sm:$0xff]  }
  0x14   : > { %2059 = vmatpush3.bf16.msra.mxu1 %v2199_v7  ;;  %1948 = vmatprep.subr.bf16.mxu0 %v2200_v8  ;;  %v2216_v24 = vld [vmem:[%s2686_s1 + $0x48] sm:$0xff]   ;;  %v2220_v28 = vld [vmem:[%s2686_s1 + $0x40] sm:$0xff]  }
  0x15   : > { %2060 = vmatprep.subr.bf16.mxu1 %v2201_v9  ;;  %v2217_v25 = vld [vmem:[%s2686_s1 + $0xc8] sm:$0xff]   ;;  %v2221_v29 = vld [vmem:[%s2686_s1 + $0xc0] sm:$0xff]  }
  0x16   : > { %v2218_v26 = vld [vmem:[%s2686_s1 + $0x8] sm:$0xff]   ;;  %v2222_v30 = vld [vmem:[%s2686_s1] sm:$0xff]  }
  0x17   : > { %1949 = vmatpush3.bf16.msra.mxu0 %v2202_v10  ;;  %v2219_v27 = vld [vmem:[%s2686_s1 + $0x88] sm:$0xff]   ;;  %v2223_v31 = vld [vmem:[%s2686_s1 + $0x80] sm:$0xff]  }
  0x18   : > { %2061 = vmatpush3.bf16.msra.mxu1 %v2203_v11  ;;  %1950 = vmatprep.subr.bf16.mxu0 %v2204_v12  ;;  %v2224_v32 = vld [vmem:[%s2545_s12] ss:$16 sps:$4 sm:$0xff]   ;;  %v2226_v33 = vld [vmem:[%s2545_s12 + $0x4] ss:$16 sps:$4 sm:$0xff]   ;;  %v2227_v34 = vld [vmem:[%s2545_s12 + $0x8] ss:$16 sps:$4 sm:$0xff]  }
  0x19   : > { %2062 = vmatprep.subr.bf16.mxu1 %v2205_v13  ;;  %v2229_v35 = vld [vmem:[%s2545_s12 + $0xc] ss:$16 sps:$4 sm:$0xff]   ;;  %968 = vmatprep.mubr.bf16.mxu0 %v2226_v33  ;;  %v2230_v36 = vld [vmem:[%s2545_s12 + $0x24] ss:$16 sps:$4 sm:$0xff]   ;;  %v2234_v38 = vld [vmem:[%s2545_s12 + $0x20] ss:$16 sps:$4 sm:$0xff]  }
  0x1a   : > { %1129 = vmatprep.mubr.bf16.mxu1 %v2229_v35  ;;  %v2232_v37 = vld [vmem:[%s2545_s12 + $0x2c] ss:$16 sps:$4 sm:$0xff]   ;;  %v2235_v39 = vld [vmem:[%s2545_s12 + $0x28] ss:$16 sps:$4 sm:$0xff]   ;;  %v2236_v40 = vld [vmem:[%s2545_s12 + $0x44] ss:$16 sps:$4 sm:$0xff]  }
  0x1b   : > { %1951 = vmatpush3.bf16.msra.mxu0 %v2206_v14  ;;  %v2238_v41 = vld [vmem:[%s2545_s12 + $0x4c] ss:$16 sps:$4 sm:$0xff]   ;;  %v2240_v42 = vld [vmem:[%s2545_s12 + $0x40] ss:$16 sps:$4 sm:$0xff]   ;;  %v2241_v43 = vld [vmem:[%s2545_s12 + $0x48] ss:$16 sps:$4 sm:$0xff]  }
  0x1c   : > { %2063 = vmatpush3.bf16.msra.mxu1 %v2207_v15  ;;  %1952 = vmatprep.subr.bf16.mxu0 %v2208_v16  ;;  %v2242_v44 = vld [vmem:[%s2545_s12 + $0x64] ss:$16 sps:$4 sm:$0xff]   ;;  %v2244_v45 = vld [vmem:[%s2545_s12 + $0x6c] ss:$16 sps:$4 sm:$0xff]   ;;  %v2246_v46 = vld [vmem:[%s2545_s12 + $0x60] ss:$16 sps:$4 sm:$0xff]  }
  0x1d   : > { %2064 = vmatprep.subr.bf16.mxu1 %v2209_v17  ;;  %v2247_v47 = vld [vmem:[%s2545_s12 + $0x68] ss:$16 sps:$4 sm:$0xff]   ;;  %v2248_v48 = vld [vmem:[%s2545_s12 + $0x84] ss:$16 sps:$4 sm:$0xff]   ;;  %v2250_v49 = vld [vmem:[%s2545_s12 + $0x8c] ss:$16 sps:$4 sm:$0xff]  }
  0x1e   : > { %v2252_v50 = vld [vmem:[%s2545_s12 + $0x80] ss:$16 sps:$4 sm:$0xff]   ;;  %v2253_v51 = vld [vmem:[%s2545_s12 + $0x88] ss:$16 sps:$4 sm:$0xff]   ;;  %v2254_v52 = vld [vmem:[%s2545_s12 + $0xa4] ss:$16 sps:$4 sm:$0xff]  }
  0x1f   : > { %1953 = vmatpush3.bf16.msra.mxu0 %v2210_v18  ;;  %v2256_v53 = vld [vmem:[%s2545_s12 + $0xac] ss:$16 sps:$4 sm:$0xff]   ;;  %v2258_v54 = vld [vmem:[%s2545_s12 + $0xa0] ss:$16 sps:$4 sm:$0xff]   ;;  %v2259_v55 = vld [vmem:[%s2545_s12 + $0xa8] ss:$16 sps:$4 sm:$0xff]  }
  0x20   : > { %2065 = vmatpush3.bf16.msra.mxu1 %v2211_v19  ;;  %1954 = vmatprep.subr.bf16.mxu0 %v2212_v20  ;;  %v2260_v56 = vld [vmem:[%s2545_s12 + $0xc4] ss:$16 sps:$4 sm:$0xff]   ;;  %v2262_v57 = vld [vmem:[%s2545_s12 + $0xcc] ss:$16 sps:$4 sm:$0xff]   ;;  %v2264_v58 = vld [vmem:[%s2545_s12 + $0xc0] ss:$16 sps:$4 sm:$0xff]  }
  0x21   : > { %2066 = vmatprep.subr.bf16.mxu1 %v2213_v21  ;;  %v2265_v59 = vld [vmem:[%s2545_s12 + $0xc8] ss:$16 sps:$4 sm:$0xff]   ;;  %v2266_v60 = vld [vmem:[%s2545_s12 + $0xe4] ss:$16 sps:$4 sm:$0xff]   ;;  %v2268_v61 = vld [vmem:[%s2545_s12 + $0xec] ss:$16 sps:$4 sm:$0xff]  }
  0x22   : > { %v2270_v62 = vld [vmem:[%s2545_s12 + $0xe0] ss:$16 sps:$4 sm:$0xff]   ;;  %v2271_v63 = vld [vmem:[%s2545_s12 + $0xe8] ss:$16 sps:$4 sm:$0xff]   ;;  %v2272_v0 = vld [vmem:[%s2545_s12 + $0x104] ss:$16 sps:$4 sm:$0xff]  }
  0x23   : > { %1955 = vmatpush3.bf16.msra.mxu0 %v2214_v22  ;;  %v2274_v1 = vld [vmem:[%s2545_s12 + $0x10c] ss:$16 sps:$4 sm:$0xff]   ;;  %v2276_v2 = vld [vmem:[%s2545_s12 + $0x100] ss:$16 sps:$4 sm:$0xff]   ;;  %v2277_v3 = vld [vmem:[%s2545_s12 + $0x108] ss:$16 sps:$4 sm:$0xff]  }
  0x24   : > { %2067 = vmatpush3.bf16.msra.mxu1 %v2215_v23  ;;  %1956 = vmatprep.subr.bf16.mxu0 %v2216_v24  ;;  %v2278_v4 = vld [vmem:[%s2545_s12 + $0x124] ss:$16 sps:$4 sm:$0xff]   ;;  %v2280_v5 = vld [vmem:[%s2545_s12 + $0x12c] ss:$16 sps:$4 sm:$0xff]   ;;  %v2282_v6 = vld [vmem:[%s2545_s12 + $0x120] ss:$16 sps:$4 sm:$0xff]  }
  0x25   : > { %2068 = vmatprep.subr.bf16.mxu1 %v2217_v25  ;;  %v2283_v7 = vld [vmem:[%s2545_s12 + $0x128] ss:$16 sps:$4 sm:$0xff]   ;;  %v2284_v8 = vld [vmem:[%s2545_s12 + $0x144] ss:$16 sps:$4 sm:$0xff]   ;;  %v2286_v9 = vld [vmem:[%s2545_s12 + $0x14c] ss:$16 sps:$4 sm:$0xff]  }
  0x26   : > { %v2288_v10 = vld [vmem:[%s2545_s12 + $0x140] ss:$16 sps:$4 sm:$0xff]   ;;  %v2289_v11 = vld [vmem:[%s2545_s12 + $0x148] ss:$16 sps:$4 sm:$0xff]   ;;  %v2290_v12 = vld [vmem:[%s2545_s12 + $0x164] ss:$16 sps:$4 sm:$0xff]  }
  0x27   : > { %1957 = vmatpush3.bf16.msra.mxu0 %v2218_v26  ;;  %v2292_v13 = vld [vmem:[%s2545_s12 + $0x16c] ss:$16 sps:$4 sm:$0xff]   ;;  %v2294_v14 = vld [vmem:[%s2545_s12 + $0x160] ss:$16 sps:$4 sm:$0xff]   ;;  %v2295_v15 = vld [vmem:[%s2545_s12 + $0x168] ss:$16 sps:$4 sm:$0xff]  }
  0x28   : > { %2069 = vmatpush3.bf16.msra.mxu1 %v2219_v27  ;;  %1958 = vmatprep.subr.bf16.mxu0 %v2220_v28  ;;  %v2296_v16 = vld [vmem:[%s2545_s12 + $0x184] ss:$16 sps:$4 sm:$0xff]   ;;  %v2298_v17 = vld [vmem:[%s2545_s12 + $0x18c] ss:$16 sps:$4 sm:$0xff]   ;;  %v2300_v18 = vld [vmem:[%s2545_s12 + $0x180] ss:$16 sps:$4 sm:$0xff]  }
  0x29   : > { %2070 = vmatprep.subr.bf16.mxu1 %v2221_v29  ;;  %v2301_v19 = vld [vmem:[%s2545_s12 + $0x188] ss:$16 sps:$4 sm:$0xff]   ;;  %v2302_v20 = vld [vmem:[%s2545_s12 + $0x1a4] ss:$16 sps:$4 sm:$0xff]   ;;  %v2304_v21 = vld [vmem:[%s2545_s12 + $0x1ac] ss:$16 sps:$4 sm:$0xff]  }
  0x2a   : > { %v2306_v22 = vld [vmem:[%s2545_s12 + $0x1a0] ss:$16 sps:$4 sm:$0xff]   ;;  %v2307_v23 = vld [vmem:[%s2545_s12 + $0x1a8] ss:$16 sps:$4 sm:$0xff]   ;;  %v2308_v24 = vld [vmem:[%s2545_s12 + $0x1c4] ss:$16 sps:$4 sm:$0xff]  }
  0x2b   : > { %1959 = vmatpush3.bf16.msra.mxu0 %v2222_v30  ;;  %v2310_v25 = vld [vmem:[%s2545_s12 + $0x1cc] ss:$16 sps:$4 sm:$0xff]   ;;  %v2312_v26 = vld [vmem:[%s2545_s12 + $0x1c0] ss:$16 sps:$4 sm:$0xff]   ;;  %v2313_v27 = vld [vmem:[%s2545_s12 + $0x1c8] ss:$16 sps:$4 sm:$0xff]  }
  0x2c   : > { %2071 = vmatpush3.bf16.msra.mxu1 %v2223_v31  ;;  %v2314_v28 = vld [vmem:[%s2545_s12 + $0x1e4] ss:$16 sps:$4 sm:$0xff]   ;;  %v2316_v29 = vld [vmem:[%s2545_s12 + $0x1ec] ss:$16 sps:$4 sm:$0xff]   ;;  %v2318_v30 = vld [vmem:[%s2545_s12 + $0x1e0] ss:$16 sps:$4 sm:$0xff]  }
  0x2d   : > { %v2319_v31 = vld [vmem:[%s2545_s12 + $0x1e8] ss:$16 sps:$4 sm:$0xff]  }
  0x2e   : > { %969 = vmatmul.mubr.bf16.vlgmr.msra.gmra.mxu0 %v2224_v32 }
  0x2f   : > { %1130 = vmatmul.mubr.bf16.vlgmr.msra.gmra.mxu1 %v2227_v34  ;;  %976 = vmatprep.mubr.bf16.mxu0 %v2230_v36 }
  0x30   : > { %1137 = vmatprep.mubr.bf16.mxu1 %v2232_v37 }
  0x36   : > { %977 = vmatmul.mubr.bf16.gmra.mxu0 %v2234_v38 }
  0x37   : > { %1138 = vmatmul.mubr.bf16.gmra.mxu1 %v2235_v39  ;;  %984 = vmatprep.mubr.bf16.mxu0 %v2236_v40 }
  0x38   : > { %1145 = vmatprep.mubr.bf16.mxu1 %v2238_v41  ;;  %v2620_v41 = vld [vmem:[%s2687_s2] ss:$0 sm:$0xff] }
  0x3e   : > { %985 = vmatmul.mubr.bf16.gmra.mxu0 %v2240_v42 }
  0x3f   : > { %1146 = vmatmul.mubr.bf16.gmra.mxu1 %v2241_v43  ;;  %992 = vmatprep.mubr.bf16.mxu0 %v2242_v44 }
  0x40   : > { %1153 = vmatprep.mubr.bf16.mxu1 %v2244_v45 }
  0x46   : > { %993 = vmatmul.mubr.bf16.gmra.mxu0 %v2246_v46 }
  0x47   : > { %1154 = vmatmul.mubr.bf16.gmra.mxu1 %v2247_v47  ;;  %1000 = vmatprep.mubr.bf16.mxu0 %v2248_v48 }
  0x48   : > { %1161 = vmatprep.mubr.bf16.mxu1 %v2250_v49 }
  0x4e   : > { %1001 = vmatmul.mubr.bf16.gmra.mxu0 %v2252_v50 }
  0x4f   : > { %1162 = vmatmul.mubr.bf16.gmra.mxu1 %v2253_v51  ;;  %1008 = vmatprep.mubr.bf16.mxu0 %v2254_v52 }
  0x50   : > { %1169 = vmatprep.mubr.bf16.mxu1 %v2256_v53 }
  0x56   : > { %1009 = vmatmul.mubr.bf16.gmra.mxu0 %v2258_v54 }
  0x57   : > { %1170 = vmatmul.mubr.bf16.gmra.mxu1 %v2259_v55  ;;  %1016 = vmatprep.mubr.bf16.mxu0 %v2260_v56 }
  0x58   : > { %1177 = vmatprep.mubr.bf16.mxu1 %v2262_v57 }
  0x5e   : > { %1017 = vmatmul.mubr.bf16.gmra.mxu0 %v2264_v58 }
  0x5f   : > { %1178 = vmatmul.mubr.bf16.gmra.mxu1 %v2265_v59  ;;  %1024 = vmatprep.mubr.bf16.mxu0 %v2266_v60 }
  0x60   : > { %1185 = vmatprep.mubr.bf16.mxu1 %v2268_v61 }
  0x66   : > { %1025 = vmatmul.mubr.bf16.gmra.mxu0 %v2270_v62 }
  0x67   : > { %1186 = vmatmul.mubr.bf16.gmra.mxu1 %v2271_v63  ;;  %1032 = vmatprep.mubr.bf16.mxu0 %v2272_v0 }
  0x68   : > { %1193 = vmatprep.mubr.bf16.mxu1 %v2274_v1 }
  0x6e   : > { %1033 = vmatmul.mubr.bf16.gmra.mxu0 %v2276_v2 }
  0x6f   : > { %1194 = vmatmul.mubr.bf16.gmra.mxu1 %v2277_v3  ;;  %1040 = vmatprep.mubr.bf16.mxu0 %v2278_v4 }
  0x70   : > { %1201 = vmatprep.mubr.bf16.mxu1 %v2280_v5 }
  0x76   : > { %1041 = vmatmul.mubr.bf16.gmra.mxu0 %v2282_v6 }
  0x77   : > { %1202 = vmatmul.mubr.bf16.gmra.mxu1 %v2283_v7  ;;  %1048 = vmatprep.mubr.bf16.mxu0 %v2284_v8 }
  0x78   : > { %1209 = vmatprep.mubr.bf16.mxu1 %v2286_v9 }
  0x7e   : > { %1049 = vmatmul.mubr.bf16.gmra.mxu0 %v2288_v10 }
  0x7f   : > { %1210 = vmatmul.mubr.bf16.gmra.mxu1 %v2289_v11  ;;  %1056 = vmatprep.mubr.bf16.mxu0 %v2290_v12 }
  0x80   : > { %1217 = vmatprep.mubr.bf16.mxu1 %v2292_v13 }
  0x86   : > { %1057 = vmatmul.mubr.bf16.gmra.mxu0 %v2294_v14 }
  0x87   : > { %1218 = vmatmul.mubr.bf16.gmra.mxu1 %v2295_v15  ;;  %1064 = vmatprep.mubr.bf16.mxu0 %v2296_v16 }
  0x88   : > { %1225 = vmatprep.mubr.bf16.mxu1 %v2298_v17 }
  0x8e   : > { %1065 = vmatmul.mubr.bf16.gmra.mxu0 %v2300_v18 }
  0x8f   : > { %1226 = vmatmul.mubr.bf16.gmra.mxu1 %v2301_v19  ;;  %1072 = vmatprep.mubr.bf16.mxu0 %v2302_v20 }
  0x90   : > { %1233 = vmatprep.mubr.bf16.mxu1 %v2304_v21 }
  0x96   : > { %1073 = vmatmul.mubr.bf16.gmra.mxu0 %v2306_v22 }
  0x97   : > { %1234 = vmatmul.mubr.bf16.gmra.mxu1 %v2307_v23  ;;  %1080 = vmatprep.mubr.bf16.mxu0 %v2308_v24 }
  0x98   : > { %1241 = vmatprep.mubr.bf16.mxu1 %v2310_v25 }
  0x9e   : > { %1081 = vmatmul.mubr.bf16.gmra.mxu0 %v2312_v26 }
  0x9f   : > { %1242 = vmatmul.mubr.bf16.gmra.mxu1 %v2313_v27  ;;  %1088 = vmatprep.mubr.bf16.mxu0 %v2314_v28 }
  0xa0   : > { %1249 = vmatprep.mubr.bf16.mxu1 %v2316_v29 }
  0xa6   : > { %1089 = vmatmul.mubr.bf16.gmra.mxu0 %v2318_v30 }
  0xa7   : > { %1250 = vmatmul.mubr.bf16.gmra.mxu1 %v2319_v31 }
  0xee   : > { %v1960_v32 = vpop.f32.mrf.mxu0 }
  0xef   : > { %v2072_v33 = vpop.f32.mrf.mxu1 }
  0xf0   : > { %v1961_v34 = vpop.f32.mrf.mxu0 }
  0xf1   : > { %v1962_v35 = vadd.f32 %v1961_v34, %v1960_v32  ;;  %v2073_v36 = vpop.f32.mrf.mxu1 }
  0xf2   : > { %v2074_v37 = vadd.f32 %v2073_v36, %v2072_v33  ;;  %v1963_v38 = vpop.f32.mrf.mxu0 }
  0xf3   : > { %v2075_v39 = vpop.f32.mrf.mxu1 }
  0xf4   : > { %v1132_v40 = vadd.f32 %v2074_v37, %v1962_v35  ;;  %v1964_v42 = vpop.f32.mrf.mxu0 }
  0xf5   : > { %v1965_v43 = vadd.f32 %v1964_v42, %v1963_v38  ;;  %v2076_v44 = vpop.f32.mrf.mxu1 }
  0xf6   : > { %v2077_v45 = vadd.f32 %v2076_v44, %v2075_v39  ;;  %v1966_v46 = vpop.f32.mrf.mxu0  ;;  %v1364_v47 = vadd.f32 %v2620_v41, %v1132_v40 }
  0xf7   : > { %v2078_v48 = vpop.f32.mrf.mxu1 }
  0xf8   : > { %v1135_v49 = vadd.f32 %v2077_v45, %v1965_v43  ;;  %v1967_v50 = vpop.f32.mrf.mxu0  ;;  %2320 = vtanh.f32 %v1364_v47 }
  0xf9   : > { %v1968_v51 = vadd.f32 %v1967_v50, %v1966_v46  ;;  %v2079_v52 = vpop.f32.mrf.mxu1 }
  0xfa   : > { %v1365_v53 = vadd.f32 %v2620_v41, %v1135_v49  ;;  %v2080_v54 = vadd.f32 %v2079_v52, %v2078_v48  ;;  %v1969_v55 = vpop.f32.mrf.mxu0 }
  0xfb   : > { %v2081_v56 = vpop.f32.mrf.mxu1 }
  0xfc   : > { %2322 = vtanh.f32 %v1365_v53  ;;  %v1140_v57 = vadd.f32 %v2080_v54, %v1968_v51  ;;  %v1970_v58 = vpop.f32.mrf.mxu0 }
  0xfd   : > { %v1971_v59 = vadd.f32 %v1970_v58, %v1969_v55  ;;  %v2082_v60 = vpop.f32.mrf.mxu1 }
  0xfe   : > { %v2083_v61 = vadd.f32 %v2082_v60, %v2081_v56  ;;  %v1972_v62 = vpop.f32.mrf.mxu0  ;;  %v1366_v63 = vadd.f32 %v2620_v41, %v1140_v57 }
  0xff   : > { %v2084_v0 = vpop.f32.mrf.mxu1 }
 0x100   : > { %v1143_v1 = vadd.f32 %v2083_v61, %v1971_v59  ;;  %v1973_v2 = vpop.f32.mrf.mxu0  ;;  %2324 = vtanh.f32 %v1366_v63 }
 0x101   : > { %v1974_v3 = vadd.f32 %v1973_v2, %v1972_v62  ;;  %v2085_v4 = vpop.f32.mrf.mxu1 }
 0x102   : > { %v1367_v5 = vadd.f32 %v2620_v41, %v1143_v1  ;;  %v2086_v6 = vadd.f32 %v2085_v4, %v2084_v0  ;;  %v1975_v7 = vpop.f32.mrf.mxu0 }
 0x103   : > { %v2087_v8 = vpop.f32.mrf.mxu1 }
 0x104   : > { %2326 = vtanh.f32 %v1367_v5  ;;  %v1148_v9 = vadd.f32 %v2086_v6, %v1974_v3  ;;  %v1976_v10 = vpop.f32.mrf.mxu0 }
 0x105   : > { %v1977_v11 = vadd.f32 %v1976_v10, %v1975_v7  ;;  %v2088_v12 = vpop.f32.mrf.mxu1  ;;  %v2321_v17 = vpop.eup %2320 }
 0x106   : > { %v2089_v13 = vadd.f32 %v2088_v12, %v2087_v8  ;;  %v1978_v14 = vpop.f32.mrf.mxu0  ;;  %v1368_v15 = vadd.f32 %v2620_v41, %v1148_v9 }
 0x107   : > { %v2090_v16 = vpop.f32.mrf.mxu1 }
 0x108   : > { %v1151_v18 = vadd.f32 %v2089_v13, %v1977_v11  ;;  %v1979_v19 = vpop.f32.mrf.mxu0  ;;  %2328 = vtanh.f32 %v1368_v15 }
 0x109   : > { %v2323_v20 = vpop.eup %2322  ;;  %v1980_v21 = vadd.f32 %v1979_v19, %v1978_v14  ;;  %v2091_v22 = vpop.f32.mrf.mxu1 }
 0x10a   : > { %v1852_v23 = vpack.c.bf16 %v2323_v20, %v2321_v17  ;;  %v1369_v24 = vadd.f32 %v2620_v41, %v1151_v18  ;;  %v2092_v25 = vadd.f32 %v2091_v22, %v2090_v16  ;;  %v1981_v26 = vpop.f32.mrf.mxu0 }
 0x10b   : > { %v2093_v27 = vpop.f32.mrf.mxu1 }
 0x10c   : > { %1853 = vst [vmem:[%s2631_s20] sm:$0xff] %v1852_v23   ;;  %2330 = vtanh.f32 %v1369_v24  ;;  %v1156_v28 = vadd.f32 %v2092_v25, %v1980_v21  ;;  %v1982_v29 = vpop.f32.mrf.mxu0 }
 0x10d   : > { %v1983_v30 = vadd.f32 %v1982_v29, %v1981_v26  ;;  %v2094_v31 = vpop.f32.mrf.mxu1  ;;  %v2325_v36 = vpop.eup %2324 }
 0x10e   : > { %v2095_v32 = vadd.f32 %v2094_v31, %v2093_v27  ;;  %v1984_v33 = vpop.f32.mrf.mxu0  ;;  %v1370_v34 = vadd.f32 %v2620_v41, %v1156_v28 }
 0x10f   : > { %v2096_v35 = vpop.f32.mrf.mxu1 }
 0x110   : > { %v1159_v37 = vadd.f32 %v2095_v32, %v1983_v30  ;;  %v1985_v38 = vpop.f32.mrf.mxu0  ;;  %2332 = vtanh.f32 %v1370_v34 }
 0x111   : > { %v2327_v39 = vpop.eup %2326  ;;  %v1986_v40 = vadd.f32 %v1985_v38, %v1984_v33  ;;  %v2097_v42 = vpop.f32.mrf.mxu1 }
 0x112   : > { %v1857_v43 = vpack.c.bf16 %v2327_v39, %v2325_v36  ;;  %v1371_v44 = vadd.f32 %v2620_v41, %v1159_v37  ;;  %v2098_v45 = vadd.f32 %v2097_v42, %v2096_v35  ;;  %v1987_v46 = vpop.f32.mrf.mxu0 }
 0x113   : > { %v2099_v47 = vpop.f32.mrf.mxu1 }
 0x114   : > { %1929 = vst [vmem:[%s2631_s20 + $0x8] sm:$0xff] %v1857_v43   ;;  %2334 = vtanh.f32 %v1371_v44  ;;  %v1164_v48 = vadd.f32 %v2098_v45, %v1986_v40  ;;  %v1988_v49 = vpop.f32.mrf.mxu0 }
 0x115   : > { %v1989_v50 = vadd.f32 %v1988_v49, %v1987_v46  ;;  %v2100_v51 = vpop.f32.mrf.mxu1  ;;  %v2329_v56 = vpop.eup %2328 }
 0x116   : > { %v2101_v52 = vadd.f32 %v2100_v51, %v2099_v47  ;;  %v1990_v53 = vpop.f32.mrf.mxu0  ;;  %v1372_v54 = vadd.f32 %v2620_v41, %v1164_v48 }
 0x117   : > { %v2102_v55 = vpop.f32.mrf.mxu1 }
 0x118   : > { %v1167_v57 = vadd.f32 %v2101_v52, %v1989_v50  ;;  %v1991_v58 = vpop.f32.mrf.mxu0  ;;  %2336 = vtanh.f32 %v1372_v54 }
 0x119   : > { %v2331_v59 = vpop.eup %2330  ;;  %v1992_v60 = vadd.f32 %v1991_v58, %v1990_v53  ;;  %v2103_v61 = vpop.f32.mrf.mxu1 }
 0x11a   : > { %v1862_v62 = vpack.c.bf16 %v2331_v59, %v2329_v56  ;;  %v1373_v63 = vadd.f32 %v2620_v41, %v1167_v57  ;;  %v2104_v0 = vadd.f32 %v2103_v61, %v2102_v55  ;;  %v1993_v1 = vpop.f32.mrf.mxu0 }
 0x11b   : > { %v2105_v2 = vpop.f32.mrf.mxu1 }
 0x11c   : > { %1930 = vst [vmem:[%s2631_s20 + $0x10] sm:$0xff] %v1862_v62   ;;  %2338 = vtanh.f32 %v1373_v63  ;;  %v1172_v3 = vadd.f32 %v2104_v0, %v1992_v60  ;;  %v1994_v4 = vpop.f32.mrf.mxu0 }
 0x11d   : > { %v1995_v5 = vadd.f32 %v1994_v4, %v1993_v1  ;;  %v2106_v6 = vpop.f32.mrf.mxu1  ;;  %v2333_v11 = vpop.eup %2332 }
 0x11e   : > { %v2107_v7 = vadd.f32 %v2106_v6, %v2105_v2  ;;  %v1996_v8 = vpop.f32.mrf.mxu0  ;;  %v1374_v9 = vadd.f32 %v2620_v41, %v1172_v3 }
 0x11f   : > { %v2108_v10 = vpop.f32.mrf.mxu1 }
 0x120   : > { %v1175_v12 = vadd.f32 %v2107_v7, %v1995_v5  ;;  %v1997_v13 = vpop.f32.mrf.mxu0  ;;  %2340 = vtanh.f32 %v1374_v9 }
 0x121   : > { %v2335_v14 = vpop.eup %2334  ;;  %v1998_v15 = vadd.f32 %v1997_v13, %v1996_v8  ;;  %v2109_v16 = vpop.f32.mrf.mxu1 }
 0x122   : > { %v1867_v17 = vpack.c.bf16 %v2335_v14, %v2333_v11  ;;  %v1375_v18 = vadd.f32 %v2620_v41, %v1175_v12  ;;  %v2110_v19 = vadd.f32 %v2109_v16, %v2108_v10  ;;  %v1999_v20 = vpop.f32.mrf.mxu0 }
 0x123   : > { %v2111_v21 = vpop.f32.mrf.mxu1 }
 0x124   : > { %1931 = vst [vmem:[%s2631_s20 + $0x18] sm:$0xff] %v1867_v17   ;;  %2342 = vtanh.f32 %v1375_v18  ;;  %v1180_v22 = vadd.f32 %v2110_v19, %v1998_v15  ;;  %v2000_v23 = vpop.f32.mrf.mxu0 }
 0x125   : > { %v2001_v24 = vadd.f32 %v2000_v23, %v1999_v20  ;;  %v2112_v25 = vpop.f32.mrf.mxu1  ;;  %v2337_v30 = vpop.eup %2336 }
 0x126   : > { %v2113_v26 = vadd.f32 %v2112_v25, %v2111_v21  ;;  %v2002_v27 = vpop.f32.mrf.mxu0  ;;  %v1376_v28 = vadd.f32 %v2620_v41, %v1180_v22 }
 0x127   : > { %v2114_v29 = vpop.f32.mrf.mxu1 }
 0x128   : > { %v1183_v31 = vadd.f32 %v2113_v26, %v2001_v24  ;;  %v2003_v32 = vpop.f32.mrf.mxu0  ;;  %2344 = vtanh.f32 %v1376_v28 }
 0x129   : > { %v2339_v33 = vpop.eup %2338  ;;  %v2004_v34 = vadd.f32 %v2003_v32, %v2002_v27  ;;  %v2115_v35 = vpop.f32.mrf.mxu1 }
 0x12a   : > { %v1872_v36 = vpack.c.bf16 %v2339_v33, %v2337_v30  ;;  %v1377_v37 = vadd.f32 %v2620_v41, %v1183_v31  ;;  %v2116_v38 = vadd.f32 %v2115_v35, %v2114_v29  ;;  %v2005_v39 = vpop.f32.mrf.mxu0 }
 0x12b   : > { %v2117_v40 = vpop.f32.mrf.mxu1 }
 0x12c   : > { %1932 = vst [vmem:[%s2631_s20 + $0x20] sm:$0xff] %v1872_v36   ;;  %2346 = vtanh.f32 %v1377_v37  ;;  %v1188_v42 = vadd.f32 %v2116_v38, %v2004_v34  ;;  %v2006_v43 = vpop.f32.mrf.mxu0 }
 0x12d   : > { %v2007_v44 = vadd.f32 %v2006_v43, %v2005_v39  ;;  %v2118_v45 = vpop.f32.mrf.mxu1  ;;  %v2341_v50 = vpop.eup %2340 }
 0x12e   : > { %v2119_v46 = vadd.f32 %v2118_v45, %v2117_v40  ;;  %v2008_v47 = vpop.f32.mrf.mxu0  ;;  %v1378_v48 = vadd.f32 %v2620_v41, %v1188_v42 }
 0x12f   : > { %v2120_v49 = vpop.f32.mrf.mxu1 }
 0x130   : > { %v1191_v51 = vadd.f32 %v2119_v46, %v2007_v44  ;;  %v2009_v52 = vpop.f32.mrf.mxu0  ;;  %2348 = vtanh.f32 %v1378_v48 }
 0x131   : > { %v2343_v53 = vpop.eup %2342  ;;  %v2010_v54 = vadd.f32 %v2009_v52, %v2008_v47  ;;  %v2121_v55 = vpop.f32.mrf.mxu1 }
 0x132   : > { %v1877_v56 = vpack.c.bf16 %v2343_v53, %v2341_v50  ;;  %v1379_v57 = vadd.f32 %v2620_v41, %v1191_v51  ;;  %v2122_v58 = vadd.f32 %v2121_v55, %v2120_v49  ;;  %v2011_v59 = vpop.f32.mrf.mxu0 }
 0x133   : > { %v2123_v60 = vpop.f32.mrf.mxu1 }
 0x134   : > { %1933 = vst [vmem:[%s2631_s20 + $0x28] sm:$0xff] %v1877_v56   ;;  %2350 = vtanh.f32 %v1379_v57  ;;  %v1196_v61 = vadd.f32 %v2122_v58, %v2010_v54  ;;  %v2012_v62 = vpop.f32.mrf.mxu0 }
 0x135   : > { %v2013_v63 = vadd.f32 %v2012_v62, %v2011_v59  ;;  %v2124_v0 = vpop.f32.mrf.mxu1  ;;  %v2345_v5 = vpop.eup %2344 }
 0x136   : > { %v2125_v1 = vadd.f32 %v2124_v0, %v2123_v60  ;;  %v2014_v2 = vpop.f32.mrf.mxu0  ;;  %v1380_v3 = vadd.f32 %v2620_v41, %v1196_v61 }
 0x137   : > { %v2126_v4 = vpop.f32.mrf.mxu1 }
 0x138   : > { %v1199_v6 = vadd.f32 %v2125_v1, %v2013_v63  ;;  %v2015_v7 = vpop.f32.mrf.mxu0  ;;  %2352 = vtanh.f32 %v1380_v3 }
 0x139   : > { %v2347_v8 = vpop.eup %2346  ;;  %v2016_v9 = vadd.f32 %v2015_v7, %v2014_v2  ;;  %v2127_v10 = vpop.f32.mrf.mxu1 }
 0x13a   : > { %v1882_v11 = vpack.c.bf16 %v2347_v8, %v2345_v5  ;;  %v1381_v12 = vadd.f32 %v2620_v41, %v1199_v6  ;;  %v2128_v13 = vadd.f32 %v2127_v10, %v2126_v4  ;;  %v2017_v14 = vpop.f32.mrf.mxu0 }
 0x13b   : > { %v2129_v15 = vpop.f32.mrf.mxu1 }
 0x13c   : > { %1934 = vst [vmem:[%s2631_s20 + $0x30] sm:$0xff] %v1882_v11   ;;  %2354 = vtanh.f32 %v1381_v12  ;;  %v1204_v16 = vadd.f32 %v2128_v13, %v2016_v9  ;;  %v2018_v17 = vpop.f32.mrf.mxu0 }
 0x13d   : > { %v2019_v18 = vadd.f32 %v2018_v17, %v2017_v14  ;;  %v2130_v19 = vpop.f32.mrf.mxu1  ;;  %v2349_v24 = vpop.eup %2348 }
 0x13e   : > { %v2131_v20 = vadd.f32 %v2130_v19, %v2129_v15  ;;  %v2020_v21 = vpop.f32.mrf.mxu0  ;;  %v1382_v22 = vadd.f32 %v2620_v41, %v1204_v16 }
 0x13f   : > { %v2132_v23 = vpop.f32.mrf.mxu1 }
 0x140   : > { %v1207_v25 = vadd.f32 %v2131_v20, %v2019_v18  ;;  %v2021_v26 = vpop.f32.mrf.mxu0  ;;  %2356 = vtanh.f32 %v1382_v22 }
 0x141   : > { %v2351_v27 = vpop.eup %2350  ;;  %v2022_v28 = vadd.f32 %v2021_v26, %v2020_v21  ;;  %v2133_v29 = vpop.f32.mrf.mxu1 }
 0x142   : > { %v1887_v30 = vpack.c.bf16 %v2351_v27, %v2349_v24  ;;  %v1383_v31 = vadd.f32 %v2620_v41, %v1207_v25  ;;  %v2134_v32 = vadd.f32 %v2133_v29, %v2132_v23  ;;  %v2023_v33 = vpop.f32.mrf.mxu0 }
 0x143   : > { %v2135_v34 = vpop.f32.mrf.mxu1 }
 0x144   : > { %1935 = vst [vmem:[%s2631_s20 + $0x38] sm:$0xff] %v1887_v30   ;;  %2358 = vtanh.f32 %v1383_v31  ;;  %v1212_v35 = vadd.f32 %v2134_v32, %v2022_v28  ;;  %v2024_v36 = vpop.f32.mrf.mxu0 }
 0x145   : > { %v2025_v37 = vadd.f32 %v2024_v36, %v2023_v33  ;;  %v2136_v38 = vpop.f32.mrf.mxu1  ;;  %v2353_v44 = vpop.eup %2352 }
 0x146   : > { %v2137_v39 = vadd.f32 %v2136_v38, %v2135_v34  ;;  %v2026_v40 = vpop.f32.mrf.mxu0  ;;  %v1384_v42 = vadd.f32 %v2620_v41, %v1212_v35 }
 0x147   : > { %v2138_v43 = vpop.f32.mrf.mxu1 }
 0x148   : > { %v1215_v45 = vadd.f32 %v2137_v39, %v2025_v37  ;;  %v2027_v46 = vpop.f32.mrf.mxu0  ;;  %2360 = vtanh.f32 %v1384_v42 }
 0x149   : > { %v2355_v47 = vpop.eup %2354  ;;  %v2028_v48 = vadd.f32 %v2027_v46, %v2026_v40  ;;  %v2139_v49 = vpop.f32.mrf.mxu1 }
 0x14a   : > { %v1892_v50 = vpack.c.bf16 %v2355_v47, %v2353_v44  ;;  %v1385_v51 = vadd.f32 %v2620_v41, %v1215_v45  ;;  %v2140_v52 = vadd.f32 %v2139_v49, %v2138_v43  ;;  %v2029_v53 = vpop.f32.mrf.mxu0 }
 0x14b   : > { %v2141_v54 = vpop.f32.mrf.mxu1 }
 0x14c   : > { %1936 = vst [vmem:[%s2631_s20 + $0x40] sm:$0xff] %v1892_v50   ;;  %2362 = vtanh.f32 %v1385_v51  ;;  %v1220_v55 = vadd.f32 %v2140_v52, %v2028_v48  ;;  %v2030_v56 = vpop.f32.mrf.mxu0 }
 0x14d   : > { %v2031_v57 = vadd.f32 %v2030_v56, %v2029_v53  ;;  %v2142_v58 = vpop.f32.mrf.mxu1  ;;  %v2357_v63 = vpop.eup %2356 }
 0x14e   : > { %v2143_v59 = vadd.f32 %v2142_v58, %v2141_v54  ;;  %v2032_v60 = vpop.f32.mrf.mxu0  ;;  %v1386_v61 = vadd.f32 %v2620_v41, %v1220_v55 }
 0x14f   : > { %v2144_v62 = vpop.f32.mrf.mxu1 }
 0x150   : > { %v1223_v0 = vadd.f32 %v2143_v59, %v2031_v57  ;;  %v2033_v1 = vpop.f32.mrf.mxu0  ;;  %2364 = vtanh.f32 %v1386_v61 }
 0x151   : > { %v2359_v2 = vpop.eup %2358  ;;  %v2034_v3 = vadd.f32 %v2033_v1, %v2032_v60  ;;  %v2145_v4 = vpop.f32.mrf.mxu1 }
 0x152   : > { %v1897_v5 = vpack.c.bf16 %v2359_v2, %v2357_v63  ;;  %v1387_v6 = vadd.f32 %v2620_v41, %v1223_v0  ;;  %v2146_v7 = vadd.f32 %v2145_v4, %v2144_v62  ;;  %v2035_v8 = vpop.f32.mrf.mxu0 }
 0x153   : > { %v2147_v9 = vpop.f32.mrf.mxu1 }
 0x154   : > { %1937 = vst [vmem:[%s2631_s20 + $0x48] sm:$0xff] %v1897_v5   ;;  %2366 = vtanh.f32 %v1387_v6  ;;  %v1228_v10 = vadd.f32 %v2146_v7, %v2034_v3  ;;  %v2036_v11 = vpop.f32.mrf.mxu0 }
 0x155   : > { %v2037_v12 = vadd.f32 %v2036_v11, %v2035_v8  ;;  %v2148_v13 = vpop.f32.mrf.mxu1  ;;  %v2361_v18 = vpop.eup %2360 }
 0x156   : > { %v2149_v14 = vadd.f32 %v2148_v13, %v2147_v9  ;;  %v2038_v15 = vpop.f32.mrf.mxu0  ;;  %v1388_v16 = vadd.f32 %v2620_v41, %v1228_v10 }
 0x157   : > { %v2150_v17 = vpop.f32.mrf.mxu1 }
 0x158   : > { %v1231_v19 = vadd.f32 %v2149_v14, %v2037_v12  ;;  %v2039_v20 = vpop.f32.mrf.mxu0  ;;  %2368 = vtanh.f32 %v1388_v16 }
 0x159   : > { %v2363_v21 = vpop.eup %2362  ;;  %v2040_v22 = vadd.f32 %v2039_v20, %v2038_v15  ;;  %v2151_v23 = vpop.f32.mrf.mxu1 }
 0x15a   : > { %v1902_v24 = vpack.c.bf16 %v2363_v21, %v2361_v18  ;;  %v1389_v25 = vadd.f32 %v2620_v41, %v1231_v19  ;;  %v2152_v26 = vadd.f32 %v2151_v23, %v2150_v17  ;;  %v2041_v27 = vpop.f32.mrf.mxu0 }
 0x15b   : > { %v2153_v28 = vpop.f32.mrf.mxu1 }
 0x15c   : > { %1938 = vst [vmem:[%s2631_s20 + $0x50] sm:$0xff] %v1902_v24   ;;  %2370 = vtanh.f32 %v1389_v25  ;;  %v1236_v29 = vadd.f32 %v2152_v26, %v2040_v22  ;;  %v2042_v30 = vpop.f32.mrf.mxu0 }
 0x15d   : > { %v2043_v31 = vadd.f32 %v2042_v30, %v2041_v27  ;;  %v2154_v32 = vpop.f32.mrf.mxu1  ;;  %v2365_v37 = vpop.eup %2364 }
 0x15e   : > { %v2155_v33 = vadd.f32 %v2154_v32, %v2153_v28  ;;  %v2044_v34 = vpop.f32.mrf.mxu0  ;;  %v1390_v35 = vadd.f32 %v2620_v41, %v1236_v29 }
 0x15f   : > { %v2156_v36 = vpop.f32.mrf.mxu1 }
 0x160   : > { %v1239_v38 = vadd.f32 %v2155_v33, %v2043_v31  ;;  %v2045_v39 = vpop.f32.mrf.mxu0  ;;  %2372 = vtanh.f32 %v1390_v35 }
 0x161   : > { %v2367_v40 = vpop.eup %2366  ;;  %v2046_v42 = vadd.f32 %v2045_v39, %v2044_v34  ;;  %v2157_v43 = vpop.f32.mrf.mxu1 }
 0x162   : > { %v1907_v44 = vpack.c.bf16 %v2367_v40, %v2365_v37  ;;  %v1391_v45 = vadd.f32 %v2620_v41, %v1239_v38  ;;  %v2158_v46 = vadd.f32 %v2157_v43, %v2156_v36  ;;  %v2047_v47 = vpop.f32.mrf.mxu0 }
 0x163   : > { %v2159_v48 = vpop.f32.mrf.mxu1 }
 0x164   : > { %1939 = vst [vmem:[%s2631_s20 + $0x58] sm:$0xff] %v1907_v44   ;;  %2374 = vtanh.f32 %v1391_v45  ;;  %v1244_v49 = vadd.f32 %v2158_v46, %v2046_v42  ;;  %v2048_v50 = vpop.f32.mrf.mxu0 }
 0x165   : > { %v2049_v51 = vadd.f32 %v2048_v50, %v2047_v47  ;;  %v2160_v52 = vpop.f32.mrf.mxu1  ;;  %v2369_v57 = vpop.eup %2368 }
 0x166   : > { %v2161_v53 = vadd.f32 %v2160_v52, %v2159_v48  ;;  %v2050_v54 = vpop.f32.mrf.mxu0  ;;  %v1392_v55 = vadd.f32 %v2620_v41, %v1244_v49 }
 0x167   : > { %v2162_v56 = vpop.f32.mrf.mxu1 }
 0x168   : > { %v1247_v58 = vadd.f32 %v2161_v53, %v2049_v51  ;;  %v2051_v59 = vpop.f32.mrf.mxu0  ;;  %2376 = vtanh.f32 %v1392_v55 }
 0x169   : > { %v2371_v60 = vpop.eup %2370  ;;  %v2052_v61 = vadd.f32 %v2051_v59, %v2050_v54  ;;  %v2163_v62 = vpop.f32.mrf.mxu1 }
 0x16a   : > { %v1912_v63 = vpack.c.bf16 %v2371_v60, %v2369_v57  ;;  %v1393_v0 = vadd.f32 %v2620_v41, %v1247_v58  ;;  %v2164_v1 = vadd.f32 %v2163_v62, %v2162_v56  ;;  %v2053_v2 = vpop.f32.mrf.mxu0 }
 0x16b   : > { %v2165_v3 = vpop.f32.mrf.mxu1 }
 0x16c   : > { %1940 = vst [vmem:[%s2631_s20 + $0x60] sm:$0xff] %v1912_v63   ;;  %2378 = vtanh.f32 %v1393_v0  ;;  %v1252_v4 = vadd.f32 %v2164_v1, %v2052_v61  ;;  %v2054_v5 = vpop.f32.mrf.mxu0 }
 0x16d   : > { %v2055_v6 = vadd.f32 %v2054_v5, %v2053_v2  ;;  %v2166_v7 = vpop.f32.mrf.mxu1  ;;  %v2373_v10 = vpop.eup %2372 }
 0x16e   : > { %v2167_v8 = vadd.f32 %v2166_v7, %v2165_v3  ;;  %v1394_v9 = vadd.f32 %v2620_v41, %v1252_v4 }
 0x170   : > { %v1255_v11 = vadd.f32 %v2167_v8, %v2055_v6  ;;  %2380 = vtanh.f32 %v1394_v9 }
 0x171   : > { %v2375_v12 = vpop.eup %2374 }
 0x172   : > { %v1917_v13 = vpack.c.bf16 %v2375_v12, %v2373_v10  ;;  %v1395_v14 = vadd.f32 %v2620_v41, %v1255_v11 }
 0x174   : > { %1941 = vst [vmem:[%s2631_s20 + $0x68] sm:$0xff] %v1917_v13   ;;  %2382 = vtanh.f32 %v1395_v14 }
 0x175   : > { %v2377_v15 = vpop.eup %2376 }
 0x179   : > { %v2379_v16 = vpop.eup %2378 }
 0x17a   : > { %v1922_v17 = vpack.c.bf16 %v2379_v16, %v2377_v15 }
 0x17c   : > { %1942 = vst [vmem:[%s2631_s20 + $0x70] sm:$0xff] %v1922_v17  }
 0x17d   : > { %v2381_v18 = vpop.eup %2380 }
 0x181   : > { %v2383_v19 = vpop.eup %2382 }
 0x182   : > { %v1927_v20 = vpack.c.bf16 %v2383_v19, %v2381_v18 }
 0x184   : > { %1943 = vst [vmem:[%s2631_s20 + $0x78] sm:$0xff] %v1927_v20  }
 0x185 PF: > { %s13_s14 = sadd.s32 1, %s2406_s14   ;;  %s2689_s12 = smov %s2402_s13 }
 0x186   : > { %p10_p5 = scmp.ge.s32.totalorder %s13_s14, 4   ;;  %s2690_s13 = smov %s2692_s15 }
 0x188   :  { %12 = sbr.rel (!%p10_p5) target bundleno = 2 (0x2), region = 73 }

</bundles_post_ra>
